<compile_context>
chip_gen: v7x
topology: tpu7x:2x2x1
jax: 0.10.0
libtpu: 0.0.40
codegen_flags: <defaults>
</compile_context>

<pallas_src>
import jax
import jax.numpy as jnp
from jax.experimental import pallas as pl
from jax.experimental.pallas import tpu as pltpu

LANE = 128


def _round_up(x, m):
    return (x + m - 1) // m * m


def _cdiv(a, b):
    return -(-a // b)


# ----------------------------------------------------------------------------
# In-kernel GRU layer (PyTorch nn.GRU semantics, gate order r, z, n; h0 = 0).
# Operates on the lane-padded hidden width Hp; padded units stay exactly 0.
# ----------------------------------------------------------------------------
def _gru_layer(xin, wih, whh, bx, bhn, T, B, seq_ref):
    """xin : (T*B, Din) bf16, time-major rows [t0: all b, t1: all b, ...]
    wih : (Din, 3H) bf16  fused input-gate weights  [r | z | n]
    whh : (H,   3H) bf16  fused hidden-gate weights [r | z | n]
    bx  : (1,   3H) f32   [b_ir+b_hr | b_iz+b_hz | b_in]
    bhn : (1,    H) f32   b_hn (sits inside r * (...))
    seq_ref: bf16 VMEM scratch (>= (T*B, H)) to receive the full sequence, or None.
    Returns h_T : (B, H) f32.
    """
    H = whh.shape[0]

    # Hoisted fused input-gate matmul: one wide dot for all gates & timesteps.
    xg = (jnp.dot(xin, wih, preferred_element_type=jnp.float32) + bx).reshape(T, B, 3 * H)
    bhn_b = jnp.broadcast_to(bhn, (B, H))            # broadcast hoisted out of the loop

    # t = 0: h_{-1} = 0, so every h @ W_h* term vanishes.
    r = jax.nn.sigmoid(xg[0, :, 0:H])
    z = jax.nn.sigmoid(xg[0, :, H:2 * H])
    n = jnp.tanh(xg[0, :, 2 * H:] + r * bhn_b)
    h = (1.0 - z) * n
    if seq_ref is not None:
        seq_ref[pl.ds(0, B), pl.ds(0, H)] = h.astype(jnp.bfloat16)

    # Fully unrolled recurrence: ONE fused (B,H)x(H,3H) bf16 dot per timestep.
    for t in range(1, T):
        hg = jnp.dot(h.astype(jnp.bfloat16), whh, preferred_element_type=jnp.float32)
        r = jax.nn.sigmoid(xg[t, :, 0:H] + hg[:, 0:H])
        z = jax.nn.sigmoid(xg[t, :, H:2 * H] + hg[:, H:2 * H])
        n = jnp.tanh(xg[t, :, 2 * H:] + r * (hg[:, 2 * H:] + bhn_b))
        h = (1.0 - z) * n + z * h
        if seq_ref is not None:
            seq_ref[pl.ds(t * B, B), pl.ds(0, H)] = h.astype(jnp.bfloat16)
    return h


# ----------------------------------------------------------------------------
# Fused forward kernel: projection MLP + GRU stack + last-timestep classifier.
# ----------------------------------------------------------------------------
def _rnn_fused_kernel(x_ref, w1_ref, b1_ref, w2_ref, b2_ref, *rest):
    seq_ref = rest[-1]                               # bf16 VMEM scratch (inter-layer seq)
    o_ref = rest[-2]
    wfc_ref, bfc_ref = rest[-4], rest[-3]
    gru_refs = rest[:-4]                             # 4 refs per GRU layer

    T, B, F = x_ref.shape

    # Projection MLP over all T*B tokens (bf16 MXU operands, f32 accumulation).
    x = x_ref[...].reshape(T * B, F).astype(jnp.bfloat16)
    h = jnp.dot(x, w1_ref[...], preferred_element_type=jnp.float32) + b1_ref[...]
    h = jnp.maximum(h, 0.0)
    h = jnp.dot(h.astype(jnp.bfloat16), w2_ref[...],
                preferred_element_type=jnp.float32) + b2_ref[...]
    h = jnp.maximum(h, 0.0)                          # (T*B, M)

    # GRU stack: non-final layers write their sequence into seq_ref (bf16); the
    # last layer only produces h_T (classify takes the last timestep).
    n_gru = len(gru_refs) // 4
    xin = h.astype(jnp.bfloat16)
    h_last = None
    for l in range(n_gru):
        wih_ref, whh_ref, bx_ref, bhn_ref = gru_refs[4 * l: 4 * l + 4]
        last = l == n_gru - 1
        h_last = _gru_layer(xin, wih_ref[...], whh_ref[...], bx_ref[...], bhn_ref[...],
                            T, B, None if last else seq_ref)
        if not last:
            xin = seq_ref[pl.ds(0, T * B), pl.ds(0, whh_ref.shape[0])]   # (T*B, H) bf16

    # Final classifier on h_T (lane-dense 128-wide padded output slab).
    logits = jnp.dot(h_last.astype(jnp.bfloat16), wfc_ref[...],
                     preferred_element_type=jnp.float32) + bfc_ref[...]
    o_ref[...] = logits.astype(o_ref.dtype)


# ----------------------------------------------------------------------------
# Parameter init (PyTorch layout / scales).
# ----------------------------------------------------------------------------
def _uniform(key, shape, scale):
    return jax.random.uniform(key, shape, jnp.float32, -scale, scale)


def init_params(key, feature_dim=3, model_size=32, n_classes=10):
    M = model_size
    keys = iter(jax.random.split(key, 32))
    params = {}

    def lin(din, dout):
        s = 1.0 / jnp.sqrt(din)
        return _uniform(next(keys), (dout, din), s), _uniform(next(keys), (1, dout), s)

    # Projection MLP: [F, 2M, M]
    params["w1"], params["b1"] = lin(feature_dim, 2 * M)
    params["w2"], params["b2"] = lin(2 * M, M)

    # GRU stack sizes: [M, 4M, 4M, M]  (PyTorch layout: wih (3H,Din), whh (3H,H))
    gru_sizes = [M, 4 * M, 4 * M, M]
    grus = []
    for i in range(1, len(gru_sizes)):
        din, hh = gru_sizes[i - 1], gru_sizes[i]
        s = 1.0 / jnp.sqrt(hh)
        grus.append({
            "wih": _uniform(next(keys), (3 * hh, din), s),
            "whh": _uniform(next(keys), (3 * hh, hh), s),
            "bih": _uniform(next(keys), (1, 3 * hh), s),
            "bhh": _uniform(next(keys), (1, 3 * hh), s),
        })
    params["grus"] = grus

    # final classifier
    params["wfc"], params["bfc"] = lin(M, n_classes)
    return params


# ----------------------------------------------------------------------------
# PyTorch layout -> fused kernel layout.
# ----------------------------------------------------------------------------
def _prep_params(params):
    """* Linear weights transposed to (Din, Dout), bf16 (f32 accumulation in-kernel).
    * GRU gates fused into wide blocks wih:(Din, 3*Hp) / whh:(Hp, 3*Hp), order [r|z|n];
      hidden sizes below a 128-lane multiple are zero-padded to Hp = round_up(H, 128)
      so gate slices of the fused 3H slab are 128-lane aligned (padded units stay 0).
    * r/z biases pre-folded (b_i* + b_h*); b_hn kept separate (inside r * (...)).
    * Classifier weight padded to (Hp_last, round_up(C, 128)) -> lane-dense output.
    """
    M = params["w2"].shape[0]

    p = {
        "w1": params["w1"].T.astype(jnp.bfloat16),
        "b1": params["b1"],
        "w2": params["w2"].T.astype(jnp.bfloat16),
        "b2": params["b2"],
    }

    grus = []
    din_feed = M
    for g in params["grus"]:
        H = g["whh"].shape[1]
        din = g["wih"].shape[1]
        Hp = _round_up(H, LANE)
        wih_g = jnp.transpose(g["wih"].reshape(3, H, din), (0, 2, 1))   # (3, din, H)
        whh_g = jnp.transpose(g["whh"].reshape(3, H, H), (0, 2, 1))     # (3, H, H)
        bih_g = g["bih"].reshape(3, H)
        bhh_g = g["bhh"].reshape(3, H)

        wih = jnp.zeros((din_feed, 3 * Hp), jnp.float32)
        whh = jnp.zeros((Hp, 3 * Hp), jnp.float32)
        bx = jnp.zeros((1, 3 * Hp), jnp.float32)
        for k in range(3):
            wih = wih.at[:din, k * Hp:k * Hp + H].set(wih_g[k])
            whh = whh.at[:H, k * Hp:k * Hp + H].set(whh_g[k])
        bx = bx.at[0, 0:H].set(bih_g[0] + bhh_g[0])
        bx = bx.at[0, Hp:Hp + H].set(bih_g[1] + bhh_g[1])
        bx = bx.at[0, 2 * Hp:2 * Hp + H].set(bih_g[2])                  # b_in only
        bhn = jnp.zeros((1, Hp), jnp.float32).at[0, :H].set(bhh_g[2])   # b_hn separate

        grus.append({"wih": wih.astype(jnp.bfloat16),
                     "whh": whh.astype(jnp.bfloat16),
                     "bx": bx, "bhn": bhn})
        din_feed = Hp
    p["grus"] = grus

    C = params["bfc"].shape[-1]
    Cp = _round_up(C, LANE)
    wfc = jnp.zeros((din_feed, Cp), jnp.float32)
    wfc = wfc.at[:params["wfc"].shape[1], :C].set(params["wfc"].T)
    bfc = jnp.zeros((1, Cp), jnp.float32).at[0, :C].set(params["bfc"][0])
    p["wfc"] = wfc.astype(jnp.bfloat16)
    p["bfc"] = bfc
    return p


def _pick_bb(nb, batch_block):
    """Divisor-aware batch block; >= 2 grid blocks whenever nb >= 16 so both v7x
    TensorCores get work under dimension_semantics=("parallel",), and padding waste
    stays under one sublane tile."""
    if nb <= 8:
        return 8
    n_blocks = max(2, _cdiv(nb, batch_block))
    return _round_up(_cdiv(nb, n_blocks), 8)


# ----------------------------------------------------------------------------
# Full forward pass (classify=True, use_fc=True)
# ----------------------------------------------------------------------------
def rnn_model_forward(params, src, *, batch_block=256):
    input_shape = src.shape
    if src.ndim > 3:
        # util.union_walks: (B, W, V, F) -> (B*W, V, F)
        B, W, V, F = input_shape
        src = src.reshape(B * W, V, F)
    NB, T, F = src.shape
    C = params["bfc"].shape[-1]

    p = _prep_params(params)
    Cp = p["bfc"].shape[-1]
    hps = [g["bhn"].shape[-1] for g in p["grus"]]
    Hseq = max(hps[:-1]) if len(hps) > 1 else hps[0]

    # batch-first -> time-major once for the whole fused forward; pad the batch axis
    # to a sublane-aligned, divisor-aware block size.
    BB = _pick_bb(NB, batch_block)
    NB_pad = _round_up(NB, BB)
    x = jnp.transpose(src, (1, 0, 2)).astype(jnp.float32)       # (T, NB, F)
    if NB_pad != NB:
        x = jnp.pad(x, ((0, 0), (0, NB_pad - NB), (0, 0)))

    operands = [x, p["w1"], p["b1"], p["w2"], p["b2"]]
    for g in p["grus"]:
        operands += [g["wih"], g["whh"], g["bx"], g["bhn"]]
    operands += [p["wfc"], p["bfc"]]

    def full_spec(a):
        return pl.BlockSpec(a.shape, lambda i, n=a.ndim: (0,) * n)

    in_specs = [pl.BlockSpec((T, BB, F), lambda i: (0, i, 0))]
    in_specs += [full_spec(a) for a in operands[1:]]

    out = pl.pallas_call(
        _rnn_fused_kernel,
        out_shape=jax.ShapeDtypeStruct((NB_pad, Cp), jnp.float32),   # lane-dense f32 slab
        grid=(NB_pad // BB,),
        in_specs=in_specs,
        out_specs=pl.BlockSpec((BB, Cp), lambda i: (i, 0)),
        scratch_shapes=[pltpu.VMEM((T * BB, Hseq), jnp.bfloat16)],
        compiler_params=pltpu.CompilerParams(
            dimension_semantics=("parallel",)),
    )(*operands)

    out = out[:NB, :C]
    if len(input_shape) > 3:
        # util.segregate_walks: (B*W, C) -> (B, W, C)
        out = out.reshape(input_shape[0], input_shape[1], C)
    return out


if __name__ == "__main__":
    key = jax.random.PRNGKey(0)
    k_param, k_src = jax.random.split(key)

    FEATURE_DIM, MODEL_SIZE, N_CLASSES = 3, 32, 10
    B, WALKS, VERTICES = 2, 3, 8

    params = init_params(k_param, FEATURE_DIM, MODEL_SIZE, N_CLASSES)
    src = jax.random.normal(k_src, (B, WALKS, VERTICES, FEATURE_DIM), jnp.float32)

    fwd = jax.jit(rnn_model_forward)
    out = fwd(params, src)
    out = jax.block_until_ready(out)

    assert out.shape == (B, WALKS, N_CLASSES), out.shape
    assert jnp.all(jnp.isfinite(out))
    print("KERNEL_OK")
</pallas_src>

<mosaic_0001>
module attributes {stable_mosaic.version = 11 : i64} {
  func.func @_rnn_fused_kernel(%arg0: i32, %arg1: memref<8x8x3xf32, #tpu.memory_space<vmem>>, %arg2: memref<3x64xbf16, #tpu.memory_space<vmem>>, %arg3: memref<1x64xf32, #tpu.memory_space<vmem>>, %arg4: memref<64x32xbf16, #tpu.memory_space<vmem>>, %arg5: memref<1x32xf32, #tpu.memory_space<vmem>>, %arg6: memref<32x384xbf16, #tpu.memory_space<vmem>>, %arg7: memref<128x384xbf16, #tpu.memory_space<vmem>>, %arg8: memref<1x384xf32, #tpu.memory_space<vmem>>, %arg9: memref<1x128xf32, #tpu.memory_space<vmem>>, %arg10: memref<128x384xbf16, #tpu.memory_space<vmem>>, %arg11: memref<128x384xbf16, #tpu.memory_space<vmem>>, %arg12: memref<1x384xf32, #tpu.memory_space<vmem>>, %arg13: memref<1x128xf32, #tpu.memory_space<vmem>>, %arg14: memref<128x384xbf16, #tpu.memory_space<vmem>>, %arg15: memref<128x384xbf16, #tpu.memory_space<vmem>>, %arg16: memref<1x384xf32, #tpu.memory_space<vmem>>, %arg17: memref<1x128xf32, #tpu.memory_space<vmem>>, %arg18: memref<128x128xbf16, #tpu.memory_space<vmem>>, %arg19: memref<1x128xf32, #tpu.memory_space<vmem>>, %arg20: memref<8x128xf32, #tpu.memory_space<vmem>>, %arg21: memref<64x128xbf16, #tpu.memory_space<vmem>>) attributes {dimension_semantics = [#tpu.dimension_semantics<parallel>], iteration_bounds = array<i64: 1>, scalar_prefetch = 0 : i64, scratch_operands = 1 : i64, tpu.core_type = #tpu.core_type<tc>, window_params = [{transform_indices = @transform_0, window_bounds = array<i64: 8, 8, 3>}, {pipeline_mode = #tpu.pipeline_mode<synchronous>, transform_indices = @transform_1, window_bounds = array<i64: 3, 64>}, {pipeline_mode = #tpu.pipeline_mode<synchronous>, transform_indices = @transform_2, window_bounds = array<i64: 1, 64>}, {pipeline_mode = #tpu.pipeline_mode<synchronous>, transform_indices = @transform_3, window_bounds = array<i64: 64, 32>}, {pipeline_mode = #tpu.pipeline_mode<synchronous>, transform_indices = @transform_4, window_bounds = array<i64: 1, 32>}, {pipeline_mode = #tpu.pipeline_mode<synchronous>, transform_indices = @transform_5, window_bounds = array<i64: 32, 384>}, {pipeline_mode = #tpu.pipeline_mode<synchronous>, transform_indices = @transform_6, window_bounds = array<i64: 128, 384>}, {pipeline_mode = #tpu.pipeline_mode<synchronous>, transform_indices = @transform_7, window_bounds = array<i64: 1, 384>}, {pipeline_mode = #tpu.pipeline_mode<synchronous>, transform_indices = @transform_8, window_bounds = array<i64: 1, 128>}, {pipeline_mode = #tpu.pipeline_mode<synchronous>, transform_indices = @transform_9, window_bounds = array<i64: 128, 384>}, {pipeline_mode = #tpu.pipeline_mode<synchronous>, transform_indices = @transform_10, window_bounds = array<i64: 128, 384>}, {pipeline_mode = #tpu.pipeline_mode<synchronous>, transform_indices = @transform_11, window_bounds = array<i64: 1, 384>}, {pipeline_mode = #tpu.pipeline_mode<synchronous>, transform_indices = @transform_12, window_bounds = array<i64: 1, 128>}, {pipeline_mode = #tpu.pipeline_mode<synchronous>, transform_indices = @transform_13, window_bounds = array<i64: 128, 384>}, {pipeline_mode = #tpu.pipeline_mode<synchronous>, transform_indices = @transform_14, window_bounds = array<i64: 128, 384>}, {pipeline_mode = #tpu.pipeline_mode<synchronous>, transform_indices = @transform_15, window_bounds = array<i64: 1, 384>}, {pipeline_mode = #tpu.pipeline_mode<synchronous>, transform_indices = @transform_16, window_bounds = array<i64: 1, 128>}, {pipeline_mode = #tpu.pipeline_mode<synchronous>, transform_indices = @transform_17, window_bounds = array<i64: 128, 128>}, {pipeline_mode = #tpu.pipeline_mode<synchronous>, transform_indices = @transform_18, window_bounds = array<i64: 1, 128>}, {transform_indices = @transform_19, window_bounds = array<i64: 8, 128>}]} {
    %c0 = arith.constant 0 : index
    %c0_0 = arith.constant 0 : index
    %c0_1 = arith.constant 0 : index
    %0 = vector.load %arg1[%c0, %c0_0, %c0_1] : memref<8x8x3xf32, #tpu.memory_space<vmem>>, vector<8x8x3xf32>
    %1 = vector.shape_cast %0 : vector<8x8x3xf32> to vector<64x3xf32>
    %2 = arith.truncf %1 : vector<64x3xf32> to vector<64x3xbf16>
    %c0_2 = arith.constant 0 : index
    %c0_3 = arith.constant 0 : index
    %3 = vector.load %arg2[%c0_2, %c0_3] : memref<3x64xbf16, #tpu.memory_space<vmem>>, vector<3x64xbf16>
    %cst = arith.constant dense<0.000000e+00> : vector<64x64xf32>
    %4 = tpu.matmul %2, %3, %cst {dimension_numbers = #tpu.dot_dimension_numbers<[1], [0], [0], [1], [0, 0, 1, 1], [], []>} : vector<64x3xbf16>, vector<3x64xbf16>, vector<64x64xf32> -> vector<64x64xf32>
    %c0_4 = arith.constant 0 : index
    %c0_5 = arith.constant 0 : index
    %5 = vector.load %arg3[%c0_4, %c0_5] : memref<1x64xf32, #tpu.memory_space<vmem>>, vector<1x64xf32>
    %6 = vector.broadcast %5 : vector<1x64xf32> to vector<64x64xf32>
    %7 = arith.addf %4, %6 : vector<64x64xf32>
    %cst_6 = arith.constant 0.000000e+00 : f32
    %8 = vector.broadcast %cst_6 : f32 to vector<64x64xf32>
    %9 = arith.maximumf %7, %8 : vector<64x64xf32>
    %10 = arith.truncf %9 : vector<64x64xf32> to vector<64x64xbf16>
    %c0_7 = arith.constant 0 : index
    %c0_8 = arith.constant 0 : index
    %11 = vector.load %arg4[%c0_7, %c0_8] : memref<64x32xbf16, #tpu.memory_space<vmem>>, vector<64x32xbf16>
    %cst_9 = arith.constant dense<0.000000e+00> : vector<64x32xf32>
    %12 = tpu.matmul %10, %11, %cst_9 {dimension_numbers = #tpu.dot_dimension_numbers<[1], [0], [0], [1], [0, 0, 1, 1], [], []>} : vector<64x64xbf16>, vector<64x32xbf16>, vector<64x32xf32> -> vector<64x32xf32>
    %c0_10 = arith.constant 0 : index
    %c0_11 = arith.constant 0 : index
    %13 = vector.load %arg5[%c0_10, %c0_11] : memref<1x32xf32, #tpu.memory_space<vmem>>, vector<1x32xf32>
    %14 = vector.broadcast %13 : vector<1x32xf32> to vector<64x32xf32>
    %15 = arith.addf %12, %14 : vector<64x32xf32>
    %cst_12 = arith.constant 0.000000e+00 : f32
    %16 = vector.broadcast %cst_12 : f32 to vector<64x32xf32>
    %17 = arith.maximumf %15, %16 : vector<64x32xf32>
    %18 = arith.truncf %17 : vector<64x32xf32> to vector<64x32xbf16>
    %c0_13 = arith.constant 0 : index
    %c0_14 = arith.constant 0 : index
    %19 = vector.load %arg6[%c0_13, %c0_14] : memref<32x384xbf16, #tpu.memory_space<vmem>>, vector<32x384xbf16>
    %c0_15 = arith.constant 0 : index
    %c0_16 = arith.constant 0 : index
    %20 = vector.load %arg7[%c0_15, %c0_16] : memref<128x384xbf16, #tpu.memory_space<vmem>>, vector<128x384xbf16>
    %c0_17 = arith.constant 0 : index
    %c0_18 = arith.constant 0 : index
    %21 = vector.load %arg8[%c0_17, %c0_18] : memref<1x384xf32, #tpu.memory_space<vmem>>, vector<1x384xf32>
    %c0_19 = arith.constant 0 : index
    %c0_20 = arith.constant 0 : index
    %22 = vector.load %arg9[%c0_19, %c0_20] : memref<1x128xf32, #tpu.memory_space<vmem>>, vector<1x128xf32>
    %cst_21 = arith.constant dense<0.000000e+00> : vector<64x384xf32>
    %23 = tpu.matmul %18, %19, %cst_21 {dimension_numbers = #tpu.dot_dimension_numbers<[1], [0], [0], [1], [0, 0, 1, 1], [], []>} : vector<64x32xbf16>, vector<32x384xbf16>, vector<64x384xf32> -> vector<64x384xf32>
    %24 = vector.broadcast %21 : vector<1x384xf32> to vector<64x384xf32>
    %25 = arith.addf %23, %24 : vector<64x384xf32>
    %26 = vector.shape_cast %25 : vector<64x384xf32> to vector<8x8x384xf32>
    %27 = vector.shape_cast %22 : vector<1x128xf32> to vector<1x128xf32>
    %28 = vector.broadcast %27 : vector<1x128xf32> to vector<8x128xf32>
    %29 = vector.extract_strided_slice %26 {offsets = [0, 0, 0], sizes = [1, 8, 128], strides = [1, 1, 1]} : vector<8x8x384xf32> to vector<1x8x128xf32>
    %30 = vector.shape_cast %29 : vector<1x8x128xf32> to vector<8x128xf32>
    %31 = arith.negf %30 : vector<8x128xf32>
    %32 = math.exp %31 : vector<8x128xf32>
    %cst_22 = arith.constant 1.000000e+00 : f32
    %33 = vector.broadcast %cst_22 : f32 to vector<8x128xf32>
    %34 = arith.addf %33, %32 : vector<8x128xf32>
    %35 = arith.divf %33, %34 : vector<8x128xf32>
    %36 = vector.extract_strided_slice %26 {offsets = [0, 0, 128], sizes = [1, 8, 128], strides = [1, 1, 1]} : vector<8x8x384xf32> to vector<1x8x128xf32>
    %37 = vector.shape_cast %36 : vector<1x8x128xf32> to vector<8x128xf32>
    %38 = arith.negf %37 : vector<8x128xf32>
    %39 = math.exp %38 : vector<8x128xf32>
    %cst_23 = arith.constant 1.000000e+00 : f32
    %40 = vector.broadcast %cst_23 : f32 to vector<8x128xf32>
    %41 = arith.addf %40, %39 : vector<8x128xf32>
    %42 = arith.divf %40, %41 : vector<8x128xf32>
    %43 = vector.extract_strided_slice %26 {offsets = [0, 0, 256], sizes = [1, 8, 128], strides = [1, 1, 1]} : vector<8x8x384xf32> to vector<1x8x128xf32>
    %44 = vector.shape_cast %43 : vector<1x8x128xf32> to vector<8x128xf32>
    %45 = arith.mulf %35, %28 : vector<8x128xf32>
    %46 = arith.addf %44, %45 : vector<8x128xf32>
    %47 = math.tanh %46 : vector<8x128xf32>
    %cst_24 = arith.constant 1.000000e+00 : f32
    %48 = vector.broadcast %cst_24 : f32 to vector<8x128xf32>
    %49 = arith.subf %48, %42 : vector<8x128xf32>
    %50 = arith.mulf %49, %47 : vector<8x128xf32>
    %51 = arith.truncf %50 : vector<8x128xf32> to vector<8x128xbf16>
    %c0_25 = arith.constant 0 : index
    %c0_26 = arith.constant 0 : index
    %52 = vector.load %arg21[%c0_25, %c0_26] : memref<64x128xbf16, #tpu.memory_space<vmem>>, vector<8x128xbf16>
    tpu.vector_store %arg21[%c0_25, %c0_26], %51 {strides = array<i32>} : memref<64x128xbf16, #tpu.memory_space<vmem>>, vector<8x128xbf16>,
    %53 = arith.truncf %50 : vector<8x128xf32> to vector<8x128xbf16>
    %cst_27 = arith.constant dense<0.000000e+00> : vector<8x384xf32>
    %54 = tpu.matmul %53, %20, %cst_27 {dimension_numbers = #tpu.dot_dimension_numbers<[1], [0], [0], [1], [0, 0, 1, 1], [], []>} : vector<8x128xbf16>, vector<128x384xbf16>, vector<8x384xf32> -> vector<8x384xf32>
    %55 = vector.extract_strided_slice %26 {offsets = [1, 0, 0], sizes = [1, 8, 128], strides = [1, 1, 1]} : vector<8x8x384xf32> to vector<1x8x128xf32>
    %56 = vector.shape_cast %55 : vector<1x8x128xf32> to vector<8x128xf32>
    %57 = vector.extract_strided_slice %54 {offsets = [0, 0], sizes = [8, 128], strides = [1, 1]} : vector<8x384xf32> to vector<8x128xf32>
    %58 = arith.addf %56, %57 : vector<8x128xf32>
    %59 = arith.negf %58 : vector<8x128xf32>
    %60 = math.exp %59 : vector<8x128xf32>
    %cst_28 = arith.constant 1.000000e+00 : f32
    %61 = vector.broadcast %cst_28 : f32 to vector<8x128xf32>
    %62 = arith.addf %61, %60 : vector<8x128xf32>
    %63 = arith.divf %61, %62 : vector<8x128xf32>
    %64 = vector.extract_strided_slice %26 {offsets = [1, 0, 128], sizes = [1, 8, 128], strides = [1, 1, 1]} : vector<8x8x384xf32> to vector<1x8x128xf32>
    %65 = vector.shape_cast %64 : vector<1x8x128xf32> to vector<8x128xf32>
    %66 = vector.extract_strided_slice %54 {offsets = [0, 128], sizes = [8, 128], strides = [1, 1]} : vector<8x384xf32> to vector<8x128xf32>
    %67 = arith.addf %65, %66 : vector<8x128xf32>
    %68 = arith.negf %67 : vector<8x128xf32>
    %69 = math.exp %68 : vector<8x128xf32>
    %cst_29 = arith.constant 1.000000e+00 : f32
    %70 = vector.broadcast %cst_29 : f32 to vector<8x128xf32>
    %71 = arith.addf %70, %69 : vector<8x128xf32>
    %72 = arith.divf %70, %71 : vector<8x128xf32>
    %73 = vector.extract_strided_slice %26 {offsets = [1, 0, 256], sizes = [1, 8, 128], strides = [1, 1, 1]} : vector<8x8x384xf32> to vector<1x8x128xf32>
    %74 = vector.shape_cast %73 : vector<1x8x128xf32> to vector<8x128xf32>
    %75 = vector.extract_strided_slice %54 {offsets = [0, 256], sizes = [8, 128], strides = [1, 1]} : vector<8x384xf32> to vector<8x128xf32>
    %76 = arith.addf %75, %28 : vector<8x128xf32>
    %77 = arith.mulf %63, %76 : vector<8x128xf32>
    %78 = arith.addf %74, %77 : vector<8x128xf32>
    %79 = math.tanh %78 : vector<8x128xf32>
    %cst_30 = arith.constant 1.000000e+00 : f32
    %80 = vector.broadcast %cst_30 : f32 to vector<8x128xf32>
    %81 = arith.subf %80, %72 : vector<8x128xf32>
    %82 = arith.mulf %81, %79 : vector<8x128xf32>
    %83 = arith.mulf %72, %50 : vector<8x128xf32>
    %84 = arith.addf %82, %83 : vector<8x128xf32>
    %85 = arith.truncf %84 : vector<8x128xf32> to vector<8x128xbf16>
    %c8 = arith.constant 8 : index
    %c0_31 = arith.constant 0 : index
    %86 = vector.load %arg21[%c8, %c0_31] : memref<64x128xbf16, #tpu.memory_space<vmem>>, vector<8x128xbf16>
    tpu.vector_store %arg21[%c8, %c0_31], %85 {strides = array<i32>} : memref<64x128xbf16, #tpu.memory_space<vmem>>, vector<8x128xbf16>,
    %87 = arith.truncf %84 : vector<8x128xf32> to vector<8x128xbf16>
    %cst_32 = arith.constant dense<0.000000e+00> : vector<8x384xf32>
    %88 = tpu.matmul %87, %20, %cst_32 {dimension_numbers = #tpu.dot_dimension_numbers<[1], [0], [0], [1], [0, 0, 1, 1], [], []>} : vector<8x128xbf16>, vector<128x384xbf16>, vector<8x384xf32> -> vector<8x384xf32>
    %89 = vector.extract_strided_slice %26 {offsets = [2, 0, 0], sizes = [1, 8, 128], strides = [1, 1, 1]} : vector<8x8x384xf32> to vector<1x8x128xf32>
    %90 = vector.shape_cast %89 : vector<1x8x128xf32> to vector<8x128xf32>
    %91 = vector.extract_strided_slice %88 {offsets = [0, 0], sizes = [8, 128], strides = [1, 1]} : vector<8x384xf32> to vector<8x128xf32>
    %92 = arith.addf %90, %91 : vector<8x128xf32>
    %93 = arith.negf %92 : vector<8x128xf32>
    %94 = math.exp %93 : vector<8x128xf32>
    %cst_33 = arith.constant 1.000000e+00 : f32
    %95 = vector.broadcast %cst_33 : f32 to vector<8x128xf32>
    %96 = arith.addf %95, %94 : vector<8x128xf32>
    %97 = arith.divf %95, %96 : vector<8x128xf32>
    %98 = vector.extract_strided_slice %26 {offsets = [2, 0, 128], sizes = [1, 8, 128], strides = [1, 1, 1]} : vector<8x8x384xf32> to vector<1x8x128xf32>
    %99 = vector.shape_cast %98 : vector<1x8x128xf32> to vector<8x128xf32>
    %100 = vector.extract_strided_slice %88 {offsets = [0, 128], sizes = [8, 128], strides = [1, 1]} : vector<8x384xf32> to vector<8x128xf32>
    %101 = arith.addf %99, %100 : vector<8x128xf32>
    %102 = arith.negf %101 : vector<8x128xf32>
    %103 = math.exp %102 : vector<8x128xf32>
    %cst_34 = arith.constant 1.000000e+00 : f32
    %104 = vector.broadcast %cst_34 : f32 to vector<8x128xf32>
    %105 = arith.addf %104, %103 : vector<8x128xf32>
    %106 = arith.divf %104, %105 : vector<8x128xf32>
    %107 = vector.extract_strided_slice %26 {offsets = [2, 0, 256], sizes = [1, 8, 128], strides = [1, 1, 1]} : vector<8x8x384xf32> to vector<1x8x128xf32>
    %108 = vector.shape_cast %107 : vector<1x8x128xf32> to vector<8x128xf32>
    %109 = vector.extract_strided_slice %88 {offsets = [0, 256], sizes = [8, 128], strides = [1, 1]} : vector<8x384xf32> to vector<8x128xf32>
    %110 = arith.addf %109, %28 : vector<8x128xf32>
    %111 = arith.mulf %97, %110 : vector<8x128xf32>
    %112 = arith.addf %108, %111 : vector<8x128xf32>
    %113 = math.tanh %112 : vector<8x128xf32>
    %cst_35 = arith.constant 1.000000e+00 : f32
    %114 = vector.broadcast %cst_35 : f32 to vector<8x128xf32>
    %115 = arith.subf %114, %106 : vector<8x128xf32>
    %116 = arith.mulf %115, %113 : vector<8x128xf32>
    %117 = arith.mulf %106, %84 : vector<8x128xf32>
    %118 = arith.addf %116, %117 : vector<8x128xf32>
    %119 = arith.truncf %118 : vector<8x128xf32> to vector<8x128xbf16>
    %c16 = arith.constant 16 : index
    %c0_36 = arith.constant 0 : index
    %120 = vector.load %arg21[%c16, %c0_36] : memref<64x128xbf16, #tpu.memory_space<vmem>>, vector<8x128xbf16>
    tpu.vector_store %arg21[%c16, %c0_36], %119 {strides = array<i32>} : memref<64x128xbf16, #tpu.memory_space<vmem>>, vector<8x128xbf16>,
    %121 = arith.truncf %118 : vector<8x128xf32> to vector<8x128xbf16>
    %cst_37 = arith.constant dense<0.000000e+00> : vector<8x384xf32>
    %122 = tpu.matmul %121, %20, %cst_37 {dimension_numbers = #tpu.dot_dimension_numbers<[1], [0], [0], [1], [0, 0, 1, 1], [], []>} : vector<8x128xbf16>, vector<128x384xbf16>, vector<8x384xf32> -> vector<8x384xf32>
    %123 = vector.extract_strided_slice %26 {offsets = [3, 0, 0], sizes = [1, 8, 128], strides = [1, 1, 1]} : vector<8x8x384xf32> to vector<1x8x128xf32>
    %124 = vector.shape_cast %123 : vector<1x8x128xf32> to vector<8x128xf32>
    %125 = vector.extract_strided_slice %122 {offsets = [0, 0], sizes = [8, 128], strides = [1, 1]} : vector<8x384xf32> to vector<8x128xf32>
    %126 = arith.addf %124, %125 : vector<8x128xf32>
    %127 = arith.negf %126 : vector<8x128xf32>
    %128 = math.exp %127 : vector<8x128xf32>
    %cst_38 = arith.constant 1.000000e+00 : f32
    %129 = vector.broadcast %cst_38 : f32 to vector<8x128xf32>
    %130 = arith.addf %129, %128 : vector<8x128xf32>
    %131 = arith.divf %129, %130 : vector<8x128xf32>
    %132 = vector.extract_strided_slice %26 {offsets = [3, 0, 128], sizes = [1, 8, 128], strides = [1, 1, 1]} : vector<8x8x384xf32> to vector<1x8x128xf32>
    %133 = vector.shape_cast %132 : vector<1x8x128xf32> to vector<8x128xf32>
    %134 = vector.extract_strided_slice %122 {offsets = [0, 128], sizes = [8, 128], strides = [1, 1]} : vector<8x384xf32> to vector<8x128xf32>
    %135 = arith.addf %133, %134 : vector<8x128xf32>
    %136 = arith.negf %135 : vector<8x128xf32>
    %137 = math.exp %136 : vector<8x128xf32>
    %cst_39 = arith.constant 1.000000e+00 : f32
    %138 = vector.broadcast %cst_39 : f32 to vector<8x128xf32>
    %139 = arith.addf %138, %137 : vector<8x128xf32>
    %140 = arith.divf %138, %139 : vector<8x128xf32>
    %141 = vector.extract_strided_slice %26 {offsets = [3, 0, 256], sizes = [1, 8, 128], strides = [1, 1, 1]} : vector<8x8x384xf32> to vector<1x8x128xf32>
    %142 = vector.shape_cast %141 : vector<1x8x128xf32> to vector<8x128xf32>
    %143 = vector.extract_strided_slice %122 {offsets = [0, 256], sizes = [8, 128], strides = [1, 1]} : vector<8x384xf32> to vector<8x128xf32>
    %144 = arith.addf %143, %28 : vector<8x128xf32>
    %145 = arith.mulf %131, %144 : vector<8x128xf32>
    %146 = arith.addf %142, %145 : vector<8x128xf32>
    %147 = math.tanh %146 : vector<8x128xf32>
    %cst_40 = arith.constant 1.000000e+00 : f32
    %148 = vector.broadcast %cst_40 : f32 to vector<8x128xf32>
    %149 = arith.subf %148, %140 : vector<8x128xf32>
    %150 = arith.mulf %149, %147 : vector<8x128xf32>
    %151 = arith.mulf %140, %118 : vector<8x128xf32>
    %152 = arith.addf %150, %151 : vector<8x128xf32>
    %153 = arith.truncf %152 : vector<8x128xf32> to vector<8x128xbf16>
    %c24 = arith.constant 24 : index
    %c0_41 = arith.constant 0 : index
    %154 = vector.load %arg21[%c24, %c0_41] : memref<64x128xbf16, #tpu.memory_space<vmem>>, vector<8x128xbf16>
    tpu.vector_store %arg21[%c24, %c0_41], %153 {strides = array<i32>} : memref<64x128xbf16, #tpu.memory_space<vmem>>, vector<8x128xbf16>,
    %155 = arith.truncf %152 : vector<8x128xf32> to vector<8x128xbf16>
    %cst_42 = arith.constant dense<0.000000e+00> : vector<8x384xf32>
    %156 = tpu.matmul %155, %20, %cst_42 {dimension_numbers = #tpu.dot_dimension_numbers<[1], [0], [0], [1], [0, 0, 1, 1], [], []>} : vector<8x128xbf16>, vector<128x384xbf16>, vector<8x384xf32> -> vector<8x384xf32>
    %157 = vector.extract_strided_slice %26 {offsets = [4, 0, 0], sizes = [1, 8, 128], strides = [1, 1, 1]} : vector<8x8x384xf32> to vector<1x8x128xf32>
    %158 = vector.shape_cast %157 : vector<1x8x128xf32> to vector<8x128xf32>
    %159 = vector.extract_strided_slice %156 {offsets = [0, 0], sizes = [8, 128], strides = [1, 1]} : vector<8x384xf32> to vector<8x128xf32>
    %160 = arith.addf %158, %159 : vector<8x128xf32>
    %161 = arith.negf %160 : vector<8x128xf32>
    %162 = math.exp %161 : vector<8x128xf32>
    %cst_43 = arith.constant 1.000000e+00 : f32
    %163 = vector.broadcast %cst_43 : f32 to vector<8x128xf32>
    %164 = arith.addf %163, %162 : vector<8x128xf32>
    %165 = arith.divf %163, %164 : vector<8x128xf32>
    %166 = vector.extract_strided_slice %26 {offsets = [4, 0, 128], sizes = [1, 8, 128], strides = [1, 1, 1]} : vector<8x8x384xf32> to vector<1x8x128xf32>
    %167 = vector.shape_cast %166 : vector<1x8x128xf32> to vector<8x128xf32>
    %168 = vector.extract_strided_slice %156 {offsets = [0, 128], sizes = [8, 128], strides = [1, 1]} : vector<8x384xf32> to vector<8x128xf32>
    %169 = arith.addf %167, %168 : vector<8x128xf32>
    %170 = arith.negf %169 : vector<8x128xf32>
    %171 = math.exp %170 : vector<8x128xf32>
    %cst_44 = arith.constant 1.000000e+00 : f32
    %172 = vector.broadcast %cst_44 : f32 to vector<8x128xf32>
    %173 = arith.addf %172, %171 : vector<8x128xf32>
    %174 = arith.divf %172, %173 : vector<8x128xf32>
    %175 = vector.extract_strided_slice %26 {offsets = [4, 0, 256], sizes = [1, 8, 128], strides = [1, 1, 1]} : vector<8x8x384xf32> to vector<1x8x128xf32>
    %176 = vector.shape_cast %175 : vector<1x8x128xf32> to vector<8x128xf32>
    %177 = vector.extract_strided_slice %156 {offsets = [0, 256], sizes = [8, 128], strides = [1, 1]} : vector<8x384xf32> to vector<8x128xf32>
    %178 = arith.addf %177, %28 : vector<8x128xf32>
    %179 = arith.mulf %165, %178 : vector<8x128xf32>
    %180 = arith.addf %176, %179 : vector<8x128xf32>
    %181 = math.tanh %180 : vector<8x128xf32>
    %cst_45 = arith.constant 1.000000e+00 : f32
    %182 = vector.broadcast %cst_45 : f32 to vector<8x128xf32>
    %183 = arith.subf %182, %174 : vector<8x128xf32>
    %184 = arith.mulf %183, %181 : vector<8x128xf32>
    %185 = arith.mulf %174, %152 : vector<8x128xf32>
    %186 = arith.addf %184, %185 : vector<8x128xf32>
    %187 = arith.truncf %186 : vector<8x128xf32> to vector<8x128xbf16>
    %c32 = arith.constant 32 : index
    %c0_46 = arith.constant 0 : index
    %188 = vector.load %arg21[%c32, %c0_46] : memref<64x128xbf16, #tpu.memory_space<vmem>>, vector<8x128xbf16>
    tpu.vector_store %arg21[%c32, %c0_46], %187 {strides = array<i32>} : memref<64x128xbf16, #tpu.memory_space<vmem>>, vector<8x128xbf16>,
    %189 = arith.truncf %186 : vector<8x128xf32> to vector<8x128xbf16>
    %cst_47 = arith.constant dense<0.000000e+00> : vector<8x384xf32>
    %190 = tpu.matmul %189, %20, %cst_47 {dimension_numbers = #tpu.dot_dimension_numbers<[1], [0], [0], [1], [0, 0, 1, 1], [], []>} : vector<8x128xbf16>, vector<128x384xbf16>, vector<8x384xf32> -> vector<8x384xf32>
    %191 = vector.extract_strided_slice %26 {offsets = [5, 0, 0], sizes = [1, 8, 128], strides = [1, 1, 1]} : vector<8x8x384xf32> to vector<1x8x128xf32>
    %192 = vector.shape_cast %191 : vector<1x8x128xf32> to vector<8x128xf32>
    %193 = vector.extract_strided_slice %190 {offsets = [0, 0], sizes = [8, 128], strides = [1, 1]} : vector<8x384xf32> to vector<8x128xf32>
    %194 = arith.addf %192, %193 : vector<8x128xf32>
    %195 = arith.negf %194 : vector<8x128xf32>
    %196 = math.exp %195 : vector<8x128xf32>
    %cst_48 = arith.constant 1.000000e+00 : f32
    %197 = vector.broadcast %cst_48 : f32 to vector<8x128xf32>
    %198 = arith.addf %197, %196 : vector<8x128xf32>
    %199 = arith.divf %197, %198 : vector<8x128xf32>
    %200 = vector.extract_strided_slice %26 {offsets = [5, 0, 128], sizes = [1, 8, 128], strides = [1, 1, 1]} : vector<8x8x384xf32> to vector<1x8x128xf32>
    %201 = vector.shape_cast %200 : vector<1x8x128xf32> to vector<8x128xf32>
    %202 = vector.extract_strided_slice %190 {offsets = [0, 128], sizes = [8, 128], strides = [1, 1]} : vector<8x384xf32> to vector<8x128xf32>
    %203 = arith.addf %201, %202 : vector<8x128xf32>
    %204 = arith.negf %203 : vector<8x128xf32>
    %205 = math.exp %204 : vector<8x128xf32>
    %cst_49 = arith.constant 1.000000e+00 : f32
    %206 = vector.broadcast %cst_49 : f32 to vector<8x128xf32>
    %207 = arith.addf %206, %205 : vector<8x128xf32>
    %208 = arith.divf %206, %207 : vector<8x128xf32>
    %209 = vector.extract_strided_slice %26 {offsets = [5, 0, 256], sizes = [1, 8, 128], strides = [1, 1, 1]} : vector<8x8x384xf32> to vector<1x8x128xf32>
    %210 = vector.shape_cast %209 : vector<1x8x128xf32> to vector<8x128xf32>
    %211 = vector.extract_strided_slice %190 {offsets = [0, 256], sizes = [8, 128], strides = [1, 1]} : vector<8x384xf32> to vector<8x128xf32>
    %212 = arith.addf %211, %28 : vector<8x128xf32>
    %213 = arith.mulf %199, %212 : vector<8x128xf32>
    %214 = arith.addf %210, %213 : vector<8x128xf32>
    %215 = math.tanh %214 : vector<8x128xf32>
    %cst_50 = arith.constant 1.000000e+00 : f32
    %216 = vector.broadcast %cst_50 : f32 to vector<8x128xf32>
    %217 = arith.subf %216, %208 : vector<8x128xf32>
    %218 = arith.mulf %217, %215 : vector<8x128xf32>
    %219 = arith.mulf %208, %186 : vector<8x128xf32>
    %220 = arith.addf %218, %219 : vector<8x128xf32>
    %221 = arith.truncf %220 : vector<8x128xf32> to vector<8x128xbf16>
    %c40 = arith.constant 40 : index
    %c0_51 = arith.constant 0 : index
    %222 = vector.load %arg21[%c40, %c0_51] : memref<64x128xbf16, #tpu.memory_space<vmem>>, vector<8x128xbf16>
    tpu.vector_store %arg21[%c40, %c0_51], %221 {strides = array<i32>} : memref<64x128xbf16, #tpu.memory_space<vmem>>, vector<8x128xbf16>,
    %223 = arith.truncf %220 : vector<8x128xf32> to vector<8x128xbf16>
    %cst_52 = arith.constant dense<0.000000e+00> : vector<8x384xf32>
    %224 = tpu.matmul %223, %20, %cst_52 {dimension_numbers = #tpu.dot_dimension_numbers<[1], [0], [0], [1], [0, 0, 1, 1], [], []>} : vector<8x128xbf16>, vector<128x384xbf16>, vector<8x384xf32> -> vector<8x384xf32>
    %225 = vector.extract_strided_slice %26 {offsets = [6, 0, 0], sizes = [1, 8, 128], strides = [1, 1, 1]} : vector<8x8x384xf32> to vector<1x8x128xf32>
    %226 = vector.shape_cast %225 : vector<1x8x128xf32> to vector<8x128xf32>
    %227 = vector.extract_strided_slice %224 {offsets = [0, 0], sizes = [8, 128], strides = [1, 1]} : vector<8x384xf32> to vector<8x128xf32>
    %228 = arith.addf %226, %227 : vector<8x128xf32>
    %229 = arith.negf %228 : vector<8x128xf32>
    %230 = math.exp %229 : vector<8x128xf32>
    %cst_53 = arith.constant 1.000000e+00 : f32
    %231 = vector.broadcast %cst_53 : f32 to vector<8x128xf32>
    %232 = arith.addf %231, %230 : vector<8x128xf32>
    %233 = arith.divf %231, %232 : vector<8x128xf32>
    %234 = vector.extract_strided_slice %26 {offsets = [6, 0, 128], sizes = [1, 8, 128], strides = [1, 1, 1]} : vector<8x8x384xf32> to vector<1x8x128xf32>
    %235 = vector.shape_cast %234 : vector<1x8x128xf32> to vector<8x128xf32>
    %236 = vector.extract_strided_slice %224 {offsets = [0, 128], sizes = [8, 128], strides = [1, 1]} : vector<8x384xf32> to vector<8x128xf32>
    %237 = arith.addf %235, %236 : vector<8x128xf32>
    %238 = arith.negf %237 : vector<8x128xf32>
    %239 = math.exp %238 : vector<8x128xf32>
    %cst_54 = arith.constant 1.000000e+00 : f32
    %240 = vector.broadcast %cst_54 : f32 to vector<8x128xf32>
    %241 = arith.addf %240, %239 : vector<8x128xf32>
    %242 = arith.divf %240, %241 : vector<8x128xf32>
    %243 = vector.extract_strided_slice %26 {offsets = [6, 0, 256], sizes = [1, 8, 128], strides = [1, 1, 1]} : vector<8x8x384xf32> to vector<1x8x128xf32>
    %244 = vector.shape_cast %243 : vector<1x8x128xf32> to vector<8x128xf32>
    %245 = vector.extract_strided_slice %224 {offsets = [0, 256], sizes = [8, 128], strides = [1, 1]} : vector<8x384xf32> to vector<8x128xf32>
    %246 = arith.addf %245, %28 : vector<8x128xf32>
    %247 = arith.mulf %233, %246 : vector<8x128xf32>
    %248 = arith.addf %244, %247 : vector<8x128xf32>
    %249 = math.tanh %248 : vector<8x128xf32>
    %cst_55 = arith.constant 1.000000e+00 : f32
    %250 = vector.broadcast %cst_55 : f32 to vector<8x128xf32>
    %251 = arith.subf %250, %242 : vector<8x128xf32>
    %252 = arith.mulf %251, %249 : vector<8x128xf32>
    %253 = arith.mulf %242, %220 : vector<8x128xf32>
    %254 = arith.addf %252, %253 : vector<8x128xf32>
    %255 = arith.truncf %254 : vector<8x128xf32> to vector<8x128xbf16>
    %c48 = arith.constant 48 : index
    %c0_56 = arith.constant 0 : index
    %256 = vector.load %arg21[%c48, %c0_56] : memref<64x128xbf16, #tpu.memory_space<vmem>>, vector<8x128xbf16>
    tpu.vector_store %arg21[%c48, %c0_56], %255 {strides = array<i32>} : memref<64x128xbf16, #tpu.memory_space<vmem>>, vector<8x128xbf16>,
    %257 = arith.truncf %254 : vector<8x128xf32> to vector<8x128xbf16>
    %cst_57 = arith.constant dense<0.000000e+00> : vector<8x384xf32>
    %258 = tpu.matmul %257, %20, %cst_57 {dimension_numbers = #tpu.dot_dimension_numbers<[1], [0], [0], [1], [0, 0, 1, 1], [], []>} : vector<8x128xbf16>, vector<128x384xbf16>, vector<8x384xf32> -> vector<8x384xf32>
    %259 = vector.extract_strided_slice %26 {offsets = [7, 0, 0], sizes = [1, 8, 128], strides = [1, 1, 1]} : vector<8x8x384xf32> to vector<1x8x128xf32>
    %260 = vector.shape_cast %259 : vector<1x8x128xf32> to vector<8x128xf32>
    %261 = vector.extract_strided_slice %258 {offsets = [0, 0], sizes = [8, 128], strides = [1, 1]} : vector<8x384xf32> to vector<8x128xf32>
    %262 = arith.addf %260, %261 : vector<8x128xf32>
    %263 = arith.negf %262 : vector<8x128xf32>
    %264 = math.exp %263 : vector<8x128xf32>
    %cst_58 = arith.constant 1.000000e+00 : f32
    %265 = vector.broadcast %cst_58 : f32 to vector<8x128xf32>
    %266 = arith.addf %265, %264 : vector<8x128xf32>
    %267 = arith.divf %265, %266 : vector<8x128xf32>
    %268 = vector.extract_strided_slice %26 {offsets = [7, 0, 128], sizes = [1, 8, 128], strides = [1, 1, 1]} : vector<8x8x384xf32> to vector<1x8x128xf32>
    %269 = vector.shape_cast %268 : vector<1x8x128xf32> to vector<8x128xf32>
    %270 = vector.extract_strided_slice %258 {offsets = [0, 128], sizes = [8, 128], strides = [1, 1]} : vector<8x384xf32> to vector<8x128xf32>
    %271 = arith.addf %269, %270 : vector<8x128xf32>
    %272 = arith.negf %271 : vector<8x128xf32>
    %273 = math.exp %272 : vector<8x128xf32>
    %cst_59 = arith.constant 1.000000e+00 : f32
    %274 = vector.broadcast %cst_59 : f32 to vector<8x128xf32>
    %275 = arith.addf %274, %273 : vector<8x128xf32>
    %276 = arith.divf %274, %275 : vector<8x128xf32>
    %277 = vector.extract_strided_slice %26 {offsets = [7, 0, 256], sizes = [1, 8, 128], strides = [1, 1, 1]} : vector<8x8x384xf32> to vector<1x8x128xf32>
    %278 = vector.shape_cast %277 : vector<1x8x128xf32> to vector<8x128xf32>
    %279 = vector.extract_strided_slice %258 {offsets = [0, 256], sizes = [8, 128], strides = [1, 1]} : vector<8x384xf32> to vector<8x128xf32>
    %280 = arith.addf %279, %28 : vector<8x128xf32>
    %281 = arith.mulf %267, %280 : vector<8x128xf32>
    %282 = arith.addf %278, %281 : vector<8x128xf32>
    %283 = math.tanh %282 : vector<8x128xf32>
    %cst_60 = arith.constant 1.000000e+00 : f32
    %284 = vector.broadcast %cst_60 : f32 to vector<8x128xf32>
    %285 = arith.subf %284, %276 : vector<8x128xf32>
    %286 = arith.mulf %285, %283 : vector<8x128xf32>
    %287 = arith.mulf %276, %254 : vector<8x128xf32>
    %288 = arith.addf %286, %287 : vector<8x128xf32>
    %289 = arith.truncf %288 : vector<8x128xf32> to vector<8x128xbf16>
    %c56 = arith.constant 56 : index
    %c0_61 = arith.constant 0 : index
    %290 = vector.load %arg21[%c56, %c0_61] : memref<64x128xbf16, #tpu.memory_space<vmem>>, vector<8x128xbf16>
    tpu.vector_store %arg21[%c56, %c0_61], %289 {strides = array<i32>} : memref<64x128xbf16, #tpu.memory_space<vmem>>, vector<8x128xbf16>,
    %c0_62 = arith.constant 0 : index
    %c0_63 = arith.constant 0 : index
    %291 = vector.load %arg21[%c0_62, %c0_63] : memref<64x128xbf16, #tpu.memory_space<vmem>>, vector<64x128xbf16>
    %c0_64 = arith.constant 0 : index
    %c0_65 = arith.constant 0 : index
    %292 = vector.load %arg10[%c0_64, %c0_65] : memref<128x384xbf16, #tpu.memory_space<vmem>>, vector<128x384xbf16>
    %c0_66 = arith.constant 0 : index
    %c0_67 = arith.constant 0 : index
    %293 = vector.load %arg11[%c0_66, %c0_67] : memref<128x384xbf16, #tpu.memory_space<vmem>>, vector<128x384xbf16>
    %c0_68 = arith.constant 0 : index
    %c0_69 = arith.constant 0 : index
    %294 = vector.load %arg12[%c0_68, %c0_69] : memref<1x384xf32, #tpu.memory_space<vmem>>, vector<1x384xf32>
    %c0_70 = arith.constant 0 : index
    %c0_71 = arith.constant 0 : index
    %295 = vector.load %arg13[%c0_70, %c0_71] : memref<1x128xf32, #tpu.memory_space<vmem>>, vector<1x128xf32>
    %cst_72 = arith.constant dense<0.000000e+00> : vector<64x384xf32>
    %296 = tpu.matmul %291, %292, %cst_72 {dimension_numbers = #tpu.dot_dimension_numbers<[1], [0], [0], [1], [0, 0, 1, 1], [], []>} : vector<64x128xbf16>, vector<128x384xbf16>, vector<64x384xf32> -> vector<64x384xf32>
    %297 = vector.broadcast %294 : vector<1x384xf32> to vector<64x384xf32>
    %298 = arith.addf %296, %297 : vector<64x384xf32>
    %299 = vector.shape_cast %298 : vector<64x384xf32> to vector<8x8x384xf32>
    %300 = vector.shape_cast %295 : vector<1x128xf32> to vector<1x128xf32>
    %301 = vector.broadcast %300 : vector<1x128xf32> to vector<8x128xf32>
    %302 = vector.extract_strided_slice %299 {offsets = [0, 0, 0], sizes = [1, 8, 128], strides = [1, 1, 1]} : vector<8x8x384xf32> to vector<1x8x128xf32>
    %303 = vector.shape_cast %302 : vector<1x8x128xf32> to vector<8x128xf32>
    %304 = arith.negf %303 : vector<8x128xf32>
    %305 = math.exp %304 : vector<8x128xf32>
    %cst_73 = arith.constant 1.000000e+00 : f32
    %306 = vector.broadcast %cst_73 : f32 to vector<8x128xf32>
    %307 = arith.addf %306, %305 : vector<8x128xf32>
    %308 = arith.divf %306, %307 : vector<8x128xf32>
    %309 = vector.extract_strided_slice %299 {offsets = [0, 0, 128], sizes = [1, 8, 128], strides = [1, 1, 1]} : vector<8x8x384xf32> to vector<1x8x128xf32>
    %310 = vector.shape_cast %309 : vector<1x8x128xf32> to vector<8x128xf32>
    %311 = arith.negf %310 : vector<8x128xf32>
    %312 = math.exp %311 : vector<8x128xf32>
    %cst_74 = arith.constant 1.000000e+00 : f32
    %313 = vector.broadcast %cst_74 : f32 to vector<8x128xf32>
    %314 = arith.addf %313, %312 : vector<8x128xf32>
    %315 = arith.divf %313, %314 : vector<8x128xf32>
    %316 = vector.extract_strided_slice %299 {offsets = [0, 0, 256], sizes = [1, 8, 128], strides = [1, 1, 1]} : vector<8x8x384xf32> to vector<1x8x128xf32>
    %317 = vector.shape_cast %316 : vector<1x8x128xf32> to vector<8x128xf32>
    %318 = arith.mulf %308, %301 : vector<8x128xf32>
    %319 = arith.addf %317, %318 : vector<8x128xf32>
    %320 = math.tanh %319 : vector<8x128xf32>
    %cst_75 = arith.constant 1.000000e+00 : f32
    %321 = vector.broadcast %cst_75 : f32 to vector<8x128xf32>
    %322 = arith.subf %321, %315 : vector<8x128xf32>
    %323 = arith.mulf %322, %320 : vector<8x128xf32>
    %324 = arith.truncf %323 : vector<8x128xf32> to vector<8x128xbf16>
    %c0_76 = arith.constant 0 : index
    %c0_77 = arith.constant 0 : index
    %325 = vector.load %arg21[%c0_76, %c0_77] : memref<64x128xbf16, #tpu.memory_space<vmem>>, vector<8x128xbf16>
    tpu.vector_store %arg21[%c0_76, %c0_77], %324 {strides = array<i32>} : memref<64x128xbf16, #tpu.memory_space<vmem>>, vector<8x128xbf16>,
    %326 = arith.truncf %323 : vector<8x128xf32> to vector<8x128xbf16>
    %cst_78 = arith.constant dense<0.000000e+00> : vector<8x384xf32>
    %327 = tpu.matmul %326, %293, %cst_78 {dimension_numbers = #tpu.dot_dimension_numbers<[1], [0], [0], [1], [0, 0, 1, 1], [], []>} : vector<8x128xbf16>, vector<128x384xbf16>, vector<8x384xf32> -> vector<8x384xf32>
    %328 = vector.extract_strided_slice %299 {offsets = [1, 0, 0], sizes = [1, 8, 128], strides = [1, 1, 1]} : vector<8x8x384xf32> to vector<1x8x128xf32>
    %329 = vector.shape_cast %328 : vector<1x8x128xf32> to vector<8x128xf32>
    %330 = vector.extract_strided_slice %327 {offsets = [0, 0], sizes = [8, 128], strides = [1, 1]} : vector<8x384xf32> to vector<8x128xf32>
    %331 = arith.addf %329, %330 : vector<8x128xf32>
    %332 = arith.negf %331 : vector<8x128xf32>
    %333 = math.exp %332 : vector<8x128xf32>
    %cst_79 = arith.constant 1.000000e+00 : f32
    %334 = vector.broadcast %cst_79 : f32 to vector<8x128xf32>
    %335 = arith.addf %334, %333 : vector<8x128xf32>
    %336 = arith.divf %334, %335 : vector<8x128xf32>
    %337 = vector.extract_strided_slice %299 {offsets = [1, 0, 128], sizes = [1, 8, 128], strides = [1, 1, 1]} : vector<8x8x384xf32> to vector<1x8x128xf32>
    %338 = vector.shape_cast %337 : vector<1x8x128xf32> to vector<8x128xf32>
    %339 = vector.extract_strided_slice %327 {offsets = [0, 128], sizes = [8, 128], strides = [1, 1]} : vector<8x384xf32> to vector<8x128xf32>
    %340 = arith.addf %338, %339 : vector<8x128xf32>
    %341 = arith.negf %340 : vector<8x128xf32>
    %342 = math.exp %341 : vector<8x128xf32>
    %cst_80 = arith.constant 1.000000e+00 : f32
    %343 = vector.broadcast %cst_80 : f32 to vector<8x128xf32>
    %344 = arith.addf %343, %342 : vector<8x128xf32>
    %345 = arith.divf %343, %344 : vector<8x128xf32>
    %346 = vector.extract_strided_slice %299 {offsets = [1, 0, 256], sizes = [1, 8, 128], strides = [1, 1, 1]} : vector<8x8x384xf32> to vector<1x8x128xf32>
    %347 = vector.shape_cast %346 : vector<1x8x128xf32> to vector<8x128xf32>
    %348 = vector.extract_strided_slice %327 {offsets = [0, 256], sizes = [8, 128], strides = [1, 1]} : vector<8x384xf32> to vector<8x128xf32>
    %349 = arith.addf %348, %301 : vector<8x128xf32>
    %350 = arith.mulf %336, %349 : vector<8x128xf32>
    %351 = arith.addf %347, %350 : vector<8x128xf32>
    %352 = math.tanh %351 : vector<8x128xf32>
    %cst_81 = arith.constant 1.000000e+00 : f32
    %353 = vector.broadcast %cst_81 : f32 to vector<8x128xf32>
    %354 = arith.subf %353, %345 : vector<8x128xf32>
    %355 = arith.mulf %354, %352 : vector<8x128xf32>
    %356 = arith.mulf %345, %323 : vector<8x128xf32>
    %357 = arith.addf %355, %356 : vector<8x128xf32>
    %358 = arith.truncf %357 : vector<8x128xf32> to vector<8x128xbf16>
    %c8_82 = arith.constant 8 : index
    %c0_83 = arith.constant 0 : index
    %359 = vector.load %arg21[%c8_82, %c0_83] : memref<64x128xbf16, #tpu.memory_space<vmem>>, vector<8x128xbf16>
    tpu.vector_store %arg21[%c8_82, %c0_83], %358 {strides = array<i32>} : memref<64x128xbf16, #tpu.memory_space<vmem>>, vector<8x128xbf16>,
    %360 = arith.truncf %357 : vector<8x128xf32> to vector<8x128xbf16>
    %cst_84 = arith.constant dense<0.000000e+00> : vector<8x384xf32>
    %361 = tpu.matmul %360, %293, %cst_84 {dimension_numbers = #tpu.dot_dimension_numbers<[1], [0], [0], [1], [0, 0, 1, 1], [], []>} : vector<8x128xbf16>, vector<128x384xbf16>, vector<8x384xf32> -> vector<8x384xf32>
    %362 = vector.extract_strided_slice %299 {offsets = [2, 0, 0], sizes = [1, 8, 128], strides = [1, 1, 1]} : vector<8x8x384xf32> to vector<1x8x128xf32>
    %363 = vector.shape_cast %362 : vector<1x8x128xf32> to vector<8x128xf32>
    %364 = vector.extract_strided_slice %361 {offsets = [0, 0], sizes = [8, 128], strides = [1, 1]} : vector<8x384xf32> to vector<8x128xf32>
    %365 = arith.addf %363, %364 : vector<8x128xf32>
    %366 = arith.negf %365 : vector<8x128xf32>
    %367 = math.exp %366 : vector<8x128xf32>
    %cst_85 = arith.constant 1.000000e+00 : f32
    %368 = vector.broadcast %cst_85 : f32 to vector<8x128xf32>
    %369 = arith.addf %368, %367 : vector<8x128xf32>
    %370 = arith.divf %368, %369 : vector<8x128xf32>
    %371 = vector.extract_strided_slice %299 {offsets = [2, 0, 128], sizes = [1, 8, 128], strides = [1, 1, 1]} : vector<8x8x384xf32> to vector<1x8x128xf32>
    %372 = vector.shape_cast %371 : vector<1x8x128xf32> to vector<8x128xf32>
    %373 = vector.extract_strided_slice %361 {offsets = [0, 128], sizes = [8, 128], strides = [1, 1]} : vector<8x384xf32> to vector<8x128xf32>
    %374 = arith.addf %372, %373 : vector<8x128xf32>
    %375 = arith.negf %374 : vector<8x128xf32>
    %376 = math.exp %375 : vector<8x128xf32>
    %cst_86 = arith.constant 1.000000e+00 : f32
    %377 = vector.broadcast %cst_86 : f32 to vector<8x128xf32>
    %378 = arith.addf %377, %376 : vector<8x128xf32>
    %379 = arith.divf %377, %378 : vector<8x128xf32>
    %380 = vector.extract_strided_slice %299 {offsets = [2, 0, 256], sizes = [1, 8, 128], strides = [1, 1, 1]} : vector<8x8x384xf32> to vector<1x8x128xf32>
    %381 = vector.shape_cast %380 : vector<1x8x128xf32> to vector<8x128xf32>
    %382 = vector.extract_strided_slice %361 {offsets = [0, 256], sizes = [8, 128], strides = [1, 1]} : vector<8x384xf32> to vector<8x128xf32>
    %383 = arith.addf %382, %301 : vector<8x128xf32>
    %384 = arith.mulf %370, %383 : vector<8x128xf32>
    %385 = arith.addf %381, %384 : vector<8x128xf32>
    %386 = math.tanh %385 : vector<8x128xf32>
    %cst_87 = arith.constant 1.000000e+00 : f32
    %387 = vector.broadcast %cst_87 : f32 to vector<8x128xf32>
    %388 = arith.subf %387, %379 : vector<8x128xf32>
    %389 = arith.mulf %388, %386 : vector<8x128xf32>
    %390 = arith.mulf %379, %357 : vector<8x128xf32>
    %391 = arith.addf %389, %390 : vector<8x128xf32>
    %392 = arith.truncf %391 : vector<8x128xf32> to vector<8x128xbf16>
    %c16_88 = arith.constant 16 : index
    %c0_89 = arith.constant 0 : index
    %393 = vector.load %arg21[%c16_88, %c0_89] : memref<64x128xbf16, #tpu.memory_space<vmem>>, vector<8x128xbf16>
    tpu.vector_store %arg21[%c16_88, %c0_89], %392 {strides = array<i32>} : memref<64x128xbf16, #tpu.memory_space<vmem>>, vector<8x128xbf16>,
    %394 = arith.truncf %391 : vector<8x128xf32> to vector<8x128xbf16>
    %cst_90 = arith.constant dense<0.000000e+00> : vector<8x384xf32>
    %395 = tpu.matmul %394, %293, %cst_90 {dimension_numbers = #tpu.dot_dimension_numbers<[1], [0], [0], [1], [0, 0, 1, 1], [], []>} : vector<8x128xbf16>, vector<128x384xbf16>, vector<8x384xf32> -> vector<8x384xf32>
    %396 = vector.extract_strided_slice %299 {offsets = [3, 0, 0], sizes = [1, 8, 128], strides = [1, 1, 1]} : vector<8x8x384xf32> to vector<1x8x128xf32>
    %397 = vector.shape_cast %396 : vector<1x8x128xf32> to vector<8x128xf32>
    %398 = vector.extract_strided_slice %395 {offsets = [0, 0], sizes = [8, 128], strides = [1, 1]} : vector<8x384xf32> to vector<8x128xf32>
    %399 = arith.addf %397, %398 : vector<8x128xf32>
    %400 = arith.negf %399 : vector<8x128xf32>
    %401 = math.exp %400 : vector<8x128xf32>
    %cst_91 = arith.constant 1.000000e+00 : f32
    %402 = vector.broadcast %cst_91 : f32 to vector<8x128xf32>
    %403 = arith.addf %402, %401 : vector<8x128xf32>
    %404 = arith.divf %402, %403 : vector<8x128xf32>
    %405 = vector.extract_strided_slice %299 {offsets = [3, 0, 128], sizes = [1, 8, 128], strides = [1, 1, 1]} : vector<8x8x384xf32> to vector<1x8x128xf32>
    %406 = vector.shape_cast %405 : vector<1x8x128xf32> to vector<8x128xf32>
    %407 = vector.extract_strided_slice %395 {offsets = [0, 128], sizes = [8, 128], strides = [1, 1]} : vector<8x384xf32> to vector<8x128xf32>
    %408 = arith.addf %406, %407 : vector<8x128xf32>
    %409 = arith.negf %408 : vector<8x128xf32>
    %410 = math.exp %409 : vector<8x128xf32>
    %cst_92 = arith.constant 1.000000e+00 : f32
    %411 = vector.broadcast %cst_92 : f32 to vector<8x128xf32>
    %412 = arith.addf %411, %410 : vector<8x128xf32>
    %413 = arith.divf %411, %412 : vector<8x128xf32>
    %414 = vector.extract_strided_slice %299 {offsets = [3, 0, 256], sizes = [1, 8, 128], strides = [1, 1, 1]} : vector<8x8x384xf32> to vector<1x8x128xf32>
    %415 = vector.shape_cast %414 : vector<1x8x128xf32> to vector<8x128xf32>
    %416 = vector.extract_strided_slice %395 {offsets = [0, 256], sizes = [8, 128], strides = [1, 1]} : vector<8x384xf32> to vector<8x128xf32>
    %417 = arith.addf %416, %301 : vector<8x128xf32>
    %418 = arith.mulf %404, %417 : vector<8x128xf32>
    %419 = arith.addf %415, %418 : vector<8x128xf32>
    %420 = math.tanh %419 : vector<8x128xf32>
    %cst_93 = arith.constant 1.000000e+00 : f32
    %421 = vector.broadcast %cst_93 : f32 to vector<8x128xf32>
    %422 = arith.subf %421, %413 : vector<8x128xf32>
    %423 = arith.mulf %422, %420 : vector<8x128xf32>
    %424 = arith.mulf %413, %391 : vector<8x128xf32>
    %425 = arith.addf %423, %424 : vector<8x128xf32>
    %426 = arith.truncf %425 : vector<8x128xf32> to vector<8x128xbf16>
    %c24_94 = arith.constant 24 : index
    %c0_95 = arith.constant 0 : index
    %427 = vector.load %arg21[%c24_94, %c0_95] : memref<64x128xbf16, #tpu.memory_space<vmem>>, vector<8x128xbf16>
    tpu.vector_store %arg21[%c24_94, %c0_95], %426 {strides = array<i32>} : memref<64x128xbf16, #tpu.memory_space<vmem>>, vector<8x128xbf16>,
    %428 = arith.truncf %425 : vector<8x128xf32> to vector<8x128xbf16>
    %cst_96 = arith.constant dense<0.000000e+00> : vector<8x384xf32>
    %429 = tpu.matmul %428, %293, %cst_96 {dimension_numbers = #tpu.dot_dimension_numbers<[1], [0], [0], [1], [0, 0, 1, 1], [], []>} : vector<8x128xbf16>, vector<128x384xbf16>, vector<8x384xf32> -> vector<8x384xf32>
    %430 = vector.extract_strided_slice %299 {offsets = [4, 0, 0], sizes = [1, 8, 128], strides = [1, 1, 1]} : vector<8x8x384xf32> to vector<1x8x128xf32>
    %431 = vector.shape_cast %430 : vector<1x8x128xf32> to vector<8x128xf32>
    %432 = vector.extract_strided_slice %429 {offsets = [0, 0], sizes = [8, 128], strides = [1, 1]} : vector<8x384xf32> to vector<8x128xf32>
    %433 = arith.addf %431, %432 : vector<8x128xf32>
    %434 = arith.negf %433 : vector<8x128xf32>
    %435 = math.exp %434 : vector<8x128xf32>
    %cst_97 = arith.constant 1.000000e+00 : f32
    %436 = vector.broadcast %cst_97 : f32 to vector<8x128xf32>
    %437 = arith.addf %436, %435 : vector<8x128xf32>
    %438 = arith.divf %436, %437 : vector<8x128xf32>
    %439 = vector.extract_strided_slice %299 {offsets = [4, 0, 128], sizes = [1, 8, 128], strides = [1, 1, 1]} : vector<8x8x384xf32> to vector<1x8x128xf32>
    %440 = vector.shape_cast %439 : vector<1x8x128xf32> to vector<8x128xf32>
    %441 = vector.extract_strided_slice %429 {offsets = [0, 128], sizes = [8, 128], strides = [1, 1]} : vector<8x384xf32> to vector<8x128xf32>
    %442 = arith.addf %440, %441 : vector<8x128xf32>
    %443 = arith.negf %442 : vector<8x128xf32>
    %444 = math.exp %443 : vector<8x128xf32>
    %cst_98 = arith.constant 1.000000e+00 : f32
    %445 = vector.broadcast %cst_98 : f32 to vector<8x128xf32>
    %446 = arith.addf %445, %444 : vector<8x128xf32>
    %447 = arith.divf %445, %446 : vector<8x128xf32>
    %448 = vector.extract_strided_slice %299 {offsets = [4, 0, 256], sizes = [1, 8, 128], strides = [1, 1, 1]} : vector<8x8x384xf32> to vector<1x8x128xf32>
    %449 = vector.shape_cast %448 : vector<1x8x128xf32> to vector<8x128xf32>
    %450 = vector.extract_strided_slice %429 {offsets = [0, 256], sizes = [8, 128], strides = [1, 1]} : vector<8x384xf32> to vector<8x128xf32>
    %451 = arith.addf %450, %301 : vector<8x128xf32>
    %452 = arith.mulf %438, %451 : vector<8x128xf32>
    %453 = arith.addf %449, %452 : vector<8x128xf32>
    %454 = math.tanh %453 : vector<8x128xf32>
    %cst_99 = arith.constant 1.000000e+00 : f32
    %455 = vector.broadcast %cst_99 : f32 to vector<8x128xf32>
    %456 = arith.subf %455, %447 : vector<8x128xf32>
    %457 = arith.mulf %456, %454 : vector<8x128xf32>
    %458 = arith.mulf %447, %425 : vector<8x128xf32>
    %459 = arith.addf %457, %458 : vector<8x128xf32>
    %460 = arith.truncf %459 : vector<8x128xf32> to vector<8x128xbf16>
    %c32_100 = arith.constant 32 : index
    %c0_101 = arith.constant 0 : index
    %461 = vector.load %arg21[%c32_100, %c0_101] : memref<64x128xbf16, #tpu.memory_space<vmem>>, vector<8x128xbf16>
    tpu.vector_store %arg21[%c32_100, %c0_101], %460 {strides = array<i32>} : memref<64x128xbf16, #tpu.memory_space<vmem>>, vector<8x128xbf16>,
    %462 = arith.truncf %459 : vector<8x128xf32> to vector<8x128xbf16>
    %cst_102 = arith.constant dense<0.000000e+00> : vector<8x384xf32>
    %463 = tpu.matmul %462, %293, %cst_102 {dimension_numbers = #tpu.dot_dimension_numbers<[1], [0], [0], [1], [0, 0, 1, 1], [], []>} : vector<8x128xbf16>, vector<128x384xbf16>, vector<8x384xf32> -> vector<8x384xf32>
    %464 = vector.extract_strided_slice %299 {offsets = [5, 0, 0], sizes = [1, 8, 128], strides = [1, 1, 1]} : vector<8x8x384xf32> to vector<1x8x128xf32>
    %465 = vector.shape_cast %464 : vector<1x8x128xf32> to vector<8x128xf32>
    %466 = vector.extract_strided_slice %463 {offsets = [0, 0], sizes = [8, 128], strides = [1, 1]} : vector<8x384xf32> to vector<8x128xf32>
    %467 = arith.addf %465, %466 : vector<8x128xf32>
    %468 = arith.negf %467 : vector<8x128xf32>
    %469 = math.exp %468 : vector<8x128xf32>
    %cst_103 = arith.constant 1.000000e+00 : f32
    %470 = vector.broadcast %cst_103 : f32 to vector<8x128xf32>
    %471 = arith.addf %470, %469 : vector<8x128xf32>
    %472 = arith.divf %470, %471 : vector<8x128xf32>
    %473 = vector.extract_strided_slice %299 {offsets = [5, 0, 128], sizes = [1, 8, 128], strides = [1, 1, 1]} : vector<8x8x384xf32> to vector<1x8x128xf32>
    %474 = vector.shape_cast %473 : vector<1x8x128xf32> to vector<8x128xf32>
    %475 = vector.extract_strided_slice %463 {offsets = [0, 128], sizes = [8, 128], strides = [1, 1]} : vector<8x384xf32> to vector<8x128xf32>
    %476 = arith.addf %474, %475 : vector<8x128xf32>
    %477 = arith.negf %476 : vector<8x128xf32>
    %478 = math.exp %477 : vector<8x128xf32>
    %cst_104 = arith.constant 1.000000e+00 : f32
    %479 = vector.broadcast %cst_104 : f32 to vector<8x128xf32>
    %480 = arith.addf %479, %478 : vector<8x128xf32>
    %481 = arith.divf %479, %480 : vector<8x128xf32>
    %482 = vector.extract_strided_slice %299 {offsets = [5, 0, 256], sizes = [1, 8, 128], strides = [1, 1, 1]} : vector<8x8x384xf32> to vector<1x8x128xf32>
    %483 = vector.shape_cast %482 : vector<1x8x128xf32> to vector<8x128xf32>
    %484 = vector.extract_strided_slice %463 {offsets = [0, 256], sizes = [8, 128], strides = [1, 1]} : vector<8x384xf32> to vector<8x128xf32>
    %485 = arith.addf %484, %301 : vector<8x128xf32>
    %486 = arith.mulf %472, %485 : vector<8x128xf32>
    %487 = arith.addf %483, %486 : vector<8x128xf32>
    %488 = math.tanh %487 : vector<8x128xf32>
    %cst_105 = arith.constant 1.000000e+00 : f32
    %489 = vector.broadcast %cst_105 : f32 to vector<8x128xf32>
    %490 = arith.subf %489, %481 : vector<8x128xf32>
    %491 = arith.mulf %490, %488 : vector<8x128xf32>
    %492 = arith.mulf %481, %459 : vector<8x128xf32>
    %493 = arith.addf %491, %492 : vector<8x128xf32>
    %494 = arith.truncf %493 : vector<8x128xf32> to vector<8x128xbf16>
    %c40_106 = arith.constant 40 : index
    %c0_107 = arith.constant 0 : index
    %495 = vector.load %arg21[%c40_106, %c0_107] : memref<64x128xbf16, #tpu.memory_space<vmem>>, vector<8x128xbf16>
    tpu.vector_store %arg21[%c40_106, %c0_107], %494 {strides = array<i32>} : memref<64x128xbf16, #tpu.memory_space<vmem>>, vector<8x128xbf16>,
    %496 = arith.truncf %493 : vector<8x128xf32> to vector<8x128xbf16>
    %cst_108 = arith.constant dense<0.000000e+00> : vector<8x384xf32>
    %497 = tpu.matmul %496, %293, %cst_108 {dimension_numbers = #tpu.dot_dimension_numbers<[1], [0], [0], [1], [0, 0, 1, 1], [], []>} : vector<8x128xbf16>, vector<128x384xbf16>, vector<8x384xf32> -> vector<8x384xf32>
    %498 = vector.extract_strided_slice %299 {offsets = [6, 0, 0], sizes = [1, 8, 128], strides = [1, 1, 1]} : vector<8x8x384xf32> to vector<1x8x128xf32>
    %499 = vector.shape_cast %498 : vector<1x8x128xf32> to vector<8x128xf32>
    %500 = vector.extract_strided_slice %497 {offsets = [0, 0], sizes = [8, 128], strides = [1, 1]} : vector<8x384xf32> to vector<8x128xf32>
    %501 = arith.addf %499, %500 : vector<8x128xf32>
    %502 = arith.negf %501 : vector<8x128xf32>
    %503 = math.exp %502 : vector<8x128xf32>
    %cst_109 = arith.constant 1.000000e+00 : f32
    %504 = vector.broadcast %cst_109 : f32 to vector<8x128xf32>
    %505 = arith.addf %504, %503 : vector<8x128xf32>
    %506 = arith.divf %504, %505 : vector<8x128xf32>
    %507 = vector.extract_strided_slice %299 {offsets = [6, 0, 128], sizes = [1, 8, 128], strides = [1, 1, 1]} : vector<8x8x384xf32> to vector<1x8x128xf32>
    %508 = vector.shape_cast %507 : vector<1x8x128xf32> to vector<8x128xf32>
    %509 = vector.extract_strided_slice %497 {offsets = [0, 128], sizes = [8, 128], strides = [1, 1]} : vector<8x384xf32> to vector<8x128xf32>
    %510 = arith.addf %508, %509 : vector<8x128xf32>
    %511 = arith.negf %510 : vector<8x128xf32>
    %512 = math.exp %511 : vector<8x128xf32>
    %cst_110 = arith.constant 1.000000e+00 : f32
    %513 = vector.broadcast %cst_110 : f32 to vector<8x128xf32>
    %514 = arith.addf %513, %512 : vector<8x128xf32>
    %515 = arith.divf %513, %514 : vector<8x128xf32>
    %516 = vector.extract_strided_slice %299 {offsets = [6, 0, 256], sizes = [1, 8, 128], strides = [1, 1, 1]} : vector<8x8x384xf32> to vector<1x8x128xf32>
    %517 = vector.shape_cast %516 : vector<1x8x128xf32> to vector<8x128xf32>
    %518 = vector.extract_strided_slice %497 {offsets = [0, 256], sizes = [8, 128], strides = [1, 1]} : vector<8x384xf32> to vector<8x128xf32>
    %519 = arith.addf %518, %301 : vector<8x128xf32>
    %520 = arith.mulf %506, %519 : vector<8x128xf32>
    %521 = arith.addf %517, %520 : vector<8x128xf32>
    %522 = math.tanh %521 : vector<8x128xf32>
    %cst_111 = arith.constant 1.000000e+00 : f32
    %523 = vector.broadcast %cst_111 : f32 to vector<8x128xf32>
    %524 = arith.subf %523, %515 : vector<8x128xf32>
    %525 = arith.mulf %524, %522 : vector<8x128xf32>
    %526 = arith.mulf %515, %493 : vector<8x128xf32>
    %527 = arith.addf %525, %526 : vector<8x128xf32>
    %528 = arith.truncf %527 : vector<8x128xf32> to vector<8x128xbf16>
    %c48_112 = arith.constant 48 : index
    %c0_113 = arith.constant 0 : index
    %529 = vector.load %arg21[%c48_112, %c0_113] : memref<64x128xbf16, #tpu.memory_space<vmem>>, vector<8x128xbf16>
    tpu.vector_store %arg21[%c48_112, %c0_113], %528 {strides = array<i32>} : memref<64x128xbf16, #tpu.memory_space<vmem>>, vector<8x128xbf16>,
    %530 = arith.truncf %527 : vector<8x128xf32> to vector<8x128xbf16>
    %cst_114 = arith.constant dense<0.000000e+00> : vector<8x384xf32>
    %531 = tpu.matmul %530, %293, %cst_114 {dimension_numbers = #tpu.dot_dimension_numbers<[1], [0], [0], [1], [0, 0, 1, 1], [], []>} : vector<8x128xbf16>, vector<128x384xbf16>, vector<8x384xf32> -> vector<8x384xf32>
    %532 = vector.extract_strided_slice %299 {offsets = [7, 0, 0], sizes = [1, 8, 128], strides = [1, 1, 1]} : vector<8x8x384xf32> to vector<1x8x128xf32>
    %533 = vector.shape_cast %532 : vector<1x8x128xf32> to vector<8x128xf32>
    %534 = vector.extract_strided_slice %531 {offsets = [0, 0], sizes = [8, 128], strides = [1, 1]} : vector<8x384xf32> to vector<8x128xf32>
    %535 = arith.addf %533, %534 : vector<8x128xf32>
    %536 = arith.negf %535 : vector<8x128xf32>
    %537 = math.exp %536 : vector<8x128xf32>
    %cst_115 = arith.constant 1.000000e+00 : f32
    %538 = vector.broadcast %cst_115 : f32 to vector<8x128xf32>
    %539 = arith.addf %538, %537 : vector<8x128xf32>
    %540 = arith.divf %538, %539 : vector<8x128xf32>
    %541 = vector.extract_strided_slice %299 {offsets = [7, 0, 128], sizes = [1, 8, 128], strides = [1, 1, 1]} : vector<8x8x384xf32> to vector<1x8x128xf32>
    %542 = vector.shape_cast %541 : vector<1x8x128xf32> to vector<8x128xf32>
    %543 = vector.extract_strided_slice %531 {offsets = [0, 128], sizes = [8, 128], strides = [1, 1]} : vector<8x384xf32> to vector<8x128xf32>
    %544 = arith.addf %542, %543 : vector<8x128xf32>
    %545 = arith.negf %544 : vector<8x128xf32>
    %546 = math.exp %545 : vector<8x128xf32>
    %cst_116 = arith.constant 1.000000e+00 : f32
    %547 = vector.broadcast %cst_116 : f32 to vector<8x128xf32>
    %548 = arith.addf %547, %546 : vector<8x128xf32>
    %549 = arith.divf %547, %548 : vector<8x128xf32>
    %550 = vector.extract_strided_slice %299 {offsets = [7, 0, 256], sizes = [1, 8, 128], strides = [1, 1, 1]} : vector<8x8x384xf32> to vector<1x8x128xf32>
    %551 = vector.shape_cast %550 : vector<1x8x128xf32> to vector<8x128xf32>
    %552 = vector.extract_strided_slice %531 {offsets = [0, 256], sizes = [8, 128], strides = [1, 1]} : vector<8x384xf32> to vector<8x128xf32>
    %553 = arith.addf %552, %301 : vector<8x128xf32>
    %554 = arith.mulf %540, %553 : vector<8x128xf32>
    %555 = arith.addf %551, %554 : vector<8x128xf32>
    %556 = math.tanh %555 : vector<8x128xf32>
    %cst_117 = arith.constant 1.000000e+00 : f32
    %557 = vector.broadcast %cst_117 : f32 to vector<8x128xf32>
    %558 = arith.subf %557, %549 : vector<8x128xf32>
    %559 = arith.mulf %558, %556 : vector<8x128xf32>
    %560 = arith.mulf %549, %527 : vector<8x128xf32>
    %561 = arith.addf %559, %560 : vector<8x128xf32>
    %562 = arith.truncf %561 : vector<8x128xf32> to vector<8x128xbf16>
    %c56_118 = arith.constant 56 : index
    %c0_119 = arith.constant 0 : index
    %563 = vector.load %arg21[%c56_118, %c0_119] : memref<64x128xbf16, #tpu.memory_space<vmem>>, vector<8x128xbf16>
    tpu.vector_store %arg21[%c56_118, %c0_119], %562 {strides = array<i32>} : memref<64x128xbf16, #tpu.memory_space<vmem>>, vector<8x128xbf16>,
    %c0_120 = arith.constant 0 : index
    %c0_121 = arith.constant 0 : index
    %564 = vector.load %arg21[%c0_120, %c0_121] : memref<64x128xbf16, #tpu.memory_space<vmem>>, vector<64x128xbf16>
    %c0_122 = arith.constant 0 : index
    %c0_123 = arith.constant 0 : index
    %565 = vector.load %arg14[%c0_122, %c0_123] : memref<128x384xbf16, #tpu.memory_space<vmem>>, vector<128x384xbf16>
    %c0_124 = arith.constant 0 : index
    %c0_125 = arith.constant 0 : index
    %566 = vector.load %arg15[%c0_124, %c0_125] : memref<128x384xbf16, #tpu.memory_space<vmem>>, vector<128x384xbf16>
    %c0_126 = arith.constant 0 : index
    %c0_127 = arith.constant 0 : index
    %567 = vector.load %arg16[%c0_126, %c0_127] : memref<1x384xf32, #tpu.memory_space<vmem>>, vector<1x384xf32>
    %c0_128 = arith.constant 0 : index
    %c0_129 = arith.constant 0 : index
    %568 = vector.load %arg17[%c0_128, %c0_129] : memref<1x128xf32, #tpu.memory_space<vmem>>, vector<1x128xf32>
    %cst_130 = arith.constant dense<0.000000e+00> : vector<64x384xf32>
    %569 = tpu.matmul %564, %565, %cst_130 {dimension_numbers = #tpu.dot_dimension_numbers<[1], [0], [0], [1], [0, 0, 1, 1], [], []>} : vector<64x128xbf16>, vector<128x384xbf16>, vector<64x384xf32> -> vector<64x384xf32>
    %570 = vector.broadcast %567 : vector<1x384xf32> to vector<64x384xf32>
    %571 = arith.addf %569, %570 : vector<64x384xf32>
    %572 = vector.shape_cast %571 : vector<64x384xf32> to vector<8x8x384xf32>
    %573 = vector.shape_cast %568 : vector<1x128xf32> to vector<1x128xf32>
    %574 = vector.broadcast %573 : vector<1x128xf32> to vector<8x128xf32>
    %575 = vector.extract_strided_slice %572 {offsets = [0, 0, 0], sizes = [1, 8, 128], strides = [1, 1, 1]} : vector<8x8x384xf32> to vector<1x8x128xf32>
    %576 = vector.shape_cast %575 : vector<1x8x128xf32> to vector<8x128xf32>
    %577 = arith.negf %576 : vector<8x128xf32>
    %578 = math.exp %577 : vector<8x128xf32>
    %cst_131 = arith.constant 1.000000e+00 : f32
    %579 = vector.broadcast %cst_131 : f32 to vector<8x128xf32>
    %580 = arith.addf %579, %578 : vector<8x128xf32>
    %581 = arith.divf %579, %580 : vector<8x128xf32>
    %582 = vector.extract_strided_slice %572 {offsets = [0, 0, 128], sizes = [1, 8, 128], strides = [1, 1, 1]} : vector<8x8x384xf32> to vector<1x8x128xf32>
    %583 = vector.shape_cast %582 : vector<1x8x128xf32> to vector<8x128xf32>
    %584 = arith.negf %583 : vector<8x128xf32>
    %585 = math.exp %584 : vector<8x128xf32>
    %cst_132 = arith.constant 1.000000e+00 : f32
    %586 = vector.broadcast %cst_132 : f32 to vector<8x128xf32>
    %587 = arith.addf %586, %585 : vector<8x128xf32>
    %588 = arith.divf %586, %587 : vector<8x128xf32>
    %589 = vector.extract_strided_slice %572 {offsets = [0, 0, 256], sizes = [1, 8, 128], strides = [1, 1, 1]} : vector<8x8x384xf32> to vector<1x8x128xf32>
    %590 = vector.shape_cast %589 : vector<1x8x128xf32> to vector<8x128xf32>
    %591 = arith.mulf %581, %574 : vector<8x128xf32>
    %592 = arith.addf %590, %591 : vector<8x128xf32>
    %593 = math.tanh %592 : vector<8x128xf32>
    %cst_133 = arith.constant 1.000000e+00 : f32
    %594 = vector.broadcast %cst_133 : f32 to vector<8x128xf32>
    %595 = arith.subf %594, %588 : vector<8x128xf32>
    %596 = arith.mulf %595, %593 : vector<8x128xf32>
    %597 = arith.truncf %596 : vector<8x128xf32> to vector<8x128xbf16>
    %cst_134 = arith.constant dense<0.000000e+00> : vector<8x384xf32>
    %598 = tpu.matmul %597, %566, %cst_134 {dimension_numbers = #tpu.dot_dimension_numbers<[1], [0], [0], [1], [0, 0, 1, 1], [], []>} : vector<8x128xbf16>, vector<128x384xbf16>, vector<8x384xf32> -> vector<8x384xf32>
    %599 = vector.extract_strided_slice %572 {offsets = [1, 0, 0], sizes = [1, 8, 128], strides = [1, 1, 1]} : vector<8x8x384xf32> to vector<1x8x128xf32>
    %600 = vector.shape_cast %599 : vector<1x8x128xf32> to vector<8x128xf32>
    %601 = vector.extract_strided_slice %598 {offsets = [0, 0], sizes = [8, 128], strides = [1, 1]} : vector<8x384xf32> to vector<8x128xf32>
    %602 = arith.addf %600, %601 : vector<8x128xf32>
    %603 = arith.negf %602 : vector<8x128xf32>
    %604 = math.exp %603 : vector<8x128xf32>
    %cst_135 = arith.constant 1.000000e+00 : f32
    %605 = vector.broadcast %cst_135 : f32 to vector<8x128xf32>
    %606 = arith.addf %605, %604 : vector<8x128xf32>
    %607 = arith.divf %605, %606 : vector<8x128xf32>
    %608 = vector.extract_strided_slice %572 {offsets = [1, 0, 128], sizes = [1, 8, 128], strides = [1, 1, 1]} : vector<8x8x384xf32> to vector<1x8x128xf32>
    %609 = vector.shape_cast %608 : vector<1x8x128xf32> to vector<8x128xf32>
    %610 = vector.extract_strided_slice %598 {offsets = [0, 128], sizes = [8, 128], strides = [1, 1]} : vector<8x384xf32> to vector<8x128xf32>
    %611 = arith.addf %609, %610 : vector<8x128xf32>
    %612 = arith.negf %611 : vector<8x128xf32>
    %613 = math.exp %612 : vector<8x128xf32>
    %cst_136 = arith.constant 1.000000e+00 : f32
    %614 = vector.broadcast %cst_136 : f32 to vector<8x128xf32>
    %615 = arith.addf %614, %613 : vector<8x128xf32>
    %616 = arith.divf %614, %615 : vector<8x128xf32>
    %617 = vector.extract_strided_slice %572 {offsets = [1, 0, 256], sizes = [1, 8, 128], strides = [1, 1, 1]} : vector<8x8x384xf32> to vector<1x8x128xf32>
    %618 = vector.shape_cast %617 : vector<1x8x128xf32> to vector<8x128xf32>
    %619 = vector.extract_strided_slice %598 {offsets = [0, 256], sizes = [8, 128], strides = [1, 1]} : vector<8x384xf32> to vector<8x128xf32>
    %620 = arith.addf %619, %574 : vector<8x128xf32>
    %621 = arith.mulf %607, %620 : vector<8x128xf32>
    %622 = arith.addf %618, %621 : vector<8x128xf32>
    %623 = math.tanh %622 : vector<8x128xf32>
    %cst_137 = arith.constant 1.000000e+00 : f32
    %624 = vector.broadcast %cst_137 : f32 to vector<8x128xf32>
    %625 = arith.subf %624, %616 : vector<8x128xf32>
    %626 = arith.mulf %625, %623 : vector<8x128xf32>
    %627 = arith.mulf %616, %596 : vector<8x128xf32>
    %628 = arith.addf %626, %627 : vector<8x128xf32>
    %629 = arith.truncf %628 : vector<8x128xf32> to vector<8x128xbf16>
    %cst_138 = arith.constant dense<0.000000e+00> : vector<8x384xf32>
    %630 = tpu.matmul %629, %566, %cst_138 {dimension_numbers = #tpu.dot_dimension_numbers<[1], [0], [0], [1], [0, 0, 1, 1], [], []>} : vector<8x128xbf16>, vector<128x384xbf16>, vector<8x384xf32> -> vector<8x384xf32>
    %631 = vector.extract_strided_slice %572 {offsets = [2, 0, 0], sizes = [1, 8, 128], strides = [1, 1, 1]} : vector<8x8x384xf32> to vector<1x8x128xf32>
    %632 = vector.shape_cast %631 : vector<1x8x128xf32> to vector<8x128xf32>
    %633 = vector.extract_strided_slice %630 {offsets = [0, 0], sizes = [8, 128], strides = [1, 1]} : vector<8x384xf32> to vector<8x128xf32>
    %634 = arith.addf %632, %633 : vector<8x128xf32>
    %635 = arith.negf %634 : vector<8x128xf32>
    %636 = math.exp %635 : vector<8x128xf32>
    %cst_139 = arith.constant 1.000000e+00 : f32
    %637 = vector.broadcast %cst_139 : f32 to vector<8x128xf32>
    %638 = arith.addf %637, %636 : vector<8x128xf32>
    %639 = arith.divf %637, %638 : vector<8x128xf32>
    %640 = vector.extract_strided_slice %572 {offsets = [2, 0, 128], sizes = [1, 8, 128], strides = [1, 1, 1]} : vector<8x8x384xf32> to vector<1x8x128xf32>
    %641 = vector.shape_cast %640 : vector<1x8x128xf32> to vector<8x128xf32>
    %642 = vector.extract_strided_slice %630 {offsets = [0, 128], sizes = [8, 128], strides = [1, 1]} : vector<8x384xf32> to vector<8x128xf32>
    %643 = arith.addf %641, %642 : vector<8x128xf32>
    %644 = arith.negf %643 : vector<8x128xf32>
    %645 = math.exp %644 : vector<8x128xf32>
    %cst_140 = arith.constant 1.000000e+00 : f32
    %646 = vector.broadcast %cst_140 : f32 to vector<8x128xf32>
    %647 = arith.addf %646, %645 : vector<8x128xf32>
    %648 = arith.divf %646, %647 : vector<8x128xf32>
    %649 = vector.extract_strided_slice %572 {offsets = [2, 0, 256], sizes = [1, 8, 128], strides = [1, 1, 1]} : vector<8x8x384xf32> to vector<1x8x128xf32>
    %650 = vector.shape_cast %649 : vector<1x8x128xf32> to vector<8x128xf32>
    %651 = vector.extract_strided_slice %630 {offsets = [0, 256], sizes = [8, 128], strides = [1, 1]} : vector<8x384xf32> to vector<8x128xf32>
    %652 = arith.addf %651, %574 : vector<8x128xf32>
    %653 = arith.mulf %639, %652 : vector<8x128xf32>
    %654 = arith.addf %650, %653 : vector<8x128xf32>
    %655 = math.tanh %654 : vector<8x128xf32>
    %cst_141 = arith.constant 1.000000e+00 : f32
    %656 = vector.broadcast %cst_141 : f32 to vector<8x128xf32>
    %657 = arith.subf %656, %648 : vector<8x128xf32>
    %658 = arith.mulf %657, %655 : vector<8x128xf32>
    %659 = arith.mulf %648, %628 : vector<8x128xf32>
    %660 = arith.addf %658, %659 : vector<8x128xf32>
    %661 = arith.truncf %660 : vector<8x128xf32> to vector<8x128xbf16>
    %cst_142 = arith.constant dense<0.000000e+00> : vector<8x384xf32>
    %662 = tpu.matmul %661, %566, %cst_142 {dimension_numbers = #tpu.dot_dimension_numbers<[1], [0], [0], [1], [0, 0, 1, 1], [], []>} : vector<8x128xbf16>, vector<128x384xbf16>, vector<8x384xf32> -> vector<8x384xf32>
    %663 = vector.extract_strided_slice %572 {offsets = [3, 0, 0], sizes = [1, 8, 128], strides = [1, 1, 1]} : vector<8x8x384xf32> to vector<1x8x128xf32>
    %664 = vector.shape_cast %663 : vector<1x8x128xf32> to vector<8x128xf32>
    %665 = vector.extract_strided_slice %662 {offsets = [0, 0], sizes = [8, 128], strides = [1, 1]} : vector<8x384xf32> to vector<8x128xf32>
    %666 = arith.addf %664, %665 : vector<8x128xf32>
    %667 = arith.negf %666 : vector<8x128xf32>
    %668 = math.exp %667 : vector<8x128xf32>
    %cst_143 = arith.constant 1.000000e+00 : f32
    %669 = vector.broadcast %cst_143 : f32 to vector<8x128xf32>
    %670 = arith.addf %669, %668 : vector<8x128xf32>
    %671 = arith.divf %669, %670 : vector<8x128xf32>
    %672 = vector.extract_strided_slice %572 {offsets = [3, 0, 128], sizes = [1, 8, 128], strides = [1, 1, 1]} : vector<8x8x384xf32> to vector<1x8x128xf32>
    %673 = vector.shape_cast %672 : vector<1x8x128xf32> to vector<8x128xf32>
    %674 = vector.extract_strided_slice %662 {offsets = [0, 128], sizes = [8, 128], strides = [1, 1]} : vector<8x384xf32> to vector<8x128xf32>
    %675 = arith.addf %673, %674 : vector<8x128xf32>
    %676 = arith.negf %675 : vector<8x128xf32>
    %677 = math.exp %676 : vector<8x128xf32>
    %cst_144 = arith.constant 1.000000e+00 : f32
    %678 = vector.broadcast %cst_144 : f32 to vector<8x128xf32>
    %679 = arith.addf %678, %677 : vector<8x128xf32>
    %680 = arith.divf %678, %679 : vector<8x128xf32>
    %681 = vector.extract_strided_slice %572 {offsets = [3, 0, 256], sizes = [1, 8, 128], strides = [1, 1, 1]} : vector<8x8x384xf32> to vector<1x8x128xf32>
    %682 = vector.shape_cast %681 : vector<1x8x128xf32> to vector<8x128xf32>
    %683 = vector.extract_strided_slice %662 {offsets = [0, 256], sizes = [8, 128], strides = [1, 1]} : vector<8x384xf32> to vector<8x128xf32>
    %684 = arith.addf %683, %574 : vector<8x128xf32>
    %685 = arith.mulf %671, %684 : vector<8x128xf32>
    %686 = arith.addf %682, %685 : vector<8x128xf32>
    %687 = math.tanh %686 : vector<8x128xf32>
    %cst_145 = arith.constant 1.000000e+00 : f32
    %688 = vector.broadcast %cst_145 : f32 to vector<8x128xf32>
    %689 = arith.subf %688, %680 : vector<8x128xf32>
    %690 = arith.mulf %689, %687 : vector<8x128xf32>
    %691 = arith.mulf %680, %660 : vector<8x128xf32>
    %692 = arith.addf %690, %691 : vector<8x128xf32>
    %693 = arith.truncf %692 : vector<8x128xf32> to vector<8x128xbf16>
    %cst_146 = arith.constant dense<0.000000e+00> : vector<8x384xf32>
    %694 = tpu.matmul %693, %566, %cst_146 {dimension_numbers = #tpu.dot_dimension_numbers<[1], [0], [0], [1], [0, 0, 1, 1], [], []>} : vector<8x128xbf16>, vector<128x384xbf16>, vector<8x384xf32> -> vector<8x384xf32>
    %695 = vector.extract_strided_slice %572 {offsets = [4, 0, 0], sizes = [1, 8, 128], strides = [1, 1, 1]} : vector<8x8x384xf32> to vector<1x8x128xf32>
    %696 = vector.shape_cast %695 : vector<1x8x128xf32> to vector<8x128xf32>
    %697 = vector.extract_strided_slice %694 {offsets = [0, 0], sizes = [8, 128], strides = [1, 1]} : vector<8x384xf32> to vector<8x128xf32>
    %698 = arith.addf %696, %697 : vector<8x128xf32>
    %699 = arith.negf %698 : vector<8x128xf32>
    %700 = math.exp %699 : vector<8x128xf32>
    %cst_147 = arith.constant 1.000000e+00 : f32
    %701 = vector.broadcast %cst_147 : f32 to vector<8x128xf32>
    %702 = arith.addf %701, %700 : vector<8x128xf32>
    %703 = arith.divf %701, %702 : vector<8x128xf32>
    %704 = vector.extract_strided_slice %572 {offsets = [4, 0, 128], sizes = [1, 8, 128], strides = [1, 1, 1]} : vector<8x8x384xf32> to vector<1x8x128xf32>
    %705 = vector.shape_cast %704 : vector<1x8x128xf32> to vector<8x128xf32>
    %706 = vector.extract_strided_slice %694 {offsets = [0, 128], sizes = [8, 128], strides = [1, 1]} : vector<8x384xf32> to vector<8x128xf32>
    %707 = arith.addf %705, %706 : vector<8x128xf32>
    %708 = arith.negf %707 : vector<8x128xf32>
    %709 = math.exp %708 : vector<8x128xf32>
    %cst_148 = arith.constant 1.000000e+00 : f32
    %710 = vector.broadcast %cst_148 : f32 to vector<8x128xf32>
    %711 = arith.addf %710, %709 : vector<8x128xf32>
    %712 = arith.divf %710, %711 : vector<8x128xf32>
    %713 = vector.extract_strided_slice %572 {offsets = [4, 0, 256], sizes = [1, 8, 128], strides = [1, 1, 1]} : vector<8x8x384xf32> to vector<1x8x128xf32>
    %714 = vector.shape_cast %713 : vector<1x8x128xf32> to vector<8x128xf32>
    %715 = vector.extract_strided_slice %694 {offsets = [0, 256], sizes = [8, 128], strides = [1, 1]} : vector<8x384xf32> to vector<8x128xf32>
    %716 = arith.addf %715, %574 : vector<8x128xf32>
    %717 = arith.mulf %703, %716 : vector<8x128xf32>
    %718 = arith.addf %714, %717 : vector<8x128xf32>
    %719 = math.tanh %718 : vector<8x128xf32>
    %cst_149 = arith.constant 1.000000e+00 : f32
    %720 = vector.broadcast %cst_149 : f32 to vector<8x128xf32>
    %721 = arith.subf %720, %712 : vector<8x128xf32>
    %722 = arith.mulf %721, %719 : vector<8x128xf32>
    %723 = arith.mulf %712, %692 : vector<8x128xf32>
    %724 = arith.addf %722, %723 : vector<8x128xf32>
    %725 = arith.truncf %724 : vector<8x128xf32> to vector<8x128xbf16>
    %cst_150 = arith.constant dense<0.000000e+00> : vector<8x384xf32>
    %726 = tpu.matmul %725, %566, %cst_150 {dimension_numbers = #tpu.dot_dimension_numbers<[1], [0], [0], [1], [0, 0, 1, 1], [], []>} : vector<8x128xbf16>, vector<128x384xbf16>, vector<8x384xf32> -> vector<8x384xf32>
    %727 = vector.extract_strided_slice %572 {offsets = [5, 0, 0], sizes = [1, 8, 128], strides = [1, 1, 1]} : vector<8x8x384xf32> to vector<1x8x128xf32>
    %728 = vector.shape_cast %727 : vector<1x8x128xf32> to vector<8x128xf32>
    %729 = vector.extract_strided_slice %726 {offsets = [0, 0], sizes = [8, 128], strides = [1, 1]} : vector<8x384xf32> to vector<8x128xf32>
    %730 = arith.addf %728, %729 : vector<8x128xf32>
    %731 = arith.negf %730 : vector<8x128xf32>
    %732 = math.exp %731 : vector<8x128xf32>
    %cst_151 = arith.constant 1.000000e+00 : f32
    %733 = vector.broadcast %cst_151 : f32 to vector<8x128xf32>
    %734 = arith.addf %733, %732 : vector<8x128xf32>
    %735 = arith.divf %733, %734 : vector<8x128xf32>
    %736 = vector.extract_strided_slice %572 {offsets = [5, 0, 128], sizes = [1, 8, 128], strides = [1, 1, 1]} : vector<8x8x384xf32> to vector<1x8x128xf32>
    %737 = vector.shape_cast %736 : vector<1x8x128xf32> to vector<8x128xf32>
    %738 = vector.extract_strided_slice %726 {offsets = [0, 128], sizes = [8, 128], strides = [1, 1]} : vector<8x384xf32> to vector<8x128xf32>
    %739 = arith.addf %737, %738 : vector<8x128xf32>
    %740 = arith.negf %739 : vector<8x128xf32>
    %741 = math.exp %740 : vector<8x128xf32>
    %cst_152 = arith.constant 1.000000e+00 : f32
    %742 = vector.broadcast %cst_152 : f32 to vector<8x128xf32>
    %743 = arith.addf %742, %741 : vector<8x128xf32>
    %744 = arith.divf %742, %743 : vector<8x128xf32>
    %745 = vector.extract_strided_slice %572 {offsets = [5, 0, 256], sizes = [1, 8, 128], strides = [1, 1, 1]} : vector<8x8x384xf32> to vector<1x8x128xf32>
    %746 = vector.shape_cast %745 : vector<1x8x128xf32> to vector<8x128xf32>
    %747 = vector.extract_strided_slice %726 {offsets = [0, 256], sizes = [8, 128], strides = [1, 1]} : vector<8x384xf32> to vector<8x128xf32>
    %748 = arith.addf %747, %574 : vector<8x128xf32>
    %749 = arith.mulf %735, %748 : vector<8x128xf32>
    %750 = arith.addf %746, %749 : vector<8x128xf32>
    %751 = math.tanh %750 : vector<8x128xf32>
    %cst_153 = arith.constant 1.000000e+00 : f32
    %752 = vector.broadcast %cst_153 : f32 to vector<8x128xf32>
    %753 = arith.subf %752, %744 : vector<8x128xf32>
    %754 = arith.mulf %753, %751 : vector<8x128xf32>
    %755 = arith.mulf %744, %724 : vector<8x128xf32>
    %756 = arith.addf %754, %755 : vector<8x128xf32>
    %757 = arith.truncf %756 : vector<8x128xf32> to vector<8x128xbf16>
    %cst_154 = arith.constant dense<0.000000e+00> : vector<8x384xf32>
    %758 = tpu.matmul %757, %566, %cst_154 {dimension_numbers = #tpu.dot_dimension_numbers<[1], [0], [0], [1], [0, 0, 1, 1], [], []>} : vector<8x128xbf16>, vector<128x384xbf16>, vector<8x384xf32> -> vector<8x384xf32>
    %759 = vector.extract_strided_slice %572 {offsets = [6, 0, 0], sizes = [1, 8, 128], strides = [1, 1, 1]} : vector<8x8x384xf32> to vector<1x8x128xf32>
    %760 = vector.shape_cast %759 : vector<1x8x128xf32> to vector<8x128xf32>
    %761 = vector.extract_strided_slice %758 {offsets = [0, 0], sizes = [8, 128], strides = [1, 1]} : vector<8x384xf32> to vector<8x128xf32>
    %762 = arith.addf %760, %761 : vector<8x128xf32>
    %763 = arith.negf %762 : vector<8x128xf32>
    %764 = math.exp %763 : vector<8x128xf32>
    %cst_155 = arith.constant 1.000000e+00 : f32
    %765 = vector.broadcast %cst_155 : f32 to vector<8x128xf32>
    %766 = arith.addf %765, %764 : vector<8x128xf32>
    %767 = arith.divf %765, %766 : vector<8x128xf32>
    %768 = vector.extract_strided_slice %572 {offsets = [6, 0, 128], sizes = [1, 8, 128], strides = [1, 1, 1]} : vector<8x8x384xf32> to vector<1x8x128xf32>
    %769 = vector.shape_cast %768 : vector<1x8x128xf32> to vector<8x128xf32>
    %770 = vector.extract_strided_slice %758 {offsets = [0, 128], sizes = [8, 128], strides = [1, 1]} : vector<8x384xf32> to vector<8x128xf32>
    %771 = arith.addf %769, %770 : vector<8x128xf32>
    %772 = arith.negf %771 : vector<8x128xf32>
    %773 = math.exp %772 : vector<8x128xf32>
    %cst_156 = arith.constant 1.000000e+00 : f32
    %774 = vector.broadcast %cst_156 : f32 to vector<8x128xf32>
    %775 = arith.addf %774, %773 : vector<8x128xf32>
    %776 = arith.divf %774, %775 : vector<8x128xf32>
    %777 = vector.extract_strided_slice %572 {offsets = [6, 0, 256], sizes = [1, 8, 128], strides = [1, 1, 1]} : vector<8x8x384xf32> to vector<1x8x128xf32>
    %778 = vector.shape_cast %777 : vector<1x8x128xf32> to vector<8x128xf32>
    %779 = vector.extract_strided_slice %758 {offsets = [0, 256], sizes = [8, 128], strides = [1, 1]} : vector<8x384xf32> to vector<8x128xf32>
    %780 = arith.addf %779, %574 : vector<8x128xf32>
    %781 = arith.mulf %767, %780 : vector<8x128xf32>
    %782 = arith.addf %778, %781 : vector<8x128xf32>
    %783 = math.tanh %782 : vector<8x128xf32>
    %cst_157 = arith.constant 1.000000e+00 : f32
    %784 = vector.broadcast %cst_157 : f32 to vector<8x128xf32>
    %785 = arith.subf %784, %776 : vector<8x128xf32>
    %786 = arith.mulf %785, %783 : vector<8x128xf32>
    %787 = arith.mulf %776, %756 : vector<8x128xf32>
    %788 = arith.addf %786, %787 : vector<8x128xf32>
    %789 = arith.truncf %788 : vector<8x128xf32> to vector<8x128xbf16>
    %cst_158 = arith.constant dense<0.000000e+00> : vector<8x384xf32>
    %790 = tpu.matmul %789, %566, %cst_158 {dimension_numbers = #tpu.dot_dimension_numbers<[1], [0], [0], [1], [0, 0, 1, 1], [], []>} : vector<8x128xbf16>, vector<128x384xbf16>, vector<8x384xf32> -> vector<8x384xf32>
    %791 = vector.extract_strided_slice %572 {offsets = [7, 0, 0], sizes = [1, 8, 128], strides = [1, 1, 1]} : vector<8x8x384xf32> to vector<1x8x128xf32>
    %792 = vector.shape_cast %791 : vector<1x8x128xf32> to vector<8x128xf32>
    %793 = vector.extract_strided_slice %790 {offsets = [0, 0], sizes = [8, 128], strides = [1, 1]} : vector<8x384xf32> to vector<8x128xf32>
    %794 = arith.addf %792, %793 : vector<8x128xf32>
    %795 = arith.negf %794 : vector<8x128xf32>
    %796 = math.exp %795 : vector<8x128xf32>
    %cst_159 = arith.constant 1.000000e+00 : f32
    %797 = vector.broadcast %cst_159 : f32 to vector<8x128xf32>
    %798 = arith.addf %797, %796 : vector<8x128xf32>
    %799 = arith.divf %797, %798 : vector<8x128xf32>
    %800 = vector.extract_strided_slice %572 {offsets = [7, 0, 128], sizes = [1, 8, 128], strides = [1, 1, 1]} : vector<8x8x384xf32> to vector<1x8x128xf32>
    %801 = vector.shape_cast %800 : vector<1x8x128xf32> to vector<8x128xf32>
    %802 = vector.extract_strided_slice %790 {offsets = [0, 128], sizes = [8, 128], strides = [1, 1]} : vector<8x384xf32> to vector<8x128xf32>
    %803 = arith.addf %801, %802 : vector<8x128xf32>
    %804 = arith.negf %803 : vector<8x128xf32>
    %805 = math.exp %804 : vector<8x128xf32>
    %cst_160 = arith.constant 1.000000e+00 : f32
    %806 = vector.broadcast %cst_160 : f32 to vector<8x128xf32>
    %807 = arith.addf %806, %805 : vector<8x128xf32>
    %808 = arith.divf %806, %807 : vector<8x128xf32>
    %809 = vector.extract_strided_slice %572 {offsets = [7, 0, 256], sizes = [1, 8, 128], strides = [1, 1, 1]} : vector<8x8x384xf32> to vector<1x8x128xf32>
    %810 = vector.shape_cast %809 : vector<1x8x128xf32> to vector<8x128xf32>
    %811 = vector.extract_strided_slice %790 {offsets = [0, 256], sizes = [8, 128], strides = [1, 1]} : vector<8x384xf32> to vector<8x128xf32>
    %812 = arith.addf %811, %574 : vector<8x128xf32>
    %813 = arith.mulf %799, %812 : vector<8x128xf32>
    %814 = arith.addf %810, %813 : vector<8x128xf32>
    %815 = math.tanh %814 : vector<8x128xf32>
    %cst_161 = arith.constant 1.000000e+00 : f32
    %816 = vector.broadcast %cst_161 : f32 to vector<8x128xf32>
    %817 = arith.subf %816, %808 : vector<8x128xf32>
    %818 = arith.mulf %817, %815 : vector<8x128xf32>
    %819 = arith.mulf %808, %788 : vector<8x128xf32>
    %820 = arith.addf %818, %819 : vector<8x128xf32>
    %821 = arith.truncf %820 : vector<8x128xf32> to vector<8x128xbf16>
    %c0_162 = arith.constant 0 : index
    %c0_163 = arith.constant 0 : index
    %822 = vector.load %arg18[%c0_162, %c0_163] : memref<128x128xbf16, #tpu.memory_space<vmem>>, vector<128x128xbf16>
    %cst_164 = arith.constant dense<0.000000e+00> : vector<8x128xf32>
    %823 = tpu.matmul %821, %822, %cst_164 {dimension_numbers = #tpu.dot_dimension_numbers<[1], [0], [0], [1], [0, 0, 1, 1], [], []>} : vector<8x128xbf16>, vector<128x128xbf16>, vector<8x128xf32> -> vector<8x128xf32>
    %c0_165 = arith.constant 0 : index
    %c0_166 = arith.constant 0 : index
    %824 = vector.load %arg19[%c0_165, %c0_166] : memref<1x128xf32, #tpu.memory_space<vmem>>, vector<1x128xf32>
    %825 = vector.broadcast %824 : vector<1x128xf32> to vector<8x128xf32>
    %826 = arith.addf %823, %825 : vector<8x128xf32>
    %c0_167 = arith.constant 0 : index
    %c0_168 = arith.constant 0 : index
    %827 = vector.load %arg20[%c0_167, %c0_168] : memref<8x128xf32, #tpu.memory_space<vmem>>, vector<8x128xf32>
    tpu.vector_store %arg20[%c0_167, %c0_168], %826 {strides = array<i32>} : memref<8x128xf32, #tpu.memory_space<vmem>>, vector<8x128xf32>,
    return
  }
  func.func @transform_0(%arg0: i32) -> (i32, i32, i32) {
    %c0_i32 = arith.constant 0 : i32
    %c0_i32_0 = arith.constant 0 : i32
    %c0_i32_1 = arith.constant 0 : i32
    return %c0_i32, %arg0, %c0_i32_0 : i32, i32, i32
  }
  func.func @transform_1(%arg0: i32) -> (i32, i32) {
    %c0_i32 = arith.constant 0 : i32
    %c0_i32_0 = arith.constant 0 : i32
    %c0_i32_1 = arith.constant 0 : i32
    return %c0_i32, %c0_i32_0 : i32, i32
  }
  func.func @transform_2(%arg0: i32) -> (i32, i32) {
    %c0_i32 = arith.constant 0 : i32
    %c0_i32_0 = arith.constant 0 : i32
    %c0_i32_1 = arith.constant 0 : i32
    return %c0_i32, %c0_i32_0 : i32, i32
  }
  func.func @transform_3(%arg0: i32) -> (i32, i32) {
    %c0_i32 = arith.constant 0 : i32
    %c0_i32_0 = arith.constant 0 : i32
    %c0_i32_1 = arith.constant 0 : i32
    return %c0_i32, %c0_i32_0 : i32, i32
  }
  func.func @transform_4(%arg0: i32) -> (i32, i32) {
    %c0_i32 = arith.constant 0 : i32
    %c0_i32_0 = arith.constant 0 : i32
    %c0_i32_1 = arith.constant 0 : i32
    return %c0_i32, %c0_i32_0 : i32, i32
  }
  func.func @transform_5(%arg0: i32) -> (i32, i32) {
    %c0_i32 = arith.constant 0 : i32
    %c0_i32_0 = arith.constant 0 : i32
    %c0_i32_1 = arith.constant 0 : i32
    return %c0_i32, %c0_i32_0 : i32, i32
  }
  func.func @transform_6(%arg0: i32) -> (i32, i32) {
    %c0_i32 = arith.constant 0 : i32
    %c0_i32_0 = arith.constant 0 : i32
    %c0_i32_1 = arith.constant 0 : i32
    return %c0_i32, %c0_i32_0 : i32, i32
  }
  func.func @transform_7(%arg0: i32) -> (i32, i32) {
    %c0_i32 = arith.constant 0 : i32
    %c0_i32_0 = arith.constant 0 : i32
    %c0_i32_1 = arith.constant 0 : i32
    return %c0_i32, %c0_i32_0 : i32, i32
  }
  func.func @transform_8(%arg0: i32) -> (i32, i32) {
    %c0_i32 = arith.constant 0 : i32
    %c0_i32_0 = arith.constant 0 : i32
    %c0_i32_1 = arith.constant 0 : i32
    return %c0_i32, %c0_i32_0 : i32, i32
  }
  func.func @transform_9(%arg0: i32) -> (i32, i32) {
    %c0_i32 = arith.constant 0 : i32
    %c0_i32_0 = arith.constant 0 : i32
    %c0_i32_1 = arith.constant 0 : i32
    return %c0_i32, %c0_i32_0 : i32, i32
  }
  func.func @transform_10(%arg0: i32) -> (i32, i32) {
    %c0_i32 = arith.constant 0 : i32
    %c0_i32_0 = arith.constant 0 : i32
    %c0_i32_1 = arith.constant 0 : i32
    return %c0_i32, %c0_i32_0 : i32, i32
  }
  func.func @transform_11(%arg0: i32) -> (i32, i32) {
    %c0_i32 = arith.constant 0 : i32
    %c0_i32_0 = arith.constant 0 : i32
    %c0_i32_1 = arith.constant 0 : i32
    return %c0_i32, %c0_i32_0 : i32, i32
  }
  func.func @transform_12(%arg0: i32) -> (i32, i32) {
    %c0_i32 = arith.constant 0 : i32
    %c0_i32_0 = arith.constant 0 : i32
    %c0_i32_1 = arith.constant 0 : i32
    return %c0_i32, %c0_i32_0 : i32, i32
  }
  func.func @transform_13(%arg0: i32) -> (i32, i32) {
    %c0_i32 = arith.constant 0 : i32
    %c0_i32_0 = arith.constant 0 : i32
    %c0_i32_1 = arith.constant 0 : i32
    return %c0_i32, %c0_i32_0 : i32, i32
  }
  func.func @transform_14(%arg0: i32) -> (i32, i32) {
    %c0_i32 = arith.constant 0 : i32
    %c0_i32_0 = arith.constant 0 : i32
    %c0_i32_1 = arith.constant 0 : i32
    return %c0_i32, %c0_i32_0 : i32, i32
  }
  func.func @transform_15(%arg0: i32) -> (i32, i32) {
    %c0_i32 = arith.constant 0 : i32
    %c0_i32_0 = arith.constant 0 : i32
    %c0_i32_1 = arith.constant 0 : i32
    return %c0_i32, %c0_i32_0 : i32, i32
  }
  func.func @transform_16(%arg0: i32) -> (i32, i32) {
    %c0_i32 = arith.constant 0 : i32
    %c0_i32_0 = arith.constant 0 : i32
    %c0_i32_1 = arith.constant 0 : i32
    return %c0_i32, %c0_i32_0 : i32, i32
  }
  func.func @transform_17(%arg0: i32) -> (i32, i32) {
    %c0_i32 = arith.constant 0 : i32
    %c0_i32_0 = arith.constant 0 : i32
    %c0_i32_1 = arith.constant 0 : i32
    return %c0_i32, %c0_i32_0 : i32, i32
  }
  func.func @transform_18(%arg0: i32) -> (i32, i32) {
    %c0_i32 = arith.constant 0 : i32
    %c0_i32_0 = arith.constant 0 : i32
    %c0_i32_1 = arith.constant 0 : i32
    return %c0_i32, %c0_i32_0 : i32, i32
  }
  func.func @transform_19(%arg0: i32) -> (i32, i32) {
    %c0_i32 = arith.constant 0 : i32
    %c0_i32_0 = arith.constant 0 : i32
    return %arg0, %c0_i32 : i32, i32
  }
}

</mosaic_0001>

<bundles_post_ra>
// kernel: rnn_model_forward.1
= control target key start
LH: loop header
LB: loop body
LE: loop exit
PB: predicated region body
PF: predicated region fallthrough
CT: control target
= control target key end

     0   :  { %vm96_vm0 = vcmask 1040384   ;;  %vm97_vm1 = vcmask 1041408   ;;  %v5471_v1 = vmov 65535   ;;  %vm83_vm2 = vcmask 23552   ;;  %s7401_s1 = inlined_call_operand.vmem [shape: bf16[3,64], index: 1, kind: input, shape index: {}]   ;;  %s7402_s0 = inlined_call_operand.vmem [shape: f32[8,8,3], index: 0, kind: input, shape index: {}]   ;;  %s7403_s3 = inlined_call_operand.vmem [shape: bf16[64,32], index: 3, kind: input, shape index: {}]   ;;  %s7404_s2 = inlined_call_operand.vmem [shape: f32[1,64], index: 2, kind: input, shape index: {}]   ;;  %s7405_s5 = inlined_call_operand.vmem [shape: bf16[32,384], index: 5, kind: input, shape index: {}]   ;;  %s7406_s4 = inlined_call_operand.vmem [shape: f32[1,32], index: 4, kind: input, shape index: {}]   ;;  %s7407_s6 = inlined_call_operand.vmem [shape: bf16[128,384], index: 6, kind: input, shape index: {}]   ;;  %s7408_s7 = inlined_call_operand.vmem [shape: f32[1,384], index: 7, kind: input, shape index: {}]   ;;  %s7409_s8 = inlined_call_operand.vmem [shape: f32[1,128], index: 8, kind: input, shape index: {}]   ;;  %s7410_s9 = inlined_call_operand.vmem [shape: bf16[128,384], index: 9, kind: input, shape index: {}]   ;;  %s7411_s10 = inlined_call_operand.vmem [shape: bf16[128,384], index: 10, kind: input, shape index: {}]   ;;  %s7412_s11 = inlined_call_operand.vmem [shape: f32[1,384], index: 11, kind: input, shape index: {}]   ;;  %s7413_s12 = inlined_call_operand.vmem [shape: f32[1,128], index: 12, kind: input, shape index: {}]   ;;  %s7414_s13 = inlined_call_operand.vmem [shape: bf16[128,384], index: 13, kind: input, shape index: {}]   ;;  %s7415_s14 = inlined_call_operand.vmem [shape: bf16[128,384], index: 14, kind: input, shape index: {}]   ;;  %s7416_s15 = inlined_call_operand.vmem [shape: f32[1,384], index: 15, kind: input, shape index: {}]   ;;  %s7417_s16 = inlined_call_operand.vmem [shape: f32[1,128], index: 16, kind: input, shape index: {}]   ;;  %s7418_s17 = inlined_call_operand.vmem [shape: bf16[128,128], index: 17, kind: input, shape index: {}]   ;;  %s7419_s18 = inlined_call_operand.vmem [shape: f32[1,128], index: 18, kind: input, shape index: {}]   ;;  %s7420_s19 = inlined_call_operand.vmem [shape: f32[8,128], index: 19, kind: output, shape index: {}]  }
   0x1   :  { %7433 = sst [smem:[#allocation12_spill]] %s7401_s1  ;;  %v98_v2 = vsel %vm96_vm0, 4294967295, %v5471_v1  ;;  %vm219_vm3 = vcmask 523264   ;;  %v5033_v50 = vld [vmem:[%s7405_s5 + $0x4] ss:$12 sps:$4 sm:$0xff]   ;;  %v7423_v56 = vmov 0  }
   0x2   :  { %7434 = sst [smem:[#allocation13_spill]] %s7402_s0  ;;  %s7437_s20 = sld [smem:[#allocation12_spill]]  ;;  %v99_v5 = vsel %vm97_vm1, %v98_v2, 0  ;;  %v5035_v51 = vld [vmem:[%s7405_s5] ss:$12 sps:$4 sm:$0xff]   ;;  %412 = vmatprep.subr.bf16.mxu0 %v5033_v50  ;;  %444 = vmatprep.mubr.bf16.mxu0 %v7423_v56  ;;  %vm399_vm4 = vcmask 261120  }
   0x3   :  { %7435 = sst [smem:[#allocation14_spill]] %s7403_s3  ;;  %s7438_s22 = sld [smem:[#allocation13_spill]]  ;;  %v5036_v52 = vld [vmem:[%s7405_s5 + $0x8] ss:$12 sps:$4 sm:$0xff]   ;;  %413 = vmatpush1.bf16.msra.mxu0 %v5035_v51  ;;  %v5039_v54 = vld [vmem:[%s7405_s5 + $0x18] ss:$12 sps:$4 sm:$0xff]  }
   0x4   :  { %7436 = sst [smem:[#allocation15_spill]] %s7404_s2  ;;  %s7439_s21 = sld [smem:[#allocation14_spill]]  ;;  %v5037_v53 = vld [vmem:[%s7405_s5 + $0x1c] ss:$12 sps:$4 sm:$0xff]   ;;  %v5040_v55 = vld [vmem:[%s7405_s5 + $0x20] ss:$12 sps:$4 sm:$0xff]  }
   0x5   :  { %s7440_s30 = sld [smem:[#allocation15_spill]]  ;;  %414 = vmatprep.subr.bf16.mxu0 %v5037_v53  ;;  %v4055_v57 = vld [vmem:[%s7406_s4] ss:$0 sm:$0xff]  ;;  %vm5474_vm5 = vmmov 0  }
   0x6   :  { %v349_v50 = vld [vmem:[%s7408_s7] sm:$0x7] }
   0x7   :  { %415 = vmatpush1.bf16.msra.mxu0 %v5039_v54 }
   0x8   :  { %v75_v0 = vld [vmem:[%s7437_s20] sm:$0x3] }
   0x9   :  { %v63_v3 = vld [vmem:[%s7438_s22] sm:$0xff]  ;;  %v64_v4 = vld [vmem:[%s7438_s22 + $0x8] sm:$0xff]  ;;  %v65_v7 = vld [vmem:[%s7438_s22 + $0x10] sm:$0xff]  ;;  %v101_v9 = vand.u32 %v99_v5, %v75_v0 }
   0xa   :  { %v71_v6 = vpack.c.bf16 %v64_v4, %v63_v3  ;;  %v66_v8 = vld [vmem:[%s7438_s22 + $0x18] sm:$0xff]  ;;  %v67_v10 = vld [vmem:[%s7438_s22 + $0x20] sm:$0xff]  ;;  %v68_v11 = vld [vmem:[%s7438_s22 + $0x28] sm:$0xff] }
   0xb   :  { %v5029_v12 = vld [vmem:[%s7439_s21] sm:$0xff]   ;;  %4499 = vmatprep.subr.bf16.mxu1 %v101_v9  ;;  %v72_v13 = vpack.c.bf16 %v66_v8, %v65_v7  ;;  %v73_v14 = vpack.c.bf16 %v68_v11, %v67_v10  ;;  %v5030_v15 = vld [vmem:[%s7439_s21 + $0x8] sm:$0xff]   ;;  %v69_v16 = vld [vmem:[%s7438_s22 + $0x30] sm:$0xff] }
   0xc   :  { %4501 = vmatprep.mubr.msk.bf16.mxu1 %vm83_vm2, %v71_v6  ;;  %4500 = vmatpush3.bf16.msra.mxu1 %v101_v9  ;;  %v70_v17 = vld [vmem:[%s7438_s22 + $0x38] sm:$0xff]  ;;  %v5031_v19 = vld [vmem:[%s7439_s21 + $0x10] sm:$0xff]   ;;  %v4050_v21 = vld [vmem:[%s7440_s30] ss:$0 sm:$0xff] }
   0xd   :  { %4509 = vmatprep.subr.bf16.mxu1 %v5029_v12  ;;  %v74_v18 = vpack.c.bf16 %v70_v17, %v69_v16  ;;  %v5032_v20 = vld [vmem:[%s7439_s21 + $0x18] sm:$0xff]  }
   0xf   :  { %4502 = vmatmul.mubr.msk.bf16.vlgmr.msra.gmra.mrb[0].mxu1 %vm83_vm2, %v72_v13 }
  0x10   :  { %4505 = vmatprep.mubr.msk.bf16.mxu1 %vm83_vm2, %v73_v14  ;;  %4510 = vmatpush3.bf16.msra.mxu1 %v5029_v12 }
  0x11   :  { %4511 = vmatprep.subr.bf16.mxu1 %v5030_v15 }
  0x14   :  { %4512 = vmatpush3.bf16.msra.mxu1 %v5030_v15 }
  0x15   :  { %4513 = vmatprep.subr.bf16.mxu1 %v5031_v19 }
  0x17   :  { %4506 = vmatmul.mubr.msk.bf16.gmra.mrb[4].mxu1 %vm83_vm2, %v74_v18 }
  0x18   :  { %4514 = vmatpush3.bf16.msra.mxu1 %v5031_v19 }
  0x19   :  { %4515 = vmatprep.subr.bf16.mxu1 %v5032_v20 }
  0x1c   :  { %4516 = vmatpush3.bf16.msra.mxu1 %v5032_v20 }
  0x1d   :  { %4525 = vmatprep.subr.bf16.mxu1 %v5036_v52 }
  0xe2   :  { %v4503_v22 = vpop.f32.mrb[0].mxu1 }
  0xe3   :  { %v146_v23 = vadd.f32 %v4503_v22, %v4050_v21  ;;  %v137_v24 = vpop.f32.mrb[1].mxu1  ;;  %v5662_v22 = vld [vmem:[%s7407_s6 + $0x4] ss:$12 sps:$4 sm:$0xff]  }
  0xe4   :  { %v138_v25 = vadd.f32 %v4050_v21, %v137_v24  ;;  %v4504_v26 = vpop.f32.mrb[2].mxu1  ;;  %703 = vmatprep.subr.bf16.mxu0 %v5662_v22  ;;  %v7425_v24 = vmov 0.0  }
  0xe5   :  { %v149_v27 = vadd.f32 %v4504_v26, %v4050_v21  ;;  %v140_v28 = vpop.f32.mrb[3].mxu1  ;;  %v170_v30 = vmax.f32 %v146_v23, 0.0  ;;  %v5667_v23 = vld [vmem:[%s7407_s6] ss:$12 sps:$4 sm:$0xff]   ;;  %v5681_v26 = vld [vmem:[%s7407_s6 + $0x1c] ss:$12 sps:$4 sm:$0xff]  }
  0xe6   :  { %v141_v29 = vadd.f32 %v4050_v21, %v140_v28  ;;  %v168_v32 = vmax.f32 %v138_v25, 0.0  ;;  %v5674_v25 = vld [vmem:[%s7407_s6 + $0x8] ss:$12 sps:$4 sm:$0xff]   ;;  %v5692_v28 = vld [vmem:[%s7407_s6 + $0x20] ss:$12 sps:$4 sm:$0xff]  }
  0xe7   :  { %v171_v31 = vmax.f32 %v149_v27, 0.0  ;;  %v5686_v27 = vld [vmem:[%s7407_s6 + $0x18] ss:$12 sps:$4 sm:$0xff]  }
  0xe8   :  { %v169_v33 = vmax.f32 %v141_v29, 0.0  ;;  %v5700_v29 = vld [vmem:[%s7407_s6 + $0x34] ss:$12 sps:$4 sm:$0xff]  }
  0xe9   :  { %v177_v34 = vpack.c.bf16 %v171_v31, %v170_v30  ;;  %v5705_v30 = vld [vmem:[%s7407_s6 + $0x30] ss:$12 sps:$4 sm:$0xff]   ;;  %v5711_v31 = vld [vmem:[%s7407_s6 + $0x38] ss:$12 sps:$4 sm:$0xff]  }
  0xea   :  { %v176_v35 = vpack.c.bf16 %v169_v33, %v168_v32  ;;  %v4507_v36 = vpop.f32.mrb[4].mxu1  ;;  %v5719_v32 = vld [vmem:[%s7407_s6 + $0x4c] ss:$12 sps:$4 sm:$0xff]   ;;  %v5724_v33 = vld [vmem:[%s7407_s6 + $0x48] ss:$12 sps:$4 sm:$0xff]  }
  0xeb   :  { %v162_v37 = vadd.f32 %v4507_v36, %v4050_v21  ;;  %v153_v38 = vpop.f32.mrb[5].mxu1  ;;  %v5743_v36 = vld [vmem:[%s7407_s6 + $0x60] ss:$12 sps:$4 sm:$0xff]  }
  0xec   :  { %4517 = vmatprep.mubr.msk.bf16.mxu1 %vm219_vm3, %v176_v35  ;;  %v154_v39 = vadd.f32 %v4050_v21, %v153_v38  ;;  %v4508_v40 = vpop.f32.mrb[6].mxu1  ;;  %v5738_v35 = vld [vmem:[%s7407_s6 + $0x64] ss:$12 sps:$4 sm:$0xff]   ;;  %v5756_v38 = vld [vmem:[%s7407_s6 + $0x7c] ss:$12 sps:$4 sm:$0xff]  }
  0xed   :  { %4518 = vmatmul.mubr.msk.bf16.vlgmr.msra.gmra.mrb[8].mxu1 %vm219_vm3, %v177_v34  ;;  %v174_v41 = vmax.f32 %v162_v37, 0.0  ;;  %v165_v42 = vadd.f32 %v4508_v40, %v4050_v21  ;;  %v156_v43 = vpop.f32.mrb[7].mxu1  ;;  %v5730_v34 = vld [vmem:[%s7407_s6 + $0x50] ss:$12 sps:$4 sm:$0xff]   ;;  %v5749_v37 = vld [vmem:[%s7407_s6 + $0x68] ss:$12 sps:$4 sm:$0xff]  }
  0xee   :  { %v172_v44 = vmax.f32 %v154_v39, 0.0  ;;  %v157_v45 = vadd.f32 %v4050_v21, %v156_v43  ;;  %4526 = vmatpush3.bf16.msra.mxu1 %v5036_v52  ;;  %v5761_v39 = vld [vmem:[%s7407_s6 + $0x78] ss:$12 sps:$4 sm:$0xff]   ;;  %v5767_v40 = vld [vmem:[%s7407_s6 + $0x80] ss:$12 sps:$4 sm:$0xff]  }
  0xef   :  { %v175_v46 = vmax.f32 %v165_v42, 0.0  ;;  %4527 = vmatprep.subr.bf16.mxu1 %v5040_v55  ;;  %v5780_v42 = vld [vmem:[%s7407_s6 + $0x90] ss:$12 sps:$4 sm:$0xff]   ;;  %v5789_v43 = vld [vmem:[%s7407_s6 + $0x98] ss:$12 sps:$4 sm:$0xff]  }
  0xf0   :  { %v173_v47 = vmax.f32 %v157_v45, 0.0  ;;  %v5801_v45 = vld [vmem:[%s7407_s6 + $0xa8] ss:$12 sps:$4 sm:$0xff]  }
  0xf1   :  { %v179_v48 = vpack.c.bf16 %v175_v46, %v174_v41  ;;  %v5772_v41 = vld [vmem:[%s7407_s6 + $0x94] ss:$12 sps:$4 sm:$0xff]   ;;  %v5808_v46 = vld [vmem:[%s7407_s6 + $0xb0] ss:$12 sps:$4 sm:$0xff]  }
  0xf2   :  { %v178_v49 = vpack.c.bf16 %v173_v47, %v172_v44  ;;  %4528 = vmatpush3.bf16.msra.mxu1 %v5040_v55  ;;  %v5794_v44 = vld [vmem:[%s7407_s6 + $0xac] ss:$12 sps:$4 sm:$0xff]   ;;  %v352_v47 = vlaneseq }
  0xf3   :  { %4537 = vmatprep.subr.bf16.mxu1 %v7425_v24 }
  0xf4   :  { %4521 = vmatprep.mubr.msk.bf16.mxu1 %vm219_vm3, %v178_v49 }
  0xf5   :  { %4522 = vmatmul.mubr.msk.bf16.gmra.mrb[12].mxu1 %vm219_vm3, %v179_v48  ;;  %v353_v48 = vshrl.u32 %v352_v47, 7 }
  0xf7   :  { %v5815_v49 = vsub.s32 0, %v353_v48  ;;  %v5820_v51 = vsub.s32 2, %v353_v48  ;;  %v5822_v52 = vsub.s32 1, %v353_v48 }
  0xf9   :  { %7441 = vst [vmem:[#allocation3_spill] sm:$0xff] %v5815_v49  ;;  %7442 = vst [vmem:[#allocation4_spill] sm:$0xff] %v5820_v51  ;;  %v355_v53 = vrot.slane %v349_v50, %v5815_v49  ;;  %v363_v54 = vrot.slane %v349_v50, %v5820_v51 }
  0xfa   :  { %7443 = vst [vmem:[#allocation5_spill] sm:$0xff] %v5822_v52 }
 0x1c0   :  { %v4519_v58 = vpop.f32.mrb[8].mxu1 }
 0x1c1   :  { %v275_v59 = vadd.f32 %v4519_v58, %v4055_v57  ;;  %v266_v60 = vpop.f32.mrb[9].mxu1 }
 0x1c2   :  { %v267_v61 = vadd.f32 %v4055_v57, %v266_v60  ;;  %v4520_v62 = vpop.f32.mrb[10].mxu1 }
 0x1c3   :  { %v278_v63 = vadd.f32 %v4520_v62, %v4055_v57  ;;  %v269_v0 = vpop.f32.mrb[11].mxu1  ;;  %v299_v2 = vmax.f32 %v275_v59, 0.0 }
 0x1c4   :  { %v270_v1 = vadd.f32 %v4055_v57, %v269_v0  ;;  %v297_v4 = vmax.f32 %v267_v61, 0.0 }
 0x1c5   :  { %v300_v3 = vmax.f32 %v278_v63, 0.0 }
 0x1c6   :  { %v298_v5 = vmax.f32 %v270_v1, 0.0 }
 0x1c7   :  { %v306_v6 = vpack.c.bf16 %v300_v3, %v299_v2 }
 0x1c8   :  { %v305_v7 = vpack.c.bf16 %v298_v5, %v297_v4  ;;  %v4523_v8 = vpop.f32.mrb[12].mxu1 }
 0x1c9   :  { %v291_v9 = vadd.f32 %v4523_v8, %v4055_v57  ;;  %v282_v10 = vpop.f32.mrb[13].mxu1 }
 0x1ca   :  { %4070 = vmatmul.mubr.msk.bf16.vlgmr.msra.gmra.mrb[0].mxu0 %vm399_vm4, %v305_v7  ;;  %4529 = vmatprep.mubr.msk.bf16.mxu1 %vm399_vm4, %v305_v7  ;;  %v283_v11 = vadd.f32 %v4055_v57, %v282_v10  ;;  %v4524_v12 = vpop.f32.mrb[14].mxu1 }
 0x1cb   :  { %4530 = vmatmul.mubr.msk.bf16.vlgmr.msra.gmra.mrb[16].mxu1 %vm399_vm4, %v306_v6  ;;  %454 = vmatprep.mubr.bf16.mxu0 %v7423_v56  ;;  %v303_v13 = vmax.f32 %v291_v9, 0.0  ;;  %v294_v14 = vadd.f32 %v4524_v12, %v4055_v57  ;;  %v285_v15 = vpop.f32.mrb[15].mxu1 }
 0x1cc   :  { %v301_v16 = vmax.f32 %v283_v11, 0.0  ;;  %v286_v17 = vadd.f32 %v4055_v57, %v285_v15  ;;  %704 = vmatpush1.bf16.msra.mxu0 %v5667_v23  ;;  %4538 = vmatpush3.bf16.msra.mxu1 %v5674_v25  ;;  %v359_v57 = vrot.slane %v349_v50, %v5822_v52 }
 0x1cd   :  { %v304_v18 = vmax.f32 %v294_v14, 0.0  ;;  %4539 = vmatprep.subr.bf16.mxu1 %v7425_v24  ;;  %705 = vmatprep.subr.bf16.mxu0 %v5681_v26 }
 0x1ce   :  { %v302_v19 = vmax.f32 %v286_v17, 0.0 }
 0x1cf   :  { %v308_v20 = vpack.c.bf16 %v304_v18, %v303_v13 }
 0x1d0   :  { %v307_v21 = vpack.c.bf16 %v302_v19, %v301_v16  ;;  %706 = vmatpush1.bf16.msra.mxu0 %v5686_v27  ;;  %4540 = vmatpush3.bf16.msra.mxu1 %v5692_v28 }
 0x1d1   :  { %4541 = vmatprep.subr.bf16.mxu1 %v7425_v24  ;;  %707 = vmatprep.subr.bf16.mxu0 %v5700_v29 }
 0x1d2   :  { %4071 = vmatmul.mubr.msk.bf16.gmra.mrb[4].mxu0 %vm399_vm4, %v306_v6  ;;  %4533 = vmatprep.mubr.msk.bf16.mxu1 %vm399_vm4, %v307_v21 }
 0x1d3   :  { %464 = vmatprep.mubr.bf16.mxu0 %v7423_v56  ;;  %4534 = vmatmul.mubr.msk.bf16.gmra.mrb[20].mxu1 %vm399_vm4, %v308_v20 }
 0x1d4   :  { %708 = vmatpush1.bf16.msra.mxu0 %v5705_v30  ;;  %4542 = vmatpush3.bf16.msra.mxu1 %v5711_v31 }
 0x1d5   :  { %4543 = vmatprep.subr.bf16.mxu1 %v7425_v24  ;;  %709 = vmatprep.subr.bf16.mxu0 %v5719_v32 }
 0x1d6   :  { %4553 = vmatprep.mubr.msk.bf16.mxu1 %vm5474_vm5, %v7425_v24 }
 0x1d8   :  { %710 = vmatpush1.bf16.msra.mxu0 %v5724_v33  ;;  %4544 = vmatpush3.bf16.msra.mxu1 %v5730_v34 }
 0x1d9   :  { %4545 = vmatprep.subr.bf16.mxu1 %v7425_v24  ;;  %711 = vmatprep.subr.bf16.mxu0 %v5738_v35 }
 0x1da   :  { %4072 = vmatmul.mubr.msk.bf16.gmra.mrb[8].mxu0 %vm399_vm4, %v307_v21 }
 0x1db   :  { %474 = vmatprep.mubr.bf16.mxu0 %v7423_v56 }
 0x1dc   :  { %712 = vmatpush1.bf16.msra.mxu0 %v5743_v36  ;;  %4546 = vmatpush3.bf16.msra.mxu1 %v5749_v37 }
 0x1dd   :  { %713 = vmatprep.subr.bf16.mxu0 %v5756_v38  ;;  %4547 = vmatprep.subr.bf16.mxu1 %v7425_v24 }
 0x1e0   :  { %714 = vmatpush1.bf16.msra.mxu0 %v5761_v39  ;;  %4548 = vmatpush3.bf16.msra.mxu1 %v5767_v40 }
 0x1e1   :  { %715 = vmatprep.subr.bf16.mxu0 %v5772_v41  ;;  %4549 = vmatprep.subr.bf16.mxu1 %v7425_v24 }
 0x1e2   :  { %4073 = vmatmul.mubr.msk.bf16.gmra.mrb[12].mxu0 %vm399_vm4, %v308_v20 }
 0x1e3   :  { %735 = vmatprep.mubr.bf16.mxu0 %v7423_v56 }
 0x1e4   :  { %716 = vmatpush1.bf16.msra.mxu0 %v5780_v42  ;;  %4550 = vmatpush3.bf16.msra.mxu1 %v5789_v43 }
 0x1e5   :  { %717 = vmatprep.subr.bf16.mxu0 %v5794_v44  ;;  %4551 = vmatprep.subr.bf16.mxu1 %v7425_v24 }
 0x1e8   :  { %718 = vmatpush1.bf16.msra.mxu0 %v5801_v45  ;;  %4552 = vmatpush3.bf16.msra.mxu1 %v5808_v46 }
 0x1e9   :  { %811 = vmatprep.subr.bf16.mxu0 %v5662_v22  ;;  %4557 = vmatprep.subr.bf16.mxu1 %v7425_v24 }
 0x29d   :  { %v446_v55 = vpop.f32.mrb[0].mxu0 }
 0x29e   :  { %v447_v58 = vadd.f32 %v446_v55, %v355_v53  ;;  %v448_v59 = vpop.f32.mrb[1].mxu0  ;;  %v4531_v60 = vpop.f32.mrb[16].mxu1 }
 0x29f   :  { %v5827_v61 = vadd.f32 %v4531_v60, %v363_v54  ;;  %v450_v62 = vpop.f32.mrb[2].mxu0  ;;  %v519_v63 = vpop.f32.mrb[17].mxu1  ;;  %v449_v4 = vadd.f32 %v448_v59, %v359_v57 }
 0x2a0   :  { %v4079_v0 = vmul.f32 -1.442695, %v447_v58  ;;  %v5829_v1 = vadd.f32 %v450_v62, %v355_v53  ;;  %v452_v2 = vpop.f32.mrb[3].mxu0  ;;  %v4532_v3 = vpop.f32.mrb[18].mxu1 }
 0x2a1   :  { %v5831_v5 = vadd.f32 %v452_v2, %v359_v57  ;;  %v5833_v6 = vadd.f32 %v4532_v3, %v363_v54  ;;  %v522_v7 = vpop.f32.mrb[19].mxu1  ;;  %v4080_v9 = vmul.f32 -1.442695, %v449_v4 }
 0x2a2   :  { %5209 = vpow2.f32 %v4079_v0  ;;  %v5835_v8 = vadd.f32 %v522_v7, %v363_v54 }
 0x2a3   :  { %5211 = vpow2.f32 %v4080_v9 }
 0x2a5   :  { %v456_v10 = vpop.f32.mrb[4].mxu0 }
 0x2a6   :  { %v5837_v11 = vadd.f32 %v456_v10, %v355_v53  ;;  %v458_v12 = vpop.f32.mrb[5].mxu0  ;;  %v4535_v13 = vpop.f32.mrb[20].mxu1 }
 0x2a7   :  { %v5839_v14 = vadd.f32 %v458_v12, %v359_v57  ;;  %v460_v15 = vpop.f32.mrb[6].mxu0  ;;  %v5841_v16 = vadd.f32 %v4535_v13, %v363_v54  ;;  %v535_v17 = vpop.f32.mrb[21].mxu1 }
 0x2a8   :  { %v5843_v18 = vadd.f32 %v460_v15, %v355_v53  ;;  %v462_v19 = vpop.f32.mrb[7].mxu0  ;;  %v5845_v20 = vadd.f32 %v535_v17, %v363_v54  ;;  %v4536_v21 = vpop.f32.mrb[22].mxu1 }
 0x2a9   :  { %v5847_v47 = vadd.f32 %v462_v19, %v359_v57  ;;  %v5849_v48 = vadd.f32 %v4536_v21, %v363_v54  ;;  %v538_v50 = vpop.f32.mrb[23].mxu1  ;;  %v5866_v19 = vld [vmem:[%s7409_s8] ss:$0 sm:$0xff] }
 0x2aa   :  { %v5851_v55 = vadd.f32 %v538_v50, %v363_v54 }
 0x2ab   :  { %7444 = vst [vmem:[#allocation6_spill] sm:$0xff] %v5849_v48 }
 0x2ac   :  { %v5210_v58 = vpop.eup %5209 }
 0x2ad   :  { %v559_v59 = vadd.f32 1.0, %v5210_v58  ;;  %v466_v60 = vpop.f32.mrb[8].mxu0  ;;  %v5212_v10 = vpop.eup %5211 }
 0x2ae   :  { %v5853_v62 = vadd.f32 %v466_v60, %v355_v53  ;;  %v468_v0 = vpop.f32.mrb[9].mxu0  ;;  %v565_v13 = vadd.f32 1.0, %v5212_v10 }
 0x2af   :  { %5213 = vrcp.f32 %v559_v59  ;;  %v5855_v2 = vadd.f32 %v468_v0, %v359_v57  ;;  %v470_v3 = vpop.f32.mrb[10].mxu0 }
 0x2b0   :  { %v5857_v4 = vadd.f32 %v470_v3, %v355_v53  ;;  %v472_v7 = vpop.f32.mrb[11].mxu0  ;;  %5215 = vrcp.f32 %v565_v13  ;;  %v520_v3 = vadd.f32 %v519_v63, %v363_v54  ;;  %v7447_v54 = vmov 0  }
 0x2b1   :  { %v5859_v9 = vadd.f32 %v472_v7, %v359_v57 }
 0x2b5   :  { %v476_v12 = vpop.f32.mrb[12].mxu0 }
 0x2b6   :  { %v5861_v15 = vadd.f32 %v476_v12, %v355_v53  ;;  %v478_v17 = vpop.f32.mrb[13].mxu0 }
 0x2b7   :  { %v5868_v21 = vadd.f32 %v478_v17, %v359_v57  ;;  %v480_v50 = vpop.f32.mrb[14].mxu0 }
 0x2b8   :  { %v5870_v58 = vadd.f32 %v480_v50, %v355_v53  ;;  %v482_v59 = vpop.f32.mrb[15].mxu0  ;;  %v7446_v53 = vmov 0.0  }
 0x2b9   :  { %v5214_v60 = vpop.eup %5213  ;;  %v5872_v0 = vadd.f32 %v482_v59, %v359_v57 }
 0x2ba   :  { %v568_v7 = vmul.f32 %v5214_v60, %v5866_v19  ;;  %v5216_v12 = vpop.eup %5215 }
 0x2bb   :  { %7445 = vst [vmem:[#allocation7_spill] sm:$0xff] %v5872_v0  ;;  %v571_v56 = vsub.f32 1.0, %v5216_v12 }
 0x2bc   :  { %v569_v10 = vadd.f32 %v568_v7, %v520_v3 }
 0x2be   :  { %5217 = vtanh.f32 %v569_v10 }
 0x2c8   :  { %v5218_v24 = vpop.eup %5217 }
 0x2c9   :  { %v5875_v51 = vmul.f32 %v5218_v24, %v571_v56 }
 0x2cb   :  { %v573_v17 = vpack.c.bf16 %v5875_v51, %v5875_v51 }
 0x2cd   :  { %574 = vst [vmem:[#allocation2] sm:$0xf] %v573_v17  ;;  %736 = vmatmul.mubr.bf16.vlgmr.msra.gmra.mrb[16].mxu0 %v573_v17  ;;  %4554 = vmatmul.mubr.bf16.vlgmr.msra.gmra.mrb[24].mxu1 %v573_v17 }
 0x2ce   :  { %812 = vmatpush1.bf16.msra.mxu0 %v5667_v23  ;;  %4558 = vmatpush3.bf16.msra.mxu1 %v5674_v25 }
 0x2cf   :  { %813 = vmatprep.subr.bf16.mxu0 %v5681_v26  ;;  %4559 = vmatprep.subr.bf16.mxu1 %v7446_v53 }
 0x2d0   :  { %843 = vmatprep.mubr.bf16.mxu0 %v7447_v54  ;;  %4573 = vmatprep.mubr.msk.bf16.mxu1 %vm5474_vm5, %v7446_v53 }
 0x2d2   :  { %814 = vmatpush1.bf16.msra.mxu0 %v5686_v27  ;;  %4560 = vmatpush3.bf16.msra.mxu1 %v5692_v28 }
 0x2d3   :  { %815 = vmatprep.subr.bf16.mxu0 %v5700_v29  ;;  %4561 = vmatprep.subr.bf16.mxu1 %v7446_v53 }
 0x2d6   :  { %816 = vmatpush1.bf16.msra.mxu0 %v5705_v30  ;;  %4562 = vmatpush3.bf16.msra.mxu1 %v5711_v31 }
 0x2d7   :  { %817 = vmatprep.subr.bf16.mxu0 %v5719_v32  ;;  %4563 = vmatprep.subr.bf16.mxu1 %v7446_v53 }
 0x2da   :  { %818 = vmatpush1.bf16.msra.mxu0 %v5724_v33  ;;  %4564 = vmatpush3.bf16.msra.mxu1 %v5730_v34 }
 0x2db   :  { %819 = vmatprep.subr.bf16.mxu0 %v5738_v35  ;;  %4565 = vmatprep.subr.bf16.mxu1 %v7446_v53 }
 0x2de   :  { %820 = vmatpush1.bf16.msra.mxu0 %v5743_v36  ;;  %4566 = vmatpush3.bf16.msra.mxu1 %v5749_v37 }
 0x2df   :  { %821 = vmatprep.subr.bf16.mxu0 %v5756_v38  ;;  %4567 = vmatprep.subr.bf16.mxu1 %v7446_v53 }
 0x2e2   :  { %822 = vmatpush1.bf16.msra.mxu0 %v5761_v39  ;;  %4568 = vmatpush3.bf16.msra.mxu1 %v5767_v40 }
 0x2e3   :  { %823 = vmatprep.subr.bf16.mxu0 %v5772_v41  ;;  %4569 = vmatprep.subr.bf16.mxu1 %v7446_v53 }
 0x2e6   :  { %824 = vmatpush1.bf16.msra.mxu0 %v5780_v42  ;;  %4570 = vmatpush3.bf16.msra.mxu1 %v5789_v43 }
 0x2e7   :  { %825 = vmatprep.subr.bf16.mxu0 %v5794_v44  ;;  %4571 = vmatprep.subr.bf16.mxu1 %v7446_v53 }
 0x2ea   :  { %826 = vmatpush1.bf16.msra.mxu0 %v5801_v45  ;;  %4572 = vmatpush3.bf16.msra.mxu1 %v5808_v46 }
 0x2eb   :  { %916 = vmatprep.subr.bf16.mxu0 %v5662_v22  ;;  %4577 = vmatprep.subr.bf16.mxu1 %v7446_v53 }
 0x3a0   :  { %v737_v56 = vpop.f32.mrb[16].mxu0  ;;  %v778_v24 = vpop.f32.mrb[24].mxu1 }
 0x3a1   :  { %v784_v57 = vadd.f32 %v737_v56, %v5829_v1  ;;  %v739_v63 = vpop.f32.mrb[17].mxu0  ;;  %v4555_v13 = vpop.f32.mrb[25].mxu1  ;;  %v798_v0 = vadd.f32 %v5866_v19, %v778_v24 }
 0x3a2   :  { %v791_v50 = vadd.f32 %v739_v63, %v5831_v5  ;;  %v741_v59 = vpop.f32.mrb[18].mxu0  ;;  %v781_v60 = vpop.f32.mrb[26].mxu1 }
 0x3a3   :  { %v4105_v3 = vmul.f32 -1.442695, %v784_v57  ;;  %v742_v7 = vpop.f32.mrb[19].mxu0  ;;  %v4556_v10 = vpop.f32.mrb[27].mxu1 }
 0x3a4   :  { %v4106_v12 = vmul.f32 -1.442695, %v791_v50 }
 0x3a5   :  { %5219 = vpow2.f32 %v4105_v3 }
 0x3a6   :  { %5221 = vpow2.f32 %v4106_v12 }
 0x3af   :  { %v5220_v17 = vpop.eup %5219 }
 0x3b0   :  { %v788_v52 = vadd.f32 1.0, %v5220_v17  ;;  %v5222_v48 = vpop.eup %5221 }
 0x3b1   :  { %v795_v49 = vadd.f32 1.0, %v5222_v48 }
 0x3b2   :  { %5223 = vrcp.f32 %v788_v52 }
 0x3b3   :  { %5225 = vrcp.f32 %v795_v49 }
 0x3bc   :  { %v5224_v1 = vpop.eup %5223 }
 0x3bd   :  { %v799_v56 = vmul.f32 %v5224_v1, %v798_v0  ;;  %v5226_v63 = vpop.eup %5225 }
 0x3be   :  { %v802_v57 = vsub.f32 1.0, %v5226_v63  ;;  %v804_v50 = vmul.f32 %v5226_v63, %v5875_v51 }
 0x3bf   :  { %v800_v5 = vadd.f32 %v799_v56, %v5835_v8 }
 0x3c1   :  { %5227 = vtanh.f32 %v800_v5 }
 0x3cb   :  { %v5228_v13 = vpop.eup %5227 }
 0x3cc   :  { %v803_v59 = vmul.f32 %v5228_v13, %v802_v57 }
 0x3ce   :  { %v5919_v60 = vadd.f32 %v804_v50, %v803_v59 }
 0x3d0   :  { %v806_v52 = vpack.c.bf16 %v5919_v60, %v5919_v60 }
 0x3d2   :  { %v808_v48 = vrot.slane %v806_v52, 4  ;;  %844 = vmatmul.mubr.bf16.vlgmr.msra.gmra.mrb[20].mxu0 %v806_v52  ;;  %4574 = vmatmul.mubr.bf16.vlgmr.msra.gmra.mrb[28].mxu1 %v806_v52 }
 0x3d3   :  { %917 = vmatpush1.bf16.msra.mxu0 %v5667_v23  ;;  %4578 = vmatpush3.bf16.msra.mxu1 %v5674_v25 }
 0x3d4   :  { %810 = vst [vmem:[#allocation2] sm:$0xf0] %v808_v48  ;;  %918 = vmatprep.subr.bf16.mxu0 %v5681_v26  ;;  %4579 = vmatprep.subr.bf16.mxu1 %v7446_v53 }
 0x3d5   :  { %948 = vmatprep.mubr.bf16.mxu0 %v7447_v54  ;;  %4593 = vmatprep.mubr.msk.bf16.mxu1 %vm5474_vm5, %v7446_v53 }
 0x3d7   :  { %919 = vmatpush1.bf16.msra.mxu0 %v5686_v27  ;;  %4580 = vmatpush3.bf16.msra.mxu1 %v5692_v28 }
 0x3d8   :  { %920 = vmatprep.subr.bf16.mxu0 %v5700_v29  ;;  %4581 = vmatprep.subr.bf16.mxu1 %v7446_v53 }
 0x3db   :  { %921 = vmatpush1.bf16.msra.mxu0 %v5705_v30  ;;  %4582 = vmatpush3.bf16.msra.mxu1 %v5711_v31 }
 0x3dc   :  { %922 = vmatprep.subr.bf16.mxu0 %v5719_v32  ;;  %4583 = vmatprep.subr.bf16.mxu1 %v7446_v53 }
 0x3df   :  { %923 = vmatpush1.bf16.msra.mxu0 %v5724_v33  ;;  %4584 = vmatpush3.bf16.msra.mxu1 %v5730_v34 }
 0x3e0   :  { %924 = vmatprep.subr.bf16.mxu0 %v5738_v35  ;;  %4585 = vmatprep.subr.bf16.mxu1 %v7446_v53 }
 0x3e3   :  { %925 = vmatpush1.bf16.msra.mxu0 %v5743_v36  ;;  %4586 = vmatpush3.bf16.msra.mxu1 %v5749_v37 }
 0x3e4   :  { %926 = vmatprep.subr.bf16.mxu0 %v5756_v38  ;;  %4587 = vmatprep.subr.bf16.mxu1 %v7446_v53 }
 0x3e7   :  { %927 = vmatpush1.bf16.msra.mxu0 %v5761_v39  ;;  %4588 = vmatpush3.bf16.msra.mxu1 %v5767_v40 }
 0x3e8   :  { %928 = vmatprep.subr.bf16.mxu0 %v5772_v41  ;;  %4589 = vmatprep.subr.bf16.mxu1 %v7446_v53 }
 0x3eb   :  { %929 = vmatpush1.bf16.msra.mxu0 %v5780_v42  ;;  %4590 = vmatpush3.bf16.msra.mxu1 %v5789_v43 }
 0x3ec   :  { %930 = vmatprep.subr.bf16.mxu0 %v5794_v44  ;;  %4591 = vmatprep.subr.bf16.mxu1 %v7446_v53 }
 0x3ef   :  { %931 = vmatpush1.bf16.msra.mxu0 %v5801_v45  ;;  %4592 = vmatpush3.bf16.msra.mxu1 %v5808_v46 }
 0x3f0   :  { %1024 = vmatprep.subr.bf16.mxu0 %v5662_v22  ;;  %4597 = vmatprep.subr.bf16.mxu1 %v7446_v53 }
 0x4a5   :  { %v845_v49 = vpop.f32.mrb[20].mxu0  ;;  %v886_v51 = vpop.f32.mrb[28].mxu1 }
 0x4a6   :  { %v892_v8 = vadd.f32 %v845_v49, %v5837_v11  ;;  %v847_v0 = vpop.f32.mrb[21].mxu0  ;;  %v4575_v24 = vpop.f32.mrb[29].mxu1  ;;  %v906_v59 = vadd.f32 %v5866_v19, %v886_v51 }
 0x4a7   :  { %v899_v3 = vadd.f32 %v847_v0, %v5839_v14  ;;  %v849_v7 = vpop.f32.mrb[22].mxu0  ;;  %v889_v10 = vpop.f32.mrb[30].mxu1 }
 0x4a8   :  { %v4107_v12 = vmul.f32 -1.442695, %v892_v8  ;;  %v850_v17 = vpop.f32.mrb[23].mxu0  ;;  %v4576_v1 = vpop.f32.mrb[31].mxu1 }
 0x4a9   :  { %v4108_v56 = vmul.f32 -1.442695, %v899_v3 }
 0x4aa   :  { %5229 = vpow2.f32 %v4107_v12 }
 0x4ab   :  { %5231 = vpow2.f32 %v4108_v56 }
 0x4b4   :  { %v5230_v5 = vpop.eup %5229 }
 0x4b5   :  { %v896_v63 = vadd.f32 1.0, %v5230_v5  ;;  %v5232_v57 = vpop.eup %5231 }
 0x4b6   :  { %v903_v13 = vadd.f32 1.0, %v5232_v57 }
 0x4b7   :  { %5233 = vrcp.f32 %v896_v63 }
 0x4b8   :  { %5235 = vrcp.f32 %v903_v13 }
 0x4c1   :  { %v5234_v11 = vpop.eup %5233 }
 0x4c2   :  { %v907_v50 = vmul.f32 %v5234_v11, %v906_v59  ;;  %v5236_v52 = vpop.eup %5235 }
 0x4c3   :  { %v910_v48 = vsub.f32 1.0, %v5236_v52  ;;  %v912_v0 = vmul.f32 %v5236_v52, %v5919_v60 }
 0x4c4   :  { %v908_v14 = vadd.f32 %v907_v50, %v5827_v61 }
 0x4c6   :  { %5237 = vtanh.f32 %v908_v14 }
 0x4d0   :  { %v5238_v49 = vpop.eup %5237 }
 0x4d1   :  { %v911_v8 = vmul.f32 %v5238_v49, %v910_v48 }
 0x4d3   :  { %v5963_v24 = vadd.f32 %v912_v0, %v911_v8 }
 0x4d5   :  { %v914_v3 = vpack.c.bf16 %v5963_v24, %v5963_v24 }
 0x4d7   :  { %915 = vst [vmem:[#allocation2 + $0x8] sm:$0xf] %v914_v3  ;;  %949 = vmatmul.mubr.bf16.vlgmr.msra.gmra.mrb[24].mxu0 %v914_v3  ;;  %4594 = vmatmul.mubr.bf16.vlgmr.msra.gmra.mrb[32].mxu1 %v914_v3 }
 0x4d8   :  { %1025 = vmatpush1.bf16.msra.mxu0 %v5667_v23  ;;  %4598 = vmatpush3.bf16.msra.mxu1 %v5674_v25 }
 0x4d9   :  { %1026 = vmatprep.subr.bf16.mxu0 %v5681_v26  ;;  %4599 = vmatprep.subr.bf16.mxu1 %v7446_v53 }
 0x4da   :  { %1056 = vmatprep.mubr.bf16.mxu0 %v7447_v54  ;;  %4613 = vmatprep.mubr.msk.bf16.mxu1 %vm5474_vm5, %v7446_v53 }
 0x4dc   :  { %1027 = vmatpush1.bf16.msra.mxu0 %v5686_v27  ;;  %4600 = vmatpush3.bf16.msra.mxu1 %v5692_v28 }
 0x4dd   :  { %1028 = vmatprep.subr.bf16.mxu0 %v5700_v29  ;;  %4601 = vmatprep.subr.bf16.mxu1 %v7446_v53 }
 0x4e0   :  { %1029 = vmatpush1.bf16.msra.mxu0 %v5705_v30  ;;  %4602 = vmatpush3.bf16.msra.mxu1 %v5711_v31 }
 0x4e1   :  { %1030 = vmatprep.subr.bf16.mxu0 %v5719_v32  ;;  %4603 = vmatprep.subr.bf16.mxu1 %v7446_v53 }
 0x4e4   :  { %1031 = vmatpush1.bf16.msra.mxu0 %v5724_v33  ;;  %4604 = vmatpush3.bf16.msra.mxu1 %v5730_v34 }
 0x4e5   :  { %1032 = vmatprep.subr.bf16.mxu0 %v5738_v35  ;;  %4605 = vmatprep.subr.bf16.mxu1 %v7446_v53 }
 0x4e8   :  { %1033 = vmatpush1.bf16.msra.mxu0 %v5743_v36  ;;  %4606 = vmatpush3.bf16.msra.mxu1 %v5749_v37 }
 0x4e9   :  { %1034 = vmatprep.subr.bf16.mxu0 %v5756_v38  ;;  %4607 = vmatprep.subr.bf16.mxu1 %v7446_v53 }
 0x4ec   :  { %1035 = vmatpush1.bf16.msra.mxu0 %v5761_v39  ;;  %4608 = vmatpush3.bf16.msra.mxu1 %v5767_v40 }
 0x4ed   :  { %1036 = vmatprep.subr.bf16.mxu0 %v5772_v41  ;;  %4609 = vmatprep.subr.bf16.mxu1 %v7446_v53 }
 0x4f0   :  { %1037 = vmatpush1.bf16.msra.mxu0 %v5780_v42  ;;  %4610 = vmatpush3.bf16.msra.mxu1 %v5789_v43 }
 0x4f1   :  { %1038 = vmatprep.subr.bf16.mxu0 %v5794_v44  ;;  %4611 = vmatprep.subr.bf16.mxu1 %v7446_v53 }
 0x4f4   :  { %1039 = vmatpush1.bf16.msra.mxu0 %v5801_v45  ;;  %4612 = vmatpush3.bf16.msra.mxu1 %v5808_v46 }
 0x4f5   :  { %1129 = vmatprep.subr.bf16.mxu0 %v5662_v22  ;;  %4617 = vmatprep.subr.bf16.mxu1 %v7446_v53 }
 0x5aa   :  { %v950_v61 = vpop.f32.mrb[24].mxu0  ;;  %v991_v60 = vpop.f32.mrb[32].mxu1 }
 0x5ab   :  { %v997_v51 = vadd.f32 %v950_v61, %v5843_v18  ;;  %v952_v7 = vpop.f32.mrb[25].mxu0  ;;  %v4595_v10 = vpop.f32.mrb[33].mxu1  ;;  %v1011_v14 = vadd.f32 %v5866_v19, %v991_v60 }
 0x5ac   :  { %v1004_v12 = vadd.f32 %v952_v7, %v5847_v47  ;;  %v954_v17 = vpop.f32.mrb[26].mxu0  ;;  %v994_v1 = vpop.f32.mrb[34].mxu1 }
 0x5ad   :  { %v4109_v56 = vmul.f32 -1.442695, %v997_v51  ;;  %v955_v5 = vpop.f32.mrb[27].mxu0  ;;  %v4596_v63 = vpop.f32.mrb[35].mxu1 }
 0x5ae   :  { %v4110_v57 = vmul.f32 -1.442695, %v1004_v12 }
 0x5af   :  { %5239 = vpow2.f32 %v4109_v56 }
 0x5b0   :  { %5241 = vpow2.f32 %v4110_v57 }
 0x5b9   :  { %v5240_v13 = vpop.eup %5239 }
 0x5ba   :  { %v1001_v59 = vadd.f32 1.0, %v5240_v13  ;;  %v5242_v11 = vpop.eup %5241 }
 0x5bb   :  { %v1008_v50 = vadd.f32 1.0, %v5242_v11 }
 0x5bc   :  { %5243 = vrcp.f32 %v1001_v59 }
 0x5bd   :  { %5245 = vrcp.f32 %v1008_v50 }
 0x5c6   :  { %v5244_v18 = vpop.eup %5243 }
 0x5c7   :  { %v1012_v52 = vmul.f32 %v5244_v18, %v1011_v14  ;;  %v5246_v48 = vpop.eup %5245 }
 0x5c8   :  { %v1015_v49 = vsub.f32 1.0, %v5246_v48  ;;  %v1017_v3 = vmul.f32 %v5246_v48, %v5963_v24 }
 0x5c9   :  { %v1013_v47 = vadd.f32 %v1012_v52, %v5833_v6 }
 0x5cb   :  { %5247 = vtanh.f32 %v1013_v47 }
 0x5d5   :  { %v5248_v8 = vpop.eup %5247 }
 0x5d6   :  { %v1016_v0 = vmul.f32 %v5248_v8, %v1015_v49 }
 0x5d8   :  { %v6007_v61 = vadd.f32 %v1017_v3, %v1016_v0 }
 0x5da   :  { %v1019_v51 = vpack.c.bf16 %v6007_v61, %v6007_v61 }
 0x5dc   :  { %v1021_v7 = vrot.slane %v1019_v51, 4  ;;  %1057 = vmatmul.mubr.bf16.vlgmr.msra.gmra.mrb[28].mxu0 %v1019_v51  ;;  %4614 = vmatmul.mubr.bf16.vlgmr.msra.gmra.mrb[36].mxu1 %v1019_v51 }
 0x5dd   :  { %1130 = vmatpush1.bf16.msra.mxu0 %v5667_v23  ;;  %4618 = vmatpush3.bf16.msra.mxu1 %v5674_v25 }
 0x5de   :  { %1023 = vst [vmem:[#allocation2 + $0x8] sm:$0xf0] %v1021_v7  ;;  %1131 = vmatprep.subr.bf16.mxu0 %v5681_v26  ;;  %4619 = vmatprep.subr.bf16.mxu1 %v7446_v53 }
 0x5df   :  { %1161 = vmatprep.mubr.bf16.mxu0 %v7447_v54  ;;  %4633 = vmatprep.mubr.msk.bf16.mxu1 %vm5474_vm5, %v7446_v53 }
 0x5e1   :  { %1132 = vmatpush1.bf16.msra.mxu0 %v5686_v27  ;;  %4620 = vmatpush3.bf16.msra.mxu1 %v5692_v28 }
 0x5e2   :  { %1133 = vmatprep.subr.bf16.mxu0 %v5700_v29  ;;  %4621 = vmatprep.subr.bf16.mxu1 %v7446_v53 }
 0x5e5   :  { %1134 = vmatpush1.bf16.msra.mxu0 %v5705_v30  ;;  %4622 = vmatpush3.bf16.msra.mxu1 %v5711_v31 }
 0x5e6   :  { %1135 = vmatprep.subr.bf16.mxu0 %v5719_v32  ;;  %4623 = vmatprep.subr.bf16.mxu1 %v7446_v53 }
 0x5e9   :  { %1136 = vmatpush1.bf16.msra.mxu0 %v5724_v33  ;;  %4624 = vmatpush3.bf16.msra.mxu1 %v5730_v34 }
 0x5ea   :  { %1137 = vmatprep.subr.bf16.mxu0 %v5738_v35  ;;  %4625 = vmatprep.subr.bf16.mxu1 %v7446_v53 }
 0x5ed   :  { %1138 = vmatpush1.bf16.msra.mxu0 %v5743_v36  ;;  %4626 = vmatpush3.bf16.msra.mxu1 %v5749_v37 }
 0x5ee   :  { %1139 = vmatprep.subr.bf16.mxu0 %v5756_v38  ;;  %4627 = vmatprep.subr.bf16.mxu1 %v7446_v53 }
 0x5f1   :  { %1140 = vmatpush1.bf16.msra.mxu0 %v5761_v39  ;;  %4628 = vmatpush3.bf16.msra.mxu1 %v5767_v40 }
 0x5f2   :  { %1141 = vmatprep.subr.bf16.mxu0 %v5772_v41  ;;  %4629 = vmatprep.subr.bf16.mxu1 %v7446_v53 }
 0x5f5   :  { %1142 = vmatpush1.bf16.msra.mxu0 %v5780_v42  ;;  %4630 = vmatpush3.bf16.msra.mxu1 %v5789_v43 }
 0x5f6   :  { %1143 = vmatprep.subr.bf16.mxu0 %v5794_v44  ;;  %4631 = vmatprep.subr.bf16.mxu1 %v7446_v53 }
 0x5f9   :  { %1144 = vmatpush1.bf16.msra.mxu0 %v5801_v45  ;;  %4632 = vmatpush3.bf16.msra.mxu1 %v5808_v46 }
 0x5fa   :  { %1237 = vmatprep.subr.bf16.mxu0 %v5662_v22  ;;  %4637 = vmatprep.subr.bf16.mxu1 %v7446_v53 }
 0x6af   :  { %v1058_v6 = vpop.f32.mrb[28].mxu0  ;;  %v1099_v24 = vpop.f32.mrb[36].mxu1 }
 0x6b0   :  { %v1105_v60 = vadd.f32 %v1058_v6, %v5853_v62  ;;  %v1060_v10 = vpop.f32.mrb[29].mxu0  ;;  %v4615_v12 = vpop.f32.mrb[37].mxu1  ;;  %v1119_v18 = vadd.f32 %v5866_v19, %v1099_v24 }
 0x6b1   :  { %v1112_v17 = vadd.f32 %v1060_v10, %v5855_v2  ;;  %v1062_v1 = vpop.f32.mrb[30].mxu0  ;;  %v1102_v56 = vpop.f32.mrb[38].mxu1 }
 0x6b2   :  { %v4111_v5 = vmul.f32 -1.442695, %v1105_v60  ;;  %v1063_v63 = vpop.f32.mrb[31].mxu0  ;;  %v4616_v57 = vpop.f32.mrb[39].mxu1 }
 0x6b3   :  { %v4112_v13 = vmul.f32 -1.442695, %v1112_v17 }
 0x6b4   :  { %5249 = vpow2.f32 %v4111_v5 }
 0x6b5   :  { %5251 = vpow2.f32 %v4112_v13 }
 0x6be   :  { %v5250_v59 = vpop.eup %5249 }
 0x6bf   :  { %v1109_v11 = vadd.f32 1.0, %v5250_v59  ;;  %v5252_v50 = vpop.eup %5251 }
 0x6c0   :  { %v1116_v14 = vadd.f32 1.0, %v5252_v50 }
 0x6c1   :  { %5253 = vrcp.f32 %v1109_v11 }
 0x6c2   :  { %5255 = vrcp.f32 %v1116_v14 }
 0x6cb   :  { %v5254_v62 = vpop.eup %5253 }
 0x6cc   :  { %v1120_v52 = vmul.f32 %v5254_v62, %v1119_v18  ;;  %v5256_v47 = vpop.eup %5255 }
 0x6cd   :  { %v1123_v48 = vsub.f32 1.0, %v5256_v47  ;;  %v1125_v0 = vmul.f32 %v5256_v47, %v6007_v61  ;;  %v5449_v47 = vld [vmem:[%s7407_s6] ss:$12 sps:$4 sm:$0xff]  }
 0x6ce   :  { %v1121_v2 = vadd.f32 %v1120_v52, %v5845_v20 }
 0x6d0   :  { %5257 = vtanh.f32 %v1121_v2 }
 0x6da   :  { %v5258_v49 = vpop.eup %5257 }
 0x6db   :  { %v1124_v8 = vmul.f32 %v5258_v49, %v1123_v48 }
 0x6dd   :  { %v6051_v3 = vadd.f32 %v1125_v0, %v1124_v8 }
 0x6df   :  { %v1127_v51 = vpack.c.bf16 %v6051_v3, %v6051_v3 }
 0x6e1   :  { %1128 = vst [vmem:[#allocation2 + $0x10] sm:$0xf] %v1127_v51  ;;  %1162 = vmatmul.mubr.bf16.vlgmr.msra.gmra.mrb[32].mxu0 %v1127_v51  ;;  %4634 = vmatmul.mubr.bf16.vlgmr.msra.gmra.mrb[40].mxu1 %v1127_v51  ;;  %v5073_v51 = vld [vmem:[%s7410_s9] ss:$12 sps:$4 sm:$0xff]  }
 0x6e2   :  { %1238 = vmatpush1.bf16.msra.mxu0 %v5667_v23  ;;  %4638 = vmatpush3.bf16.msra.mxu1 %v5674_v25 }
 0x6e3   :  { %1239 = vmatprep.subr.bf16.mxu0 %v5681_v26  ;;  %4639 = vmatprep.subr.bf16.mxu1 %v7446_v53 }
 0x6e4   :  { %1269 = vmatprep.mubr.bf16.mxu0 %v7447_v54  ;;  %4653 = vmatprep.mubr.msk.bf16.mxu1 %vm5474_vm5, %v7446_v53 }
 0x6e6   :  { %1240 = vmatpush1.bf16.msra.mxu0 %v5686_v27  ;;  %4640 = vmatpush3.bf16.msra.mxu1 %v5692_v28 }
 0x6e7   :  { %1241 = vmatprep.subr.bf16.mxu0 %v5700_v29  ;;  %4641 = vmatprep.subr.bf16.mxu1 %v7446_v53 }
 0x6ea   :  { %1242 = vmatpush1.bf16.msra.mxu0 %v5705_v30  ;;  %4642 = vmatpush3.bf16.msra.mxu1 %v5711_v31 }
 0x6eb   :  { %1243 = vmatprep.subr.bf16.mxu0 %v5719_v32  ;;  %4643 = vmatprep.subr.bf16.mxu1 %v7446_v53 }
 0x6ee   :  { %1244 = vmatpush1.bf16.msra.mxu0 %v5724_v33  ;;  %4644 = vmatpush3.bf16.msra.mxu1 %v5730_v34 }
 0x6ef   :  { %1245 = vmatprep.subr.bf16.mxu0 %v5738_v35  ;;  %4645 = vmatprep.subr.bf16.mxu1 %v7446_v53 }
 0x6f2   :  { %1246 = vmatpush1.bf16.msra.mxu0 %v5743_v36  ;;  %4646 = vmatpush3.bf16.msra.mxu1 %v5749_v37 }
 0x6f3   :  { %1247 = vmatprep.subr.bf16.mxu0 %v5756_v38  ;;  %4647 = vmatprep.subr.bf16.mxu1 %v7446_v53 }
 0x6f6   :  { %1248 = vmatpush1.bf16.msra.mxu0 %v5761_v39  ;;  %4648 = vmatpush3.bf16.msra.mxu1 %v5767_v40 }
 0x6f7   :  { %1249 = vmatprep.subr.bf16.mxu0 %v5772_v41  ;;  %4649 = vmatprep.subr.bf16.mxu1 %v7446_v53 }
 0x6fa   :  { %1250 = vmatpush1.bf16.msra.mxu0 %v5780_v42  ;;  %4650 = vmatpush3.bf16.msra.mxu1 %v5789_v43 }
 0x6fb   :  { %1251 = vmatprep.subr.bf16.mxu0 %v5794_v44  ;;  %4651 = vmatprep.subr.bf16.mxu1 %v7446_v53 }
 0x6fe   :  { %1252 = vmatpush1.bf16.msra.mxu0 %v5801_v45  ;;  %4652 = vmatpush3.bf16.msra.mxu1 %v5808_v46 }
 0x6ff   :  { %1342 = vmatprep.subr.bf16.mxu0 %v5662_v22  ;;  %4657 = vmatprep.subr.bf16.mxu1 %v7446_v53 }
 0x7b4   :  { %v1163_v23 = vpop.f32.mrb[32].mxu0  ;;  %v1204_v25 = vpop.f32.mrb[40].mxu1 }
 0x7b5   :  { %v1210_v20 = vadd.f32 %v1163_v23, %v5857_v4  ;;  %v1165_v61 = vpop.f32.mrb[33].mxu0  ;;  %v4635_v7 = vpop.f32.mrb[41].mxu1  ;;  %v1224_v57 = vadd.f32 %v5866_v19, %v1204_v25  ;;  %v5080_v23 = vld [vmem:[%s7410_s9 + $0x20] ss:$12 sps:$4 sm:$0xff]  }
 0x7b6   :  { %v1217_v6 = vadd.f32 %v1165_v61, %v5859_v9  ;;  %v1167_v24 = vpop.f32.mrb[34].mxu0  ;;  %v1207_v60 = vpop.f32.mrb[42].mxu1  ;;  %v1450_v25 = vld [vmem:[#allocation2] sm:$0xff] }
 0x7b7   :  { %v4113_v10 = vmul.f32 -1.442695, %v1210_v20  ;;  %v1168_v12 = vpop.f32.mrb[35].mxu0  ;;  %v4636_v17 = vpop.f32.mrb[43].mxu1  ;;  %v5077_v20 = vld [vmem:[%s7410_s9 + $0x18] ss:$12 sps:$4 sm:$0xff]  }
 0x7b8   :  { %v4114_v1 = vmul.f32 -1.442695, %v1217_v6  ;;  %v5083_v61 = vld [vmem:[%s7410_s9 + $0x34] ss:$12 sps:$4 sm:$0xff]   ;;  %v5084_v7 = vld [vmem:[%s7410_s9 + $0x38] ss:$12 sps:$4 sm:$0xff]  }
 0x7b9   :  { %5259 = vpow2.f32 %v4113_v10  ;;  %v5081_v6 = vld [vmem:[%s7410_s9 + $0x30] ss:$12 sps:$4 sm:$0xff]   ;;  %v5087_v24 = vld [vmem:[%s7410_s9 + $0x4c] ss:$12 sps:$4 sm:$0xff]   ;;  %v5085_v10 = vld [vmem:[%s7410_s9 + $0x48] ss:$12 sps:$4 sm:$0xff]  }
 0x7ba   :  { %5261 = vpow2.f32 %v4114_v1  ;;  %v5088_v60 = vld [vmem:[%s7410_s9 + $0x50] ss:$12 sps:$4 sm:$0xff]   ;;  %v5092_v17 = vld [vmem:[%s7410_s9 + $0x68] ss:$12 sps:$4 sm:$0xff]   ;;  %v5089_v1 = vld [vmem:[%s7410_s9 + $0x60] ss:$12 sps:$4 sm:$0xff]  }
 0x7bb   :  { %v5091_v12 = vld [vmem:[%s7410_s9 + $0x64] ss:$12 sps:$4 sm:$0xff]  }
 0x7c3   :  { %v5260_v56 = vpop.eup %5259 }
 0x7c4   :  { %v1214_v22 = vadd.f32 1.0, %v5260_v56  ;;  %v5262_v5 = vpop.eup %5261  ;;  %v5095_v56 = vld [vmem:[%s7410_s9 + $0x7c] ss:$12 sps:$4 sm:$0xff]  }
 0x7c5   :  { %v1221_v63 = vadd.f32 1.0, %v5262_v5  ;;  %v5093_v5 = vld [vmem:[%s7410_s9 + $0x78] ss:$12 sps:$4 sm:$0xff]  }
 0x7c6   :  { %5263 = vrcp.f32 %v1214_v22  ;;  %v5096_v22 = vld [vmem:[%s7410_s9 + $0x80] ss:$12 sps:$4 sm:$0xff]  }
 0x7c7   :  { %5265 = vrcp.f32 %v1221_v63  ;;  %v5099_v63 = vld [vmem:[%s7410_s9 + $0x94] ss:$12 sps:$4 sm:$0xff]  }
 0x7d0   :  { %v5264_v4 = vpop.eup %5263 }
 0x7d1   :  { %v1225_v13 = vmul.f32 %v5264_v4, %v1224_v57  ;;  %v5266_v59 = vpop.eup %5265  ;;  %v5100_v57 = vld [vmem:[%s7410_s9 + $0x98] ss:$12 sps:$4 sm:$0xff]   ;;  %v5097_v4 = vld [vmem:[%s7410_s9 + $0x90] ss:$12 sps:$4 sm:$0xff]  }
 0x7d2   :  { %v1228_v11 = vsub.f32 1.0, %v5266_v59  ;;  %v1230_v18 = vmul.f32 %v5266_v59, %v6051_v3  ;;  %v5101_v59 = vld [vmem:[%s7410_s9 + $0xa8] ss:$12 sps:$4 sm:$0xff]  }
 0x7d3   :  { %v1226_v9 = vadd.f32 %v1225_v13, %v5851_v55  ;;  %v5450_v55 = vld [vmem:[%s7407_s6 + $0x8] ss:$12 sps:$4 sm:$0xff]   ;;  %v5103_v13 = vld [vmem:[%s7410_s9 + $0xac] ss:$12 sps:$4 sm:$0xff]  }
 0x7d5   :  { %5267 = vtanh.f32 %v1226_v9  ;;  %v5104_v9 = vld [vmem:[%s7410_s9 + $0xb0] ss:$12 sps:$4 sm:$0xff]  }
 0x7df   :  { %v5268_v50 = vpop.eup %5267 }
 0x7e0   :  { %v1229_v14 = vmul.f32 %v5268_v50, %v1228_v11  ;;  %v1451_v11 = vld [vmem:[#allocation2 + $0x8] sm:$0xff] }
 0x7e2   :  { %v6095_v62 = vadd.f32 %v1230_v18, %v1229_v14  ;;  %v6225_v14 = vld [vmem:[%s7411_s10 + $0x4] ss:$12 sps:$4 sm:$0xff]   ;;  %v6230_v18 = vld [vmem:[%s7411_s10] ss:$12 sps:$4 sm:$0xff]  }
 0x7e4   :  { %v1232_v52 = vpack.c.bf16 %v6095_v62, %v6095_v62 }
 0x7e6   :  { %v1234_v2 = vrot.slane %v1232_v52, 4  ;;  %1270 = vmatmul.mubr.bf16.vlgmr.msra.gmra.mrb[36].mxu0 %v1232_v52  ;;  %4654 = vmatmul.mubr.bf16.vlgmr.msra.gmra.mrb[44].mxu1 %v1232_v52  ;;  %v6243_v52 = vld [vmem:[%s7411_s10 + $0x1c] ss:$12 sps:$4 sm:$0xff]  }
 0x7e7   :  { %1343 = vmatpush1.bf16.msra.mxu0 %v5449_v47  ;;  %4658 = vmatpush3.bf16.msra.mxu1 %v5450_v55  ;;  %v6254_v47 = vld [vmem:[%s7411_s10 + $0x20] ss:$12 sps:$4 sm:$0xff]  }
 0x7e8   :  { %1236 = vst [vmem:[#allocation2 + $0x10] sm:$0xf0] %v1234_v2  ;;  %1344 = vmatprep.subr.bf16.mxu0 %v5681_v26  ;;  %4659 = vmatprep.subr.bf16.mxu1 %v7446_v53  ;;  %v5075_v26 = vld [vmem:[%s7410_s9 + $0x4] ss:$12 sps:$4 sm:$0xff]   ;;  %v6262_v55 = vld [vmem:[%s7411_s10 + $0x34] ss:$12 sps:$4 sm:$0xff]  }
 0x7e9   :  { %1374 = vmatprep.mubr.bf16.mxu0 %v7447_v54  ;;  %4673 = vmatprep.mubr.msk.bf16.mxu1 %vm5474_vm5, %v7446_v53  ;;  %v6248_v2 = vld [vmem:[%s7411_s10 + $0x18] ss:$12 sps:$4 sm:$0xff]  }
 0x7eb   :  { %1345 = vmatpush1.bf16.msra.mxu0 %v5686_v27  ;;  %4660 = vmatpush3.bf16.msra.mxu1 %v5692_v28  ;;  %v5076_v27 = vld [vmem:[%s7410_s9 + $0x8] ss:$12 sps:$4 sm:$0xff]  }
 0x7ec   :  { %1346 = vmatprep.subr.bf16.mxu0 %v5700_v29  ;;  %4661 = vmatprep.subr.bf16.mxu1 %v7446_v53 }
 0x7ef   :  { %1347 = vmatpush1.bf16.msra.mxu0 %v5705_v30  ;;  %4662 = vmatpush3.bf16.msra.mxu1 %v5711_v31  ;;  %v1452_v50 = vld [vmem:[#allocation2 + $0x10] sm:$0xff] }
 0x7f0   :  { %1348 = vmatprep.subr.bf16.mxu0 %v5719_v32  ;;  %4663 = vmatprep.subr.bf16.mxu1 %v7446_v53 }
 0x7f3   :  { %1349 = vmatpush1.bf16.msra.mxu0 %v5724_v33  ;;  %4664 = vmatpush3.bf16.msra.mxu1 %v5730_v34 }
 0x7f4   :  { %1350 = vmatprep.subr.bf16.mxu0 %v5738_v35  ;;  %4665 = vmatprep.subr.bf16.mxu1 %v7446_v53 }
 0x7f7   :  { %1351 = vmatpush1.bf16.msra.mxu0 %v5743_v36  ;;  %4666 = vmatpush3.bf16.msra.mxu1 %v5749_v37 }
 0x7f8   :  { %1352 = vmatprep.subr.bf16.mxu0 %v5756_v38  ;;  %4667 = vmatprep.subr.bf16.mxu1 %v7446_v53 }
 0x7fb   :  { %1353 = vmatpush1.bf16.msra.mxu0 %v5761_v39  ;;  %4668 = vmatpush3.bf16.msra.mxu1 %v5767_v40 }
 0x7fc   :  { %1354 = vmatprep.subr.bf16.mxu0 %v5772_v41  ;;  %4669 = vmatprep.subr.bf16.mxu1 %v7446_v53 }
 0x7ff   :  { %1355 = vmatpush1.bf16.msra.mxu0 %v5780_v42  ;;  %4670 = vmatpush3.bf16.msra.mxu1 %v5789_v43 }
 0x800   :  { %1356 = vmatprep.subr.bf16.mxu0 %v5794_v44  ;;  %4671 = vmatprep.subr.bf16.mxu1 %v7446_v53 }
 0x803   :  { %1357 = vmatpush1.bf16.msra.mxu0 %v5801_v45  ;;  %4672 = vmatpush3.bf16.msra.mxu1 %v5808_v46 }
 0x804   :  { %1664 = vmatprep.subr.bf16.mxu0 %v5075_v26  ;;  %4677 = vmatprep.subr.bf16.mxu1 %v5076_v27  ;;  %v6267_v26 = vld [vmem:[%s7411_s10 + $0x30] ss:$12 sps:$4 sm:$0xff]  }
 0x8b9   :  { %v1271_v28 = vpop.f32.mrb[36].mxu0  ;;  %v1312_v29 = vpop.f32.mrb[44].mxu1 }
 0x8ba   :  { %v1318_v30 = vadd.f32 %v1271_v28, %v5861_v15  ;;  %v1273_v31 = vpop.f32.mrb[37].mxu0  ;;  %v4655_v32 = vpop.f32.mrb[45].mxu1  ;;  %v1332_v44 = vadd.f32 %v5866_v19, %v1312_v29  ;;  %v6281_v28 = vld [vmem:[%s7411_s10 + $0x4c] ss:$12 sps:$4 sm:$0xff]   ;;  %v6286_v29 = vld [vmem:[%s7411_s10 + $0x48] ss:$12 sps:$4 sm:$0xff]  }
 0x8bb   :  { %v1325_v33 = vadd.f32 %v1273_v31, %v5868_v21  ;;  %v1275_v34 = vpop.f32.mrb[38].mxu0  ;;  %v1315_v35 = vpop.f32.mrb[46].mxu1  ;;  %v6300_v31 = vld [vmem:[%s7411_s10 + $0x64] ss:$12 sps:$4 sm:$0xff]   ;;  %v6305_v32 = vld [vmem:[%s7411_s10 + $0x60] ss:$12 sps:$4 sm:$0xff]  }
 0x8bc   :  { %v4115_v36 = vmul.f32 -1.442695, %v1318_v30  ;;  %v1276_v37 = vpop.f32.mrb[39].mxu0  ;;  %v4656_v38 = vpop.f32.mrb[47].mxu1  ;;  %v6292_v30 = vld [vmem:[%s7411_s10 + $0x50] ss:$12 sps:$4 sm:$0xff]  }
 0x8bd   :  { %v4116_v39 = vmul.f32 -1.442695, %v1325_v33  ;;  %v6311_v33 = vld [vmem:[%s7411_s10 + $0x68] ss:$12 sps:$4 sm:$0xff]   ;;  %v6323_v35 = vld [vmem:[%s7411_s10 + $0x78] ss:$12 sps:$4 sm:$0xff]  }
 0x8be   :  { %5269 = vpow2.f32 %v4115_v36  ;;  %v6318_v34 = vld [vmem:[%s7411_s10 + $0x7c] ss:$12 sps:$4 sm:$0xff]   ;;  %v6329_v36 = vld [vmem:[%s7411_s10 + $0x80] ss:$12 sps:$4 sm:$0xff]  }
 0x8bf   :  { %5271 = vpow2.f32 %v4116_v39  ;;  %v6334_v37 = vld [vmem:[%s7411_s10 + $0x94] ss:$12 sps:$4 sm:$0xff]   ;;  %v6342_v38 = vld [vmem:[%s7411_s10 + $0x90] ss:$12 sps:$4 sm:$0xff]   ;;  %v6349_v39 = vld [vmem:[%s7411_s10 + $0x98] ss:$12 sps:$4 sm:$0xff]  }
 0x8c8   :  { %v5270_v40 = vpop.eup %5269 }
 0x8c9   :  { %v1322_v41 = vadd.f32 1.0, %v5270_v40  ;;  %v5272_v42 = vpop.eup %5271  ;;  %v6354_v40 = vld [vmem:[%s7411_s10 + $0xac] ss:$12 sps:$4 sm:$0xff]  }
 0x8ca   :  { %v1329_v43 = vadd.f32 1.0, %v5272_v42  ;;  %v6368_v42 = vld [vmem:[%s7411_s10 + $0xb0] ss:$12 sps:$4 sm:$0xff]  }
 0x8cb   :  { %5273 = vrcp.f32 %v1322_v41  ;;  %v6361_v41 = vld [vmem:[%s7411_s10 + $0xa8] ss:$12 sps:$4 sm:$0xff]  }
 0x8cc   :  { %5275 = vrcp.f32 %v1329_v43 }
 0x8d5   :  { %v5274_v45 = vpop.eup %5273 }
 0x8d6   :  { %v1333_v46 = vmul.f32 %v5274_v45, %v1332_v44  ;;  %v5276_v21 = vpop.eup %5275 }
 0x8d7   :  { %v1336_v48 = vsub.f32 1.0, %v5276_v21  ;;  %v1338_v0 = vmul.f32 %v5276_v21, %v6095_v62  ;;  %v6236_v62 = vld [vmem:[%s7411_s10 + $0x8] ss:$12 sps:$4 sm:$0xff]   ;;  %v7448_v21 = vld [vmem:[#allocation7_spill] sm:$0xff] }
 0x8d8   :  { %v1334_v15 = vadd.f32 %v1333_v46, %v5841_v16  ;;  %v5079_v16 = vld [vmem:[%s7410_s9 + $0x1c] ss:$12 sps:$4 sm:$0xff]  }
 0x8da   :  { %5277 = vtanh.f32 %v1334_v15 }
 0x8e4   :  { %v5278_v49 = vpop.eup %5277 }
 0x8e5   :  { %v1337_v8 = vmul.f32 %v5278_v49, %v1336_v48 }
 0x8e7   :  { %v6147_v3 = vadd.f32 %v1338_v0, %v1337_v8 }
 0x8e9   :  { %v1340_v19 = vpack.c.bf16 %v6147_v3, %v6147_v3 }
 0x8eb   :  { %1341 = vst [vmem:[#allocation2 + $0x18] sm:$0xf] %v1340_v19  ;;  %1375 = vmatmul.mubr.bf16.vlgmr.msra.gmra.mrb[40].mxu0 %v1340_v19  ;;  %4674 = vmatmul.mubr.bf16.vlgmr.msra.gmra.mrb[48].mxu1 %v1340_v19 }
 0x8ec   :  { %1665 = vmatpush1.bf16.msra.mxu0 %v5073_v51  ;;  %4678 = vmatpush3.bf16.msra.mxu1 %v5076_v27  ;;  %v6273_v27 = vld [vmem:[%s7411_s10 + $0x38] ss:$12 sps:$4 sm:$0xff]  }
 0x8ed   :  { %4693 = vmatprep.mubr.bf16.mxu1 %v1450_v25  ;;  %1666 = vmatprep.subr.bf16.mxu0 %v5079_v16 }
 0x8ee   :  { %4679 = vmatprep.subr.bf16.mxu1 %v5080_v23  ;;  %1696 = vmatprep.mubr.bf16.mxu0 %v7447_v54 }
 0x8f0   :  { %1667 = vmatpush1.bf16.msra.mxu0 %v5077_v20  ;;  %4680 = vmatpush3.bf16.msra.mxu1 %v5080_v23 }
 0x8f1   :  { %1668 = vmatprep.subr.bf16.mxu0 %v5083_v61  ;;  %4681 = vmatprep.subr.bf16.mxu1 %v5084_v7 }
 0x8f4   :  { %1669 = vmatpush1.bf16.msra.mxu0 %v5081_v6  ;;  %4682 = vmatpush3.bf16.msra.mxu1 %v5084_v7  ;;  %v5451_v7 = vld [vmem:[%s7409_s8] ss:$0 sm:$0xff] }
 0x8f5   :  { %1670 = vmatprep.subr.bf16.mxu0 %v5087_v24  ;;  %4683 = vmatprep.subr.bf16.mxu1 %v5088_v60 }
 0x8f8   :  { %1671 = vmatpush1.bf16.msra.mxu0 %v5085_v10  ;;  %4684 = vmatpush3.bf16.msra.mxu1 %v5088_v60  ;;  %v7449_v10 = vld [vmem:[#allocation3_spill] sm:$0xff] }
 0x8f9   :  { %1672 = vmatprep.subr.bf16.mxu0 %v5091_v12  ;;  %4685 = vmatprep.subr.bf16.mxu1 %v5092_v17 }
 0x8fc   :  { %1673 = vmatpush1.bf16.msra.mxu0 %v5089_v1  ;;  %4686 = vmatpush3.bf16.msra.mxu1 %v5092_v17  ;;  %v7450_v17 = vld [vmem:[#allocation6_spill] sm:$0xff] }
 0x8fd   :  { %1674 = vmatprep.subr.bf16.mxu0 %v5095_v56  ;;  %4687 = vmatprep.subr.bf16.mxu1 %v5096_v22 }
 0x900   :  { %1675 = vmatpush1.bf16.msra.mxu0 %v5093_v5  ;;  %4688 = vmatpush3.bf16.msra.mxu1 %v5096_v22  ;;  %v7451_v5 = vld [vmem:[#allocation5_spill] sm:$0xff] }
 0x901   :  { %1676 = vmatprep.subr.bf16.mxu0 %v5099_v63  ;;  %4689 = vmatprep.subr.bf16.mxu1 %v5100_v57 }
 0x904   :  { %1677 = vmatpush1.bf16.msra.mxu0 %v5097_v4  ;;  %4690 = vmatpush3.bf16.msra.mxu1 %v5100_v57 }
 0x905   :  { %1678 = vmatprep.subr.bf16.mxu0 %v5103_v13  ;;  %4691 = vmatprep.subr.bf16.mxu1 %v5104_v9 }
 0x908   :  { %1679 = vmatpush1.bf16.msra.mxu0 %v5101_v59  ;;  %4692 = vmatpush3.bf16.msra.mxu1 %v5104_v9 }
 0x909   :  { %4701 = vmatprep.subr.bf16.mxu1 %v7446_v53  ;;  %1955 = vmatprep.subr.bf16.mxu0 %v6225_v14 }
 0x90b   :  { %1697 = vmatmul.mubr.bf16.vlgmr.msra.gmra.mrb[44].mxu0 %v1450_v25  ;;  %4694 = vmatmul.mubr.bf16.vlgmr.msra.gmra.mrb[52].mxu1 %v1451_v11 }
 0x90c   :  { %4697 = vmatprep.mubr.bf16.mxu1 %v1452_v50  ;;  %1706 = vmatprep.mubr.bf16.mxu0 %v7447_v54 }
 0x90d   :  { %1956 = vmatpush1.bf16.msra.mxu0 %v6230_v18  ;;  %4702 = vmatpush3.bf16.msra.mxu1 %v6236_v62 }
 0x90e   :  { %4703 = vmatprep.subr.bf16.mxu1 %v7446_v53  ;;  %1957 = vmatprep.subr.bf16.mxu0 %v6243_v52 }
 0x911   :  { %1958 = vmatpush1.bf16.msra.mxu0 %v6248_v2  ;;  %4704 = vmatpush3.bf16.msra.mxu1 %v6254_v47 }
 0x912   :  { %4705 = vmatprep.subr.bf16.mxu1 %v7446_v53  ;;  %1959 = vmatprep.subr.bf16.mxu0 %v6262_v55 }
 0x913   :  { %1707 = vmatmul.mubr.bf16.gmra.mrb[48].mxu0 %v1451_v11 }
 0x914   :  { %1716 = vmatprep.mubr.bf16.mxu0 %v7447_v54 }
 0x915   :  { %1960 = vmatpush1.bf16.msra.mxu0 %v6267_v26  ;;  %4706 = vmatpush3.bf16.msra.mxu1 %v6273_v27 }
 0x916   :  { %4707 = vmatprep.subr.bf16.mxu1 %v7446_v53  ;;  %1961 = vmatprep.subr.bf16.mxu0 %v6281_v28 }
 0x919   :  { %1962 = vmatpush1.bf16.msra.mxu0 %v6286_v29  ;;  %4708 = vmatpush3.bf16.msra.mxu1 %v6292_v30 }
 0x91a   :  { %4709 = vmatprep.subr.bf16.mxu1 %v7446_v53  ;;  %1963 = vmatprep.subr.bf16.mxu0 %v6300_v31 }
 0x91b   :  { %1717 = vmatmul.mubr.bf16.gmra.mrb[52].mxu0 %v1452_v50 }
 0x91c   :  { %1726 = vmatprep.mubr.bf16.mxu0 %v7447_v54 }
 0x91d   :  { %1964 = vmatpush1.bf16.msra.mxu0 %v6305_v32  ;;  %4710 = vmatpush3.bf16.msra.mxu1 %v6311_v33 }
 0x91e   :  { %1965 = vmatprep.subr.bf16.mxu0 %v6318_v34  ;;  %4711 = vmatprep.subr.bf16.mxu1 %v7446_v53 }
 0x921   :  { %1966 = vmatpush1.bf16.msra.mxu0 %v6323_v35  ;;  %4712 = vmatpush3.bf16.msra.mxu1 %v6329_v36 }
 0x922   :  { %1967 = vmatprep.subr.bf16.mxu0 %v6334_v37  ;;  %4713 = vmatprep.subr.bf16.mxu1 %v7446_v53 }
 0x925   :  { %1968 = vmatpush1.bf16.msra.mxu0 %v6342_v38  ;;  %4714 = vmatpush3.bf16.msra.mxu1 %v6349_v39 }
 0x926   :  { %1969 = vmatprep.subr.bf16.mxu0 %v6354_v40  ;;  %4715 = vmatprep.subr.bf16.mxu1 %v7446_v53 }
 0x929   :  { %1970 = vmatpush1.bf16.msra.mxu0 %v6361_v41  ;;  %4716 = vmatpush3.bf16.msra.mxu1 %v6368_v42 }
 0x92a   :  { %2063 = vmatprep.subr.bf16.mxu0 %v6225_v14  ;;  %4721 = vmatprep.subr.bf16.mxu1 %v7446_v53 }
 0x9be   :  { %v1376_v43 = vpop.f32.mrb[40].mxu0  ;;  %v1417_v44 = vpop.f32.mrb[48].mxu1 }
 0x9bf   :  { %v1423_v45 = vadd.f32 %v1376_v43, %v5870_v58  ;;  %v1378_v46 = vpop.f32.mrb[41].mxu0  ;;  %v4675_v15 = vpop.f32.mrb[49].mxu1  ;;  %v1518_v58 = vld [vmem:[%s7412_s11] sm:$0x7]  ;;  %v1437_v6 = vadd.f32 %v5451_v7, %v1417_v44 }
 0x9c0   :  { %v1430_v48 = vadd.f32 %v1378_v46, %v7448_v21  ;;  %v1380_v49 = vpop.f32.mrb[42].mxu0  ;;  %v1420_v8 = vpop.f32.mrb[50].mxu1  ;;  %v6384_v12 = vrot.slane %v1518_v58, %v7449_v10  ;;  %v6390_v63 = vrot.slane %v1518_v58, %v7451_v5 }
 0x9c1   :  { %v4117_v0 = vmul.f32 -1.442695, %v1423_v45  ;;  %v1381_v51 = vpop.f32.mrb[43].mxu0  ;;  %v4676_v19 = vpop.f32.mrb[51].mxu1 }
 0x9c2   :  { %v4118_v16 = vmul.f32 -1.442695, %v1430_v48 }
 0x9c3   :  { %5279 = vpow2.f32 %v4117_v0 }
 0x9c4   :  { %5281 = vpow2.f32 %v4118_v16 }
 0x9cd   :  { %v5280_v23 = vpop.eup %5279 }
 0x9ce   :  { %v1427_v25 = vadd.f32 1.0, %v5280_v23  ;;  %v5282_v20 = vpop.eup %5281 }
 0x9cf   :  { %v1434_v61 = vadd.f32 1.0, %v5282_v20 }
 0x9d0   :  { %5283 = vrcp.f32 %v1427_v25 }
 0x9d1   :  { %5285 = vrcp.f32 %v1434_v61 }
 0x9da   :  { %v5284_v24 = vpop.eup %5283 }
 0x9db   :  { %v1438_v60 = vmul.f32 %v5284_v24, %v1437_v6  ;;  %v5286_v45 = vpop.eup %5285 }
 0x9dc   :  { %v1441_v48 = vsub.f32 1.0, %v5286_v45  ;;  %v1443_v19 = vmul.f32 %v5286_v45, %v6147_v3 }
 0x9dd   :  { %v1439_v1 = vadd.f32 %v1438_v60, %v7450_v17 }
 0x9de   :  { %v1698_v56 = vpop.f32.mrb[44].mxu0  ;;  %v6387_v22 = vpop.f32.mrb[52].mxu1 }
 0x9df   :  { %5287 = vtanh.f32 %v1439_v1  ;;  %v1699_v57 = vadd.f32 %v1698_v56, %v6384_v12  ;;  %v1700_v4 = vpop.f32.mrb[45].mxu0  ;;  %v1771_v13 = vpop.f32.mrb[53].mxu1  ;;  %v7452_v1 = vld [vmem:[#allocation4_spill] sm:$0xff] }
 0x9e0   :  { %v6393_v9 = vpop.f32.mrb[46].mxu0  ;;  %v6395_v59 = vpop.f32.mrb[54].mxu1  ;;  %v1701_v44 = vadd.f32 %v1700_v4, %v6390_v63  ;;  %v6420_v56 = vrot.slane %v1518_v58, %v7452_v1 }
 0x9e1   :  { %v4144_v11 = vmul.f32 -1.442695, %v1699_v57  ;;  %v6397_v50 = vpop.f32.mrb[47].mxu0  ;;  %v6399_v43 = vpop.f32.mrb[55].mxu1  ;;  %v6425_v57 = vld [vmem:[%s7413_s12] ss:$0 sm:$0xff] }
 0x9e2   :  { %v4145_v46 = vmul.f32 -1.442695, %v1701_v44  ;;  %v1772_v44 = vadd.f32 %v1771_v13, %v6420_v56 }
 0x9e3   :  { %5289 = vpow2.f32 %v4144_v11 }
 0x9e4   :  { %5291 = vpow2.f32 %v4145_v46 }
 0x9e6   :  { %v6402_v15 = vpop.f32.mrb[48].mxu0 }
 0x9e7   :  { %v6404_v21 = vpop.f32.mrb[49].mxu0 }
 0x9e8   :  { %v6406_v49 = vpop.f32.mrb[50].mxu0 }
 0x9e9   :  { %v5288_v8 = vpop.eup %5287  ;;  %v6408_v0 = vpop.f32.mrb[51].mxu0 }
 0x9ea   :  { %v1442_v51 = vmul.f32 %v5288_v8, %v1441_v48 }
 0x9ec   :  { %v1444_v16 = vadd.f32 %v1443_v19, %v1442_v51 }
 0x9ed   :  { %v5290_v23 = vpop.eup %5289 }
 0x9ee   :  { %v1445_v25 = vpack.c.bf16 %v1444_v16, %v1444_v16  ;;  %v1811_v20 = vadd.f32 1.0, %v5290_v23  ;;  %v6411_v61 = vpop.f32.mrb[52].mxu0  ;;  %v5292_v17 = vpop.eup %5291 }
 0x9ef   :  { %v6413_v7 = vpop.f32.mrb[53].mxu0  ;;  %v1817_v3 = vadd.f32 1.0, %v5292_v17 }
 0x9f0   :  { %v1447_v6 = vrot.slane %v1445_v25, 4  ;;  %5293 = vrcp.f32 %v1811_v20  ;;  %v6415_v24 = vpop.f32.mrb[54].mxu0 }
 0x9f1   :  { %v6417_v60 = vpop.f32.mrb[55].mxu0  ;;  %5295 = vrcp.f32 %v1817_v3 }
 0x9f2   :  { %1449 = vst [vmem:[#allocation2 + $0x18] sm:$0xf0] %v1447_v6 }
 0x9f9   :  { %v1453_v4 = vld [vmem:[#allocation2 + $0x18] sm:$0xff] }
 0x9fa   :  { %v5294_v11 = vpop.eup %5293  ;;  %1727 = vmatmul.mubr.bf16.gmra.mrb[56].mxu0 %v1453_v4  ;;  %4698 = vmatmul.mubr.bf16.gmra.mrb[56].mxu1 %v1453_v4  ;;  %v1703_v4 = vadd.f32 %v6393_v9, %v6384_v12 }
 0x9fb   :  { %v1820_v45 = vmul.f32 %v5294_v11, %v6425_v57  ;;  %1987 = vmatprep.mubr.bf16.mxu0 %v7447_v54  ;;  %4717 = vmatprep.mubr.msk.bf16.mxu1 %vm5474_vm5, %v7446_v53  ;;  %v5296_v46 = vpop.eup %5295  ;;  %v1705_v11 = vadd.f32 %v6397_v50, %v6390_v63 }
 0x9fc   :  { %v1823_v48 = vsub.f32 1.0, %v5296_v46 }
 0x9fd   :  { %v1821_v58 = vadd.f32 %v1820_v45, %v1772_v44 }
 0x9ff   :  { %5297 = vtanh.f32 %v1821_v58 }
 0xa09   :  { %v5298_v8 = vpop.eup %5297 }
 0xa0a   :  { %v6432_v51 = vmul.f32 %v5298_v8, %v1823_v48 }
 0xa0c   :  { %v1825_v19 = vpack.c.bf16 %v6432_v51, %v6432_v51 }
 0xa0e   :  { %1826 = vst [vmem:[#allocation2] sm:$0xf] %v1825_v19  ;;  %1988 = vmatmul.mubr.bf16.vlgmr.msra.gmra.mrb[60].mxu0 %v1825_v19  ;;  %4718 = vmatmul.mubr.bf16.vlgmr.msra.gmra.mrb[60].mxu1 %v1825_v19 }
 0xa0f   :  { %2064 = vmatpush1.bf16.msra.mxu0 %v6230_v18  ;;  %4722 = vmatpush3.bf16.msra.mxu1 %v6236_v62 }
 0xa10   :  { %2065 = vmatprep.subr.bf16.mxu0 %v6243_v52  ;;  %4723 = vmatprep.subr.bf16.mxu1 %v7446_v53 }
 0xa11   :  { %2095 = vmatprep.mubr.bf16.mxu0 %v7447_v54  ;;  %4737 = vmatprep.mubr.msk.bf16.mxu1 %vm5474_vm5, %v7446_v53 }
 0xa13   :  { %2066 = vmatpush1.bf16.msra.mxu0 %v6248_v2  ;;  %4724 = vmatpush3.bf16.msra.mxu1 %v6254_v47 }
 0xa14   :  { %2067 = vmatprep.subr.bf16.mxu0 %v6262_v55  ;;  %4725 = vmatprep.subr.bf16.mxu1 %v7446_v53 }
 0xa17   :  { %2068 = vmatpush1.bf16.msra.mxu0 %v6267_v26  ;;  %4726 = vmatpush3.bf16.msra.mxu1 %v6273_v27 }
 0xa18   :  { %2069 = vmatprep.subr.bf16.mxu0 %v6281_v28  ;;  %4727 = vmatprep.subr.bf16.mxu1 %v7446_v53 }
 0xa1b   :  { %2070 = vmatpush1.bf16.msra.mxu0 %v6286_v29  ;;  %4728 = vmatpush3.bf16.msra.mxu1 %v6292_v30 }
 0xa1c   :  { %2071 = vmatprep.subr.bf16.mxu0 %v6300_v31  ;;  %4729 = vmatprep.subr.bf16.mxu1 %v7446_v53 }
 0xa1f   :  { %2072 = vmatpush1.bf16.msra.mxu0 %v6305_v32  ;;  %4730 = vmatpush3.bf16.msra.mxu1 %v6311_v33 }
 0xa20   :  { %2073 = vmatprep.subr.bf16.mxu0 %v6318_v34  ;;  %4731 = vmatprep.subr.bf16.mxu1 %v7446_v53 }
 0xa23   :  { %2074 = vmatpush1.bf16.msra.mxu0 %v6323_v35  ;;  %4732 = vmatpush3.bf16.msra.mxu1 %v6329_v36 }
 0xa24   :  { %2075 = vmatprep.subr.bf16.mxu0 %v6334_v37  ;;  %4733 = vmatprep.subr.bf16.mxu1 %v7446_v53 }
 0xa27   :  { %2076 = vmatpush1.bf16.msra.mxu0 %v6342_v38  ;;  %4734 = vmatpush3.bf16.msra.mxu1 %v6349_v39 }
 0xa28   :  { %2077 = vmatprep.subr.bf16.mxu0 %v6354_v40  ;;  %4735 = vmatprep.subr.bf16.mxu1 %v7446_v53 }
 0xa2b   :  { %2078 = vmatpush1.bf16.msra.mxu0 %v6361_v41  ;;  %4736 = vmatpush3.bf16.msra.mxu1 %v6368_v42 }
 0xa2c   :  { %2168 = vmatprep.subr.bf16.mxu0 %v6225_v14  ;;  %4741 = vmatprep.subr.bf16.mxu1 %v7446_v53 }
 0xacd   :  { %v6471_v13 = vpop.f32.mrb[56].mxu0  ;;  %v6473_v16 = vpop.f32.mrb[56].mxu1 }
 0xace   :  { %7453 = vst [vmem:[#allocation7_spill] sm:$0xff] %v6471_v13  ;;  %7454 = vst [vmem:[#allocation6_spill] sm:$0xff] %v6473_v16  ;;  %v6475_v23 = vpop.f32.mrb[57].mxu0  ;;  %v6477_v25 = vpop.f32.mrb[57].mxu1 }
 0xacf   :  { %7455 = vst [vmem:[#allocation8_spill] sm:$0xff] %v6475_v23  ;;  %v6479_v20 = vpop.f32.mrb[58].mxu0  ;;  %v6481_v6 = vpop.f32.mrb[58].mxu1 }
 0xad0   :  { %7456 = vst [vmem:[#allocation9_spill] sm:$0xff] %v6479_v20  ;;  %7457 = vst [vmem:[#allocation10_spill] sm:$0xff] %v6481_v6  ;;  %v6483_v17 = vpop.f32.mrb[59].mxu0  ;;  %v6485_v3 = vpop.f32.mrb[59].mxu1 }
 0xad1   :  { %7458 = vst [vmem:[#allocation11_spill] sm:$0xff] %v6483_v17 }
 0xae1   :  { %v1989_v44 = vpop.f32.mrb[60].mxu0  ;;  %v2030_v45 = vpop.f32.mrb[60].mxu1 }
 0xae2   :  { %v2036_v58 = vadd.f32 %v1989_v44, %v1703_v4  ;;  %v1991_v46 = vpop.f32.mrb[61].mxu0  ;;  %v4719_v48 = vpop.f32.mrb[61].mxu1  ;;  %v2050_v50 = vadd.f32 %v6425_v57, %v2030_v45  ;;  %v1775_v4 = vadd.f32 %v6399_v43, %v6420_v56  ;;  %v1709_v43 = vadd.f32 %v6402_v15, %v6384_v12 }
 0xae3   :  { %v2043_v8 = vadd.f32 %v1991_v46, %v1705_v11  ;;  %v1993_v19 = vpop.f32.mrb[62].mxu0  ;;  %v2033_v1 = vpop.f32.mrb[62].mxu1 }
 0xae4   :  { %v4170_v5 = vmul.f32 -1.442695, %v2036_v58  ;;  %v1994_v10 = vpop.f32.mrb[63].mxu0  ;;  %v4720_v6 = vpop.f32.mrb[63].mxu1 }
 0xae5   :  { %v4171_v17 = vmul.f32 -1.442695, %v2043_v8 }
 0xae6   :  { %5299 = vpow2.f32 %v4170_v5 }
 0xae7   :  { %5301 = vpow2.f32 %v4171_v17 }
 0xaf0   :  { %v5300_v20 = vpop.eup %5299 }
 0xaf1   :  { %v2040_v16 = vadd.f32 1.0, %v5300_v20  ;;  %v5302_v9 = vpop.eup %5301 }
 0xaf2   :  { %v2047_v23 = vadd.f32 1.0, %v5302_v9 }
 0xaf3   :  { %5303 = vrcp.f32 %v2040_v16 }
 0xaf4   :  { %5305 = vrcp.f32 %v2047_v23 }
 0xafd   :  { %v5304_v13 = vpop.eup %5303 }
 0xafe   :  { %v2051_v11 = vmul.f32 %v5304_v13, %v2050_v50  ;;  %v5306_v10 = vpop.eup %5305 }
 0xaff   :  { %v2054_v6 = vsub.f32 1.0, %v5306_v10  ;;  %v2056_v17 = vmul.f32 %v5306_v10, %v6432_v51  ;;  %v1711_v51 = vadd.f32 %v6404_v21, %v6390_v63 }
 0xb00   :  { %v2052_v1 = vadd.f32 %v2051_v11, %v1775_v4 }
 0xb02   :  { %5307 = vtanh.f32 %v2052_v1 }
 0xb0c   :  { %v5308_v5 = vpop.eup %5307 }
 0xb0d   :  { %v2055_v44 = vmul.f32 %v5308_v5, %v2054_v6 }
 0xb0f   :  { %v6495_v20 = vadd.f32 %v2056_v17, %v2055_v44  ;;  %v1780_v17 = vadd.f32 %v6387_v22, %v6420_v56  ;;  %v1713_v22 = vadd.f32 %v6406_v49, %v6384_v12 }
 0xb11   :  { %v2058_v16 = vpack.c.bf16 %v6495_v20, %v6495_v20 }
 0xb13   :  { %v2060_v45 = vrot.slane %v2058_v16, 4  ;;  %2096 = vmatmul.mubr.bf16.vlgmr.msra.gmra.mrb[64].mxu0 %v2058_v16  ;;  %4738 = vmatmul.mubr.bf16.vlgmr.msra.gmra.mrb[64].mxu1 %v2058_v16 }
 0xb14   :  { %2169 = vmatpush1.bf16.msra.mxu0 %v6230_v18  ;;  %4742 = vmatpush3.bf16.msra.mxu1 %v6236_v62 }
 0xb15   :  { %2062 = vst [vmem:[#allocation2] sm:$0xf0] %v2060_v45  ;;  %2170 = vmatprep.subr.bf16.mxu0 %v6243_v52  ;;  %4743 = vmatprep.subr.bf16.mxu1 %v7446_v53 }
 0xb16   :  { %2200 = vmatprep.mubr.bf16.mxu0 %v7447_v54  ;;  %4757 = vmatprep.mubr.msk.bf16.mxu1 %vm5474_vm5, %v7446_v53 }
 0xb18   :  { %2171 = vmatpush1.bf16.msra.mxu0 %v6248_v2  ;;  %4744 = vmatpush3.bf16.msra.mxu1 %v6254_v47 }
 0xb19   :  { %2172 = vmatprep.subr.bf16.mxu0 %v6262_v55  ;;  %4745 = vmatprep.subr.bf16.mxu1 %v7446_v53 }
 0xb1c   :  { %2173 = vmatpush1.bf16.msra.mxu0 %v6267_v26  ;;  %4746 = vmatpush3.bf16.msra.mxu1 %v6273_v27 }
 0xb1d   :  { %2174 = vmatprep.subr.bf16.mxu0 %v6281_v28  ;;  %4747 = vmatprep.subr.bf16.mxu1 %v7446_v53 }
 0xb20   :  { %2175 = vmatpush1.bf16.msra.mxu0 %v6286_v29  ;;  %4748 = vmatpush3.bf16.msra.mxu1 %v6292_v30 }
 0xb21   :  { %2176 = vmatprep.subr.bf16.mxu0 %v6300_v31  ;;  %4749 = vmatprep.subr.bf16.mxu1 %v7446_v53 }
 0xb24   :  { %2177 = vmatpush1.bf16.msra.mxu0 %v6305_v32  ;;  %4750 = vmatpush3.bf16.msra.mxu1 %v6311_v33 }
 0xb25   :  { %2178 = vmatprep.subr.bf16.mxu0 %v6318_v34  ;;  %4751 = vmatprep.subr.bf16.mxu1 %v7446_v53 }
 0xb28   :  { %2179 = vmatpush1.bf16.msra.mxu0 %v6323_v35  ;;  %4752 = vmatpush3.bf16.msra.mxu1 %v6329_v36 }
 0xb29   :  { %2180 = vmatprep.subr.bf16.mxu0 %v6334_v37  ;;  %4753 = vmatprep.subr.bf16.mxu1 %v7446_v53 }
 0xb2c   :  { %2181 = vmatpush1.bf16.msra.mxu0 %v6342_v38  ;;  %4754 = vmatpush3.bf16.msra.mxu1 %v6349_v39 }
 0xb2d   :  { %2182 = vmatprep.subr.bf16.mxu0 %v6354_v40  ;;  %4755 = vmatprep.subr.bf16.mxu1 %v7446_v53 }
 0xb30   :  { %2183 = vmatpush1.bf16.msra.mxu0 %v6361_v41  ;;  %4756 = vmatpush3.bf16.msra.mxu1 %v6368_v42 }
 0xb31   :  { %2276 = vmatprep.subr.bf16.mxu0 %v6225_v14  ;;  %4761 = vmatprep.subr.bf16.mxu1 %v7446_v53 }
 0xbe6   :  { %v2097_v13 = vpop.f32.mrb[64].mxu0  ;;  %v2138_v23 = vpop.f32.mrb[64].mxu1 }
 0xbe7   :  { %v2144_v58 = vadd.f32 %v2097_v13, %v1709_v43  ;;  %v2099_v46 = vpop.f32.mrb[65].mxu0  ;;  %v4739_v48 = vpop.f32.mrb[65].mxu1  ;;  %v2158_v21 = vadd.f32 %v6425_v57, %v2138_v23 }
 0xbe8   :  { %v2151_v8 = vadd.f32 %v2099_v46, %v1711_v51  ;;  %v2101_v19 = vpop.f32.mrb[66].mxu0  ;;  %v2141_v9 = vpop.f32.mrb[66].mxu1 }
 0xbe9   :  { %v4172_v50 = vmul.f32 -1.442695, %v2144_v58  ;;  %v2102_v4 = vpop.f32.mrb[67].mxu0  ;;  %v4740_v11 = vpop.f32.mrb[67].mxu1 }
 0xbea   :  { %v4173_v1 = vmul.f32 -1.442695, %v2151_v8 }
 0xbeb   :  { %5309 = vpow2.f32 %v4172_v50 }
 0xbec   :  { %5311 = vpow2.f32 %v4173_v1 }
 0xbf5   :  { %v5310_v10 = vpop.eup %5309 }
 0xbf6   :  { %v2148_v6 = vadd.f32 1.0, %v5310_v10  ;;  %v5312_v15 = vpop.eup %5311 }
 0xbf7   :  { %v2155_v5 = vadd.f32 1.0, %v5312_v15 }
 0xbf8   :  { %5313 = vrcp.f32 %v2148_v6 }
 0xbf9   :  { %5315 = vrcp.f32 %v2155_v5 }
 0xc02   :  { %v5314_v44 = vpop.eup %5313 }
 0xc03   :  { %v2159_v16 = vmul.f32 %v5314_v44, %v2158_v21  ;;  %v5316_v43 = vpop.eup %5315 }
 0xc04   :  { %v2162_v51 = vsub.f32 1.0, %v5316_v43  ;;  %v2164_v46 = vmul.f32 %v5316_v43, %v6495_v20  ;;  %v1715_v20 = vadd.f32 %v6408_v0, %v6390_v63  ;;  %v1783_v43 = vadd.f32 %v6395_v59, %v6420_v56 }
 0xc05   :  { %v2160_v45 = vadd.f32 %v2159_v16, %v1780_v17  ;;  %v1719_v59 = vadd.f32 %v6411_v61, %v6384_v12 }
 0xc07   :  { %5317 = vtanh.f32 %v2160_v45 }
 0xc11   :  { %v5318_v13 = vpop.eup %5317 }
 0xc12   :  { %v2163_v58 = vmul.f32 %v5318_v13, %v2162_v51 }
 0xc14   :  { %v6542_v48 = vadd.f32 %v2164_v46, %v2163_v58 }
 0xc16   :  { %v2166_v8 = vpack.c.bf16 %v6542_v48, %v6542_v48 }
 0xc18   :  { %2167 = vst [vmem:[#allocation2 + $0x8] sm:$0xf] %v2166_v8  ;;  %2201 = vmatmul.mubr.bf16.vlgmr.msra.gmra.mrb[68].mxu0 %v2166_v8  ;;  %4758 = vmatmul.mubr.bf16.vlgmr.msra.gmra.mrb[68].mxu1 %v2166_v8 }
 0xc19   :  { %2277 = vmatpush1.bf16.msra.mxu0 %v6230_v18  ;;  %4762 = vmatpush3.bf16.msra.mxu1 %v6236_v62 }
 0xc1a   :  { %2278 = vmatprep.subr.bf16.mxu0 %v6243_v52  ;;  %4763 = vmatprep.subr.bf16.mxu1 %v7446_v53 }
 0xc1b   :  { %2308 = vmatprep.mubr.bf16.mxu0 %v7447_v54  ;;  %4777 = vmatprep.mubr.msk.bf16.mxu1 %vm5474_vm5, %v7446_v53 }
 0xc1d   :  { %2279 = vmatpush1.bf16.msra.mxu0 %v6248_v2  ;;  %4764 = vmatpush3.bf16.msra.mxu1 %v6254_v47 }
 0xc1e   :  { %2280 = vmatprep.subr.bf16.mxu0 %v6262_v55  ;;  %4765 = vmatprep.subr.bf16.mxu1 %v7446_v53 }
 0xc21   :  { %2281 = vmatpush1.bf16.msra.mxu0 %v6267_v26  ;;  %4766 = vmatpush3.bf16.msra.mxu1 %v6273_v27 }
 0xc22   :  { %2282 = vmatprep.subr.bf16.mxu0 %v6281_v28  ;;  %4767 = vmatprep.subr.bf16.mxu1 %v7446_v53 }
 0xc25   :  { %2283 = vmatpush1.bf16.msra.mxu0 %v6286_v29  ;;  %4768 = vmatpush3.bf16.msra.mxu1 %v6292_v30 }
 0xc26   :  { %2284 = vmatprep.subr.bf16.mxu0 %v6300_v31  ;;  %4769 = vmatprep.subr.bf16.mxu1 %v7446_v53 }
 0xc29   :  { %2285 = vmatpush1.bf16.msra.mxu0 %v6305_v32  ;;  %4770 = vmatpush3.bf16.msra.mxu1 %v6311_v33 }
 0xc2a   :  { %2286 = vmatprep.subr.bf16.mxu0 %v6318_v34  ;;  %4771 = vmatprep.subr.bf16.mxu1 %v7446_v53 }
 0xc2d   :  { %2287 = vmatpush1.bf16.msra.mxu0 %v6323_v35  ;;  %4772 = vmatpush3.bf16.msra.mxu1 %v6329_v36 }
 0xc2e   :  { %2288 = vmatprep.subr.bf16.mxu0 %v6334_v37  ;;  %4773 = vmatprep.subr.bf16.mxu1 %v7446_v53 }
 0xc31   :  { %2289 = vmatpush1.bf16.msra.mxu0 %v6342_v38  ;;  %4774 = vmatpush3.bf16.msra.mxu1 %v6349_v39 }
 0xc32   :  { %2290 = vmatprep.subr.bf16.mxu0 %v6354_v40  ;;  %4775 = vmatprep.subr.bf16.mxu1 %v7446_v53 }
 0xc35   :  { %2291 = vmatpush1.bf16.msra.mxu0 %v6361_v41  ;;  %4776 = vmatpush3.bf16.msra.mxu1 %v6368_v42 }
 0xc36   :  { %2381 = vmatprep.subr.bf16.mxu0 %v6225_v14  ;;  %4781 = vmatprep.subr.bf16.mxu1 %v7446_v53 }
 0xceb   :  { %v2202_v23 = vpop.f32.mrb[68].mxu0  ;;  %v2243_v19 = vpop.f32.mrb[68].mxu1 }
 0xcec   :  { %v2249_v9 = vadd.f32 %v2202_v23, %v1713_v22  ;;  %v2204_v50 = vpop.f32.mrb[69].mxu0  ;;  %v4759_v4 = vpop.f32.mrb[69].mxu1  ;;  %v2263_v0 = vadd.f32 %v6425_v57, %v2243_v19 }
 0xced   :  { %v2256_v11 = vadd.f32 %v2204_v50, %v1715_v20  ;;  %v2206_v1 = vpop.f32.mrb[70].mxu0  ;;  %v2246_v10 = vpop.f32.mrb[70].mxu1 }
 0xcee   :  { %v4174_v6 = vmul.f32 -1.442695, %v2249_v9  ;;  %v2207_v15 = vpop.f32.mrb[71].mxu0  ;;  %v4760_v5 = vpop.f32.mrb[71].mxu1 }
 0xcef   :  { %v4175_v21 = vmul.f32 -1.442695, %v2256_v11 }
 0xcf0   :  { %5319 = vpow2.f32 %v4174_v6 }
 0xcf1   :  { %5321 = vpow2.f32 %v4175_v21 }
 0xcfa   :  { %v5320_v44 = vpop.eup %5319 }
 0xcfb   :  { %v2253_v17 = vadd.f32 1.0, %v5320_v44  ;;  %v5322_v49 = vpop.eup %5321 }
 0xcfc   :  { %v2260_v16 = vadd.f32 1.0, %v5322_v49 }
 0xcfd   :  { %5323 = vrcp.f32 %v2253_v17 }
 0xcfe   :  { %5325 = vrcp.f32 %v2260_v16 }
 0xd07   :  { %v5324_v45 = vpop.eup %5323 }
 0xd08   :  { %v2264_v51 = vmul.f32 %v5324_v45, %v2263_v0  ;;  %v5326_v58 = vpop.eup %5325 }
 0xd09   :  { %v2267_v46 = vsub.f32 1.0, %v5326_v58  ;;  %v2269_v20 = vmul.f32 %v5326_v58, %v6542_v48  ;;  %v1721_v48 = vadd.f32 %v6413_v7, %v6390_v63 }
 0xd0a   :  { %v2265_v13 = vadd.f32 %v2264_v51, %v1783_v43  ;;  %v1788_v51 = vadd.f32 %v6477_v25, %v6420_v56 }
 0xd0c   :  { %5327 = vtanh.f32 %v2265_v13 }
 0xd16   :  { %v5328_v8 = vpop.eup %5327 }
 0xd17   :  { %v2268_v22 = vmul.f32 %v5328_v8, %v2267_v46 }
 0xd19   :  { %v6589_v23 = vadd.f32 %v2269_v20, %v2268_v22 }
 0xd1b   :  { %v2271_v9 = vpack.c.bf16 %v6589_v23, %v6589_v23 }
 0xd1d   :  { %v2273_v19 = vrot.slane %v2271_v9, 4  ;;  %2309 = vmatmul.mubr.bf16.vlgmr.msra.gmra.mrb[72].mxu0 %v2271_v9  ;;  %4778 = vmatmul.mubr.bf16.vlgmr.msra.gmra.mrb[72].mxu1 %v2271_v9 }
 0xd1e   :  { %2382 = vmatpush1.bf16.msra.mxu0 %v6230_v18  ;;  %4782 = vmatpush3.bf16.msra.mxu1 %v6236_v62 }
 0xd1f   :  { %2275 = vst [vmem:[#allocation2 + $0x8] sm:$0xf0] %v2273_v19  ;;  %2383 = vmatprep.subr.bf16.mxu0 %v6243_v52  ;;  %4783 = vmatprep.subr.bf16.mxu1 %v7446_v53 }
 0xd20   :  { %2413 = vmatprep.mubr.bf16.mxu0 %v7447_v54  ;;  %4797 = vmatprep.mubr.msk.bf16.mxu1 %vm5474_vm5, %v7446_v53 }
 0xd22   :  { %2384 = vmatpush1.bf16.msra.mxu0 %v6248_v2  ;;  %4784 = vmatpush3.bf16.msra.mxu1 %v6254_v47 }
 0xd23   :  { %2385 = vmatprep.subr.bf16.mxu0 %v6262_v55  ;;  %4785 = vmatprep.subr.bf16.mxu1 %v7446_v53 }
 0xd26   :  { %2386 = vmatpush1.bf16.msra.mxu0 %v6267_v26  ;;  %4786 = vmatpush3.bf16.msra.mxu1 %v6273_v27 }
 0xd27   :  { %2387 = vmatprep.subr.bf16.mxu0 %v6281_v28  ;;  %4787 = vmatprep.subr.bf16.mxu1 %v7446_v53 }
 0xd2a   :  { %2388 = vmatpush1.bf16.msra.mxu0 %v6286_v29  ;;  %4788 = vmatpush3.bf16.msra.mxu1 %v6292_v30 }
 0xd2b   :  { %2389 = vmatprep.subr.bf16.mxu0 %v6300_v31  ;;  %4789 = vmatprep.subr.bf16.mxu1 %v7446_v53 }
 0xd2e   :  { %2390 = vmatpush1.bf16.msra.mxu0 %v6305_v32  ;;  %4790 = vmatpush3.bf16.msra.mxu1 %v6311_v33 }
 0xd2f   :  { %2391 = vmatprep.subr.bf16.mxu0 %v6318_v34  ;;  %4791 = vmatprep.subr.bf16.mxu1 %v7446_v53 }
 0xd32   :  { %2392 = vmatpush1.bf16.msra.mxu0 %v6323_v35  ;;  %4792 = vmatpush3.bf16.msra.mxu1 %v6329_v36 }
 0xd33   :  { %2393 = vmatprep.subr.bf16.mxu0 %v6334_v37  ;;  %4793 = vmatprep.subr.bf16.mxu1 %v7446_v53 }
 0xd36   :  { %2394 = vmatpush1.bf16.msra.mxu0 %v6342_v38  ;;  %4794 = vmatpush3.bf16.msra.mxu1 %v6349_v39 }
 0xd37   :  { %2395 = vmatprep.subr.bf16.mxu0 %v6354_v40  ;;  %4795 = vmatprep.subr.bf16.mxu1 %v7446_v53 }
 0xd3a   :  { %2396 = vmatpush1.bf16.msra.mxu0 %v6361_v41  ;;  %4796 = vmatpush3.bf16.msra.mxu1 %v6368_v42 }
 0xd3b   :  { %2489 = vmatprep.subr.bf16.mxu0 %v6225_v14  ;;  %4801 = vmatprep.subr.bf16.mxu1 %v7446_v53 }
 0xdf0   :  { %v2310_v50 = vpop.f32.mrb[72].mxu0  ;;  %v2351_v4 = vpop.f32.mrb[72].mxu1 }
 0xdf1   :  { %v2357_v11 = vadd.f32 %v2310_v50, %v1719_v59  ;;  %v2312_v1 = vpop.f32.mrb[73].mxu0  ;;  %v4779_v10 = vpop.f32.mrb[73].mxu1  ;;  %v2371_v7 = vadd.f32 %v6425_v57, %v2351_v4 }
 0xdf2   :  { %v2364_v6 = vadd.f32 %v2312_v1, %v1721_v48  ;;  %v2314_v15 = vpop.f32.mrb[74].mxu0  ;;  %v2354_v5 = vpop.f32.mrb[74].mxu1 }
 0xdf3   :  { %v4176_v21 = vmul.f32 -1.442695, %v2357_v11  ;;  %v2315_v44 = vpop.f32.mrb[75].mxu0  ;;  %v4780_v17 = vpop.f32.mrb[75].mxu1 }
 0xdf4   :  { %v4177_v49 = vmul.f32 -1.442695, %v2364_v6  ;;  %v1791_v6 = vadd.f32 %v6485_v3, %v6420_v56  ;;  %v5452_v3 = vld [vmem:[%s7411_s10] ss:$12 sps:$4 sm:$0xff]  }
 0xdf5   :  { %5329 = vpow2.f32 %v4176_v21 }
 0xdf6   :  { %5331 = vpow2.f32 %v4177_v49 }
 0xdff   :  { %v5330_v16 = vpop.eup %5329 }
 0xe00   :  { %v2361_v0 = vadd.f32 1.0, %v5330_v16  ;;  %v5332_v61 = vpop.eup %5331 }
 0xe01   :  { %v2368_v45 = vadd.f32 1.0, %v5332_v61 }
 0xe02   :  { %5333 = vrcp.f32 %v2361_v0 }
 0xe03   :  { %5335 = vrcp.f32 %v2368_v45 }
 0xe0c   :  { %v5334_v43 = vpop.eup %5333 }
 0xe0d   :  { %v2372_v13 = vmul.f32 %v5334_v43, %v2371_v7  ;;  %v5336_v46 = vpop.eup %5335  ;;  %v5453_v7 = vld [vmem:[%s7411_s10 + $0x8] ss:$12 sps:$4 sm:$0xff]  }
 0xe0e   :  { %v2375_v8 = vsub.f32 1.0, %v5336_v46  ;;  %v2377_v9 = vmul.f32 %v5336_v46, %v6589_v23  ;;  %v5454_v43 = vld [vmem:[%s7411_s10 + $0x1c] ss:$12 sps:$4 sm:$0xff]  }
 0xe0f   :  { %v2373_v58 = vadd.f32 %v2372_v13, %v1788_v51  ;;  %v5455_v51 = vld [vmem:[%s7411_s10 + $0x18] ss:$12 sps:$4 sm:$0xff]   ;;  %v5456_v13 = vld [vmem:[%s7411_s10 + $0x20] ss:$12 sps:$4 sm:$0xff]   ;;  %v5458_v46 = vld [vmem:[%s7411_s10 + $0x30] ss:$12 sps:$4 sm:$0xff]  }
 0xe11   :  { %5337 = vtanh.f32 %v2373_v58  ;;  %v5457_v58 = vld [vmem:[%s7411_s10 + $0x34] ss:$12 sps:$4 sm:$0xff]  }
 0xe1b   :  { %v5338_v22 = vpop.eup %5337 }
 0xe1c   :  { %v2376_v20 = vmul.f32 %v5338_v22, %v2375_v8  ;;  %v5459_v8 = vld [vmem:[%s7411_s10 + $0x38] ss:$12 sps:$4 sm:$0xff]  }
 0xe1d   :  { %v5460_v22 = vld [vmem:[%s7411_s10 + $0x4c] ss:$12 sps:$4 sm:$0xff]  }
 0xe1e   :  { %v6636_v19 = vadd.f32 %v2377_v9, %v2376_v20 }
 0xe20   :  { %v2379_v59 = vpack.c.bf16 %v6636_v19, %v6636_v19 }
 0xe22   :  { %2380 = vst [vmem:[#allocation2 + $0x10] sm:$0xf] %v2379_v59  ;;  %2414 = vmatmul.mubr.bf16.vlgmr.msra.gmra.mrb[76].mxu0 %v2379_v59  ;;  %4798 = vmatmul.mubr.bf16.vlgmr.msra.gmra.mrb[76].mxu1 %v2379_v59 }
 0xe23   :  { %2490 = vmatpush1.bf16.msra.mxu0 %v6230_v18  ;;  %4802 = vmatpush3.bf16.msra.mxu1 %v6236_v62  ;;  %v1723_v18 = vadd.f32 %v6415_v24, %v6384_v12  ;;  %v1725_v62 = vadd.f32 %v6417_v60, %v6390_v63 }
 0xe24   :  { %2491 = vmatprep.subr.bf16.mxu0 %v6243_v52  ;;  %4803 = vmatprep.subr.bf16.mxu1 %v7446_v53 }
 0xe25   :  { %2521 = vmatprep.mubr.bf16.mxu0 %v7447_v54  ;;  %4817 = vmatprep.mubr.msk.bf16.mxu1 %vm5474_vm5, %v7446_v53 }
 0xe27   :  { %2492 = vmatpush1.bf16.msra.mxu0 %v6248_v2  ;;  %4804 = vmatpush3.bf16.msra.mxu1 %v6254_v47 }
 0xe28   :  { %2493 = vmatprep.subr.bf16.mxu0 %v6262_v55  ;;  %4805 = vmatprep.subr.bf16.mxu1 %v7446_v53 }
 0xe2b   :  { %2494 = vmatpush1.bf16.msra.mxu0 %v6267_v26  ;;  %4806 = vmatpush3.bf16.msra.mxu1 %v6273_v27 }
 0xe2c   :  { %2495 = vmatprep.subr.bf16.mxu0 %v6281_v28  ;;  %4807 = vmatprep.subr.bf16.mxu1 %v7446_v53 }
 0xe2f   :  { %2496 = vmatpush1.bf16.msra.mxu0 %v6286_v29  ;;  %4808 = vmatpush3.bf16.msra.mxu1 %v6292_v30 }
 0xe30   :  { %2497 = vmatprep.subr.bf16.mxu0 %v6300_v31  ;;  %4809 = vmatprep.subr.bf16.mxu1 %v7446_v53 }
 0xe33   :  { %2498 = vmatpush1.bf16.msra.mxu0 %v6305_v32  ;;  %4810 = vmatpush3.bf16.msra.mxu1 %v6311_v33 }
 0xe34   :  { %2499 = vmatprep.subr.bf16.mxu0 %v6318_v34  ;;  %4811 = vmatprep.subr.bf16.mxu1 %v7446_v53 }
 0xe37   :  { %2500 = vmatpush1.bf16.msra.mxu0 %v6323_v35  ;;  %4812 = vmatpush3.bf16.msra.mxu1 %v6329_v36 }
 0xe38   :  { %2501 = vmatprep.subr.bf16.mxu0 %v6334_v37  ;;  %4813 = vmatprep.subr.bf16.mxu1 %v7446_v53 }
 0xe3b   :  { %2502 = vmatpush1.bf16.msra.mxu0 %v6342_v38  ;;  %4814 = vmatpush3.bf16.msra.mxu1 %v6349_v39 }
 0xe3c   :  { %2503 = vmatprep.subr.bf16.mxu0 %v6354_v40  ;;  %4815 = vmatprep.subr.bf16.mxu1 %v7446_v53 }
 0xe3f   :  { %2504 = vmatpush1.bf16.msra.mxu0 %v6361_v41  ;;  %4816 = vmatpush3.bf16.msra.mxu1 %v6368_v42 }
 0xe40   :  { %2594 = vmatprep.subr.bf16.mxu0 %v6225_v14  ;;  %4821 = vmatprep.subr.bf16.mxu1 %v7446_v53 }
 0xef5   :  { %v2415_v52 = vpop.f32.mrb[76].mxu0  ;;  %v2456_v2 = vpop.f32.mrb[76].mxu1 }
 0xef6   :  { %v2462_v47 = vadd.f32 %v2415_v52, %v1723_v18  ;;  %v2417_v55 = vpop.f32.mrb[77].mxu0  ;;  %v4799_v26 = vpop.f32.mrb[77].mxu1  ;;  %v2476_v60 = vadd.f32 %v6425_v57, %v2456_v2 }
 0xef7   :  { %v2469_v27 = vadd.f32 %v2417_v55, %v1725_v62  ;;  %v2419_v28 = vpop.f32.mrb[78].mxu0  ;;  %v2459_v25 = vpop.f32.mrb[78].mxu1  ;;  %v7461_v26 = vld [vmem:[#allocation6_spill] sm:$0xff] }
 0xef8   :  { %v4178_v23 = vmul.f32 -1.442695, %v2462_v47  ;;  %v2420_v48 = vpop.f32.mrb[79].mxu0  ;;  %v4800_v50 = vpop.f32.mrb[79].mxu1 }
 0xef9   :  { %v4179_v14 = vmul.f32 -1.442695, %v2469_v27  ;;  %v1796_v27 = vadd.f32 %v7461_v26, %v6420_v56  ;;  %v6973_v26 = vld [vmem:[%s7415_s14 + $0xb0] ss:$12 sps:$4 sm:$0xff]  }
 0xefa   :  { %5339 = vpow2.f32 %v4178_v23 }
 0xefb   :  { %5341 = vpow2.f32 %v4179_v14 }
 0xf04   :  { %v5340_v4 = vpop.eup %5339 }
 0xf05   :  { %v2466_v11 = vadd.f32 1.0, %v5340_v4  ;;  %v5342_v24 = vpop.eup %5341 }
 0xf06   :  { %v2473_v1 = vadd.f32 1.0, %v5342_v24 }
 0xf07   :  { %5343 = vrcp.f32 %v2466_v11 }
 0xf08   :  { %5345 = vrcp.f32 %v2473_v1  ;;  %v5143_v1 = vld [vmem:[%s7414_s13 + $0x1c] ss:$12 sps:$4 sm:$0xff]  }
 0xf11   :  { %v5344_v10 = vpop.eup %5343 }
 0xf12   :  { %v2477_v15 = vmul.f32 %v5344_v10, %v2476_v60  ;;  %v5346_v21 = vpop.eup %5345  ;;  %v5144_v60 = vld [vmem:[%s7414_s13 + $0x20] ss:$12 sps:$4 sm:$0xff]  }
 0xf13   :  { %v2480_v44 = vsub.f32 1.0, %v5346_v21  ;;  %v2482_v16 = vmul.f32 %v5346_v21, %v6636_v19  ;;  %v2702_v10 = vld [vmem:[#allocation2] sm:$0xff]  ;;  %v5145_v21 = vld [vmem:[%s7414_s13 + $0x30] ss:$12 sps:$4 sm:$0xff]  }
 0xf14   :  { %v2478_v5 = vadd.f32 %v2477_v15, %v1791_v6  ;;  %v5141_v6 = vld [vmem:[%s7414_s13 + $0x18] ss:$12 sps:$4 sm:$0xff]   ;;  %v5147_v15 = vld [vmem:[%s7414_s13 + $0x34] ss:$12 sps:$4 sm:$0xff]  }
 0xf16   :  { %5347 = vtanh.f32 %v2478_v5  ;;  %v5148_v5 = vld [vmem:[%s7414_s13 + $0x38] ss:$12 sps:$4 sm:$0xff]  }
 0xf20   :  { %v5348_v17 = vpop.eup %5347 }
 0xf21   :  { %v2481_v49 = vmul.f32 %v5348_v17, %v2480_v44  ;;  %v5151_v44 = vld [vmem:[%s7414_s13 + $0x4c] ss:$12 sps:$4 sm:$0xff]   ;;  %v5152_v17 = vld [vmem:[%s7414_s13 + $0x50] ss:$12 sps:$4 sm:$0xff]  }
 0xf23   :  { %v6683_v0 = vadd.f32 %v2482_v16, %v2481_v49  ;;  %v5149_v49 = vld [vmem:[%s7414_s13 + $0x48] ss:$12 sps:$4 sm:$0xff]   ;;  %v5155_v16 = vld [vmem:[%s7414_s13 + $0x64] ss:$12 sps:$4 sm:$0xff]  }
 0xf25   :  { %v2484_v61 = vpack.c.bf16 %v6683_v0, %v6683_v0 }
 0xf27   :  { %v2486_v45 = vrot.slane %v2484_v61, 4  ;;  %2522 = vmatmul.mubr.bf16.vlgmr.msra.gmra.mrb[80].mxu0 %v2484_v61  ;;  %4818 = vmatmul.mubr.bf16.vlgmr.msra.gmra.mrb[80].mxu1 %v2484_v61  ;;  %v5153_v61 = vld [vmem:[%s7414_s13 + $0x60] ss:$12 sps:$4 sm:$0xff]  }
 0xf28   :  { %2595 = vmatpush1.bf16.msra.mxu0 %v5452_v3  ;;  %4822 = vmatpush3.bf16.msra.mxu1 %v5453_v7  ;;  %v5160_v3 = vld [vmem:[%s7414_s13 + $0x80] ss:$12 sps:$4 sm:$0xff]   ;;  %v5157_v7 = vld [vmem:[%s7414_s13 + $0x78] ss:$12 sps:$4 sm:$0xff]  }
 0xf29   :  { %2488 = vst [vmem:[#allocation2 + $0x10] sm:$0xf0] %v2486_v45  ;;  %2596 = vmatprep.subr.bf16.mxu0 %v5454_v43  ;;  %4823 = vmatprep.subr.bf16.mxu1 %v7446_v53  ;;  %v5159_v45 = vld [vmem:[%s7414_s13 + $0x7c] ss:$12 sps:$4 sm:$0xff]   ;;  %v5163_v43 = vld [vmem:[%s7414_s13 + $0x94] ss:$12 sps:$4 sm:$0xff]  }
 0xf2a   :  { %2626 = vmatprep.mubr.bf16.mxu0 %v7447_v54  ;;  %4837 = vmatprep.mubr.msk.bf16.mxu1 %vm5474_vm5, %v7446_v53 }
 0xf2c   :  { %2597 = vmatpush1.bf16.msra.mxu0 %v5455_v51  ;;  %4824 = vmatpush3.bf16.msra.mxu1 %v5456_v13  ;;  %v5164_v51 = vld [vmem:[%s7414_s13 + $0x98] ss:$12 sps:$4 sm:$0xff]   ;;  %v5161_v13 = vld [vmem:[%s7414_s13 + $0x90] ss:$12 sps:$4 sm:$0xff]  }
 0xf2d   :  { %2598 = vmatprep.subr.bf16.mxu0 %v5457_v58  ;;  %4825 = vmatprep.subr.bf16.mxu1 %v7446_v53  ;;  %v5167_v58 = vld [vmem:[%s7414_s13 + $0xac] ss:$12 sps:$4 sm:$0xff]  }
 0xf30   :  { %2599 = vmatpush1.bf16.msra.mxu0 %v5458_v46  ;;  %4826 = vmatpush3.bf16.msra.mxu1 %v5459_v8  ;;  %v5168_v46 = vld [vmem:[%s7414_s13 + $0xb0] ss:$12 sps:$4 sm:$0xff]   ;;  %v5165_v8 = vld [vmem:[%s7414_s13 + $0xa8] ss:$12 sps:$4 sm:$0xff]  }
 0xf31   :  { %2600 = vmatprep.subr.bf16.mxu0 %v5460_v22  ;;  %4827 = vmatprep.subr.bf16.mxu1 %v7446_v53  ;;  %v2703_v22 = vld [vmem:[#allocation2 + $0x8] sm:$0xff] }
 0xf34   :  { %2601 = vmatpush1.bf16.msra.mxu0 %v6286_v29  ;;  %4828 = vmatpush3.bf16.msra.mxu1 %v6292_v30  ;;  %v5139_v29 = vld [vmem:[%s7414_s13 + $0x4] ss:$12 sps:$4 sm:$0xff]   ;;  %v5140_v30 = vld [vmem:[%s7414_s13 + $0x8] ss:$12 sps:$4 sm:$0xff]  }
 0xf35   :  { %2602 = vmatprep.subr.bf16.mxu0 %v6300_v31  ;;  %4829 = vmatprep.subr.bf16.mxu1 %v7446_v53  ;;  %v7459_v31 = vld [vmem:[#allocation7_spill] sm:$0xff] }
 0xf38   :  { %2603 = vmatpush1.bf16.msra.mxu0 %v6305_v32  ;;  %4830 = vmatpush3.bf16.msra.mxu1 %v6311_v33  ;;  %v1729_v32 = vadd.f32 %v7459_v31, %v6384_v12  ;;  %v7460_v33 = vld [vmem:[#allocation8_spill] sm:$0xff] }
 0xf39   :  { %2604 = vmatprep.subr.bf16.mxu0 %v6318_v34  ;;  %4831 = vmatprep.subr.bf16.mxu1 %v7446_v53  ;;  %v1731_v34 = vadd.f32 %v7460_v33, %v6390_v63  ;;  %v6835_v31 = vld [vmem:[%s7415_s14] ss:$12 sps:$4 sm:$0xff]   ;;  %v6848_v33 = vld [vmem:[%s7415_s14 + $0x1c] ss:$12 sps:$4 sm:$0xff]  }
 0xf3c   :  { %2605 = vmatpush1.bf16.msra.mxu0 %v6323_v35  ;;  %4832 = vmatpush3.bf16.msra.mxu1 %v6329_v36 }
 0xf3d   :  { %2606 = vmatprep.subr.bf16.mxu0 %v6334_v37  ;;  %4833 = vmatprep.subr.bf16.mxu1 %v7446_v53 }
 0xf40   :  { %2607 = vmatpush1.bf16.msra.mxu0 %v6342_v38  ;;  %4834 = vmatpush3.bf16.msra.mxu1 %v6349_v39 }
 0xf41   :  { %2608 = vmatprep.subr.bf16.mxu0 %v6354_v40  ;;  %4835 = vmatprep.subr.bf16.mxu1 %v7446_v53 }
 0xf44   :  { %2609 = vmatpush1.bf16.msra.mxu0 %v6361_v41  ;;  %4836 = vmatpush3.bf16.msra.mxu1 %v6368_v42 }
 0xf45   :  { %2916 = vmatprep.subr.bf16.mxu0 %v5139_v29  ;;  %4841 = vmatprep.subr.bf16.mxu1 %v5140_v30  ;;  %v2704_v29 = vld [vmem:[#allocation2 + $0x10] sm:$0xff] }
 0xffa   :  { %v2523_v35 = vpop.f32.mrb[80].mxu0  ;;  %v2564_v36 = vpop.f32.mrb[80].mxu1 }
 0xffb   :  { %v2570_v37 = vadd.f32 %v2523_v35, %v1729_v32  ;;  %v2525_v38 = vpop.f32.mrb[81].mxu0  ;;  %v4819_v39 = vpop.f32.mrb[81].mxu1  ;;  %v2584_v47 = vadd.f32 %v6425_v57, %v2564_v36  ;;  %v5137_v57 = vld [vmem:[%s7414_s13] ss:$12 sps:$4 sm:$0xff]   ;;  %v6841_v32 = vld [vmem:[%s7415_s14 + $0x8] ss:$12 sps:$4 sm:$0xff]  }
 0xffc   :  { %v2577_v40 = vadd.f32 %v2525_v38, %v1731_v34  ;;  %v2527_v41 = vpop.f32.mrb[82].mxu0  ;;  %v2567_v42 = vpop.f32.mrb[82].mxu1  ;;  %v6853_v34 = vld [vmem:[%s7415_s14 + $0x18] ss:$12 sps:$4 sm:$0xff]   ;;  %v6859_v35 = vld [vmem:[%s7415_s14 + $0x20] ss:$12 sps:$4 sm:$0xff]  }
 0xffd   :  { %v4180_v20 = vmul.f32 -1.442695, %v2570_v37  ;;  %v2528_v9 = vpop.f32.mrb[83].mxu0  ;;  %v4820_v19 = vpop.f32.mrb[83].mxu1  ;;  %v6867_v36 = vld [vmem:[%s7415_s14 + $0x34] ss:$12 sps:$4 sm:$0xff]  }
 0xffe   :  { %v4181_v59 = vmul.f32 -1.442695, %v2577_v40  ;;  %v6872_v37 = vld [vmem:[%s7415_s14 + $0x30] ss:$12 sps:$4 sm:$0xff]   ;;  %v6878_v38 = vld [vmem:[%s7415_s14 + $0x38] ss:$12 sps:$4 sm:$0xff]  }
 0xfff   :  { %5349 = vpow2.f32 %v4180_v20  ;;  %v6886_v39 = vld [vmem:[%s7415_s14 + $0x4c] ss:$12 sps:$4 sm:$0xff]   ;;  %v6891_v40 = vld [vmem:[%s7415_s14 + $0x48] ss:$12 sps:$4 sm:$0xff]   ;;  %v6897_v41 = vld [vmem:[%s7415_s14 + $0x50] ss:$12 sps:$4 sm:$0xff]  }
0x1000   :  { %5351 = vpow2.f32 %v4181_v59  ;;  %v6905_v42 = vld [vmem:[%s7415_s14 + $0x64] ss:$12 sps:$4 sm:$0xff]   ;;  %v6910_v20 = vld [vmem:[%s7415_s14 + $0x60] ss:$12 sps:$4 sm:$0xff]   ;;  %v6916_v9 = vld [vmem:[%s7415_s14 + $0x68] ss:$12 sps:$4 sm:$0xff]  }
0x1001   :  { %v6923_v19 = vld [vmem:[%s7415_s14 + $0x7c] ss:$12 sps:$4 sm:$0xff]   ;;  %v6928_v59 = vld [vmem:[%s7415_s14 + $0x78] ss:$12 sps:$4 sm:$0xff]  }
0x1009   :  { %v5350_v18 = vpop.eup %5349 }
0x100a   :  { %v2574_v62 = vadd.f32 1.0, %v5350_v18  ;;  %v5352_v52 = vpop.eup %5351  ;;  %v6934_v18 = vld [vmem:[%s7415_s14 + $0x80] ss:$12 sps:$4 sm:$0xff]  }
0x100b   :  { %v2581_v2 = vadd.f32 1.0, %v5352_v52  ;;  %v6947_v52 = vld [vmem:[%s7415_s14 + $0x90] ss:$12 sps:$4 sm:$0xff]  }
0x100c   :  { %5353 = vrcp.f32 %v2574_v62  ;;  %v6939_v62 = vld [vmem:[%s7415_s14 + $0x94] ss:$12 sps:$4 sm:$0xff]  }
0x100d   :  { %5355 = vrcp.f32 %v2581_v2  ;;  %v6954_v2 = vld [vmem:[%s7415_s14 + $0x98] ss:$12 sps:$4 sm:$0xff]  }
0x1016   :  { %v5354_v55 = vpop.eup %5353 }
0x1017   :  { %v2585_v28 = vmul.f32 %v5354_v55, %v2584_v47  ;;  %v5356_v23 = vpop.eup %5355  ;;  %v6959_v47 = vld [vmem:[%s7415_s14 + $0xac] ss:$12 sps:$4 sm:$0xff]   ;;  %v6966_v55 = vld [vmem:[%s7415_s14 + $0xa8] ss:$12 sps:$4 sm:$0xff]  }
0x1018   :  { %v2588_v48 = vsub.f32 1.0, %v5356_v23  ;;  %v2590_v4 = vmul.f32 %v5356_v23, %v6683_v0  ;;  %v5156_v0 = vld [vmem:[%s7414_s13 + $0x68] ss:$12 sps:$4 sm:$0xff]  }
0x1019   :  { %v2586_v25 = vadd.f32 %v2585_v28, %v1796_v27  ;;  %v7462_v27 = vld [vmem:[#allocation9_spill] sm:$0xff] }
0x101a   :  { %v1733_v28 = vadd.f32 %v7462_v27, %v6384_v12 }
0x101b   :  { %5357 = vtanh.f32 %v2586_v25  ;;  %v7463_v25 = vld [vmem:[#allocation11_spill] sm:$0xff] }
0x101c   :  { %v1735_v23 = vadd.f32 %v7463_v25, %v6390_v63  ;;  %v2770_v63 = vld [vmem:[%s7416_s15] sm:$0x7] }
0x1025   :  { %v5358_v50 = vpop.eup %5357 }
0x1026   :  { %v2589_v14 = vmul.f32 %v5358_v50, %v2588_v48 }
0x1028   :  { %v6752_v11 = vadd.f32 %v2590_v4, %v2589_v14 }
0x102a   :  { %v2592_v24 = vpack.c.bf16 %v6752_v11, %v6752_v11 }
0x102c   :  { %2593 = vst [vmem:[#allocation2 + $0x18] sm:$0xf] %v2592_v24  ;;  %2627 = vmatmul.mubr.bf16.vlgmr.msra.gmra.mrb[84].mxu0 %v2592_v24  ;;  %4838 = vmatmul.mubr.bf16.vlgmr.msra.gmra.mrb[84].mxu1 %v2592_v24 }
0x102d   :  { %2917 = vmatpush1.bf16.msra.mxu0 %v5137_v57  ;;  %4842 = vmatpush3.bf16.msra.mxu1 %v5140_v30  ;;  %v6830_v30 = vld [vmem:[%s7415_s14 + $0x4] ss:$12 sps:$4 sm:$0xff]  }
0x102e   :  { %4857 = vmatprep.mubr.bf16.mxu1 %v2702_v10  ;;  %2918 = vmatprep.subr.bf16.mxu0 %v5143_v1 }
0x102f   :  { %4843 = vmatprep.subr.bf16.mxu1 %v5144_v60  ;;  %2948 = vmatprep.mubr.bf16.mxu0 %v7447_v54 }
0x1031   :  { %2919 = vmatpush1.bf16.msra.mxu0 %v5141_v6  ;;  %4844 = vmatpush3.bf16.msra.mxu1 %v5144_v60 }
0x1032   :  { %2920 = vmatprep.subr.bf16.mxu0 %v5147_v15  ;;  %4845 = vmatprep.subr.bf16.mxu1 %v5148_v5 }
0x1035   :  { %2921 = vmatpush1.bf16.msra.mxu0 %v5145_v21  ;;  %4846 = vmatpush3.bf16.msra.mxu1 %v5148_v5 }
0x1036   :  { %2922 = vmatprep.subr.bf16.mxu0 %v5151_v44  ;;  %4847 = vmatprep.subr.bf16.mxu1 %v5152_v17 }
0x1039   :  { %2923 = vmatpush1.bf16.msra.mxu0 %v5149_v49  ;;  %4848 = vmatpush3.bf16.msra.mxu1 %v5152_v17  ;;  %v5461_v49 = vld [vmem:[%s7413_s12] ss:$0 sm:$0xff] }
0x103a   :  { %2924 = vmatprep.subr.bf16.mxu0 %v5155_v16  ;;  %4849 = vmatprep.subr.bf16.mxu1 %v5156_v0 }
0x103d   :  { %2925 = vmatpush1.bf16.msra.mxu0 %v5153_v61  ;;  %4850 = vmatpush3.bf16.msra.mxu1 %v5156_v0  ;;  %v7464_v61 = vld [vmem:[#allocation10_spill] sm:$0xff] }
0x103e   :  { %2926 = vmatprep.subr.bf16.mxu0 %v5159_v45  ;;  %4851 = vmatprep.subr.bf16.mxu1 %v5160_v3  ;;  %v1799_v45 = vadd.f32 %v7464_v61, %v6420_v56 }
0x1041   :  { %2927 = vmatpush1.bf16.msra.mxu0 %v5157_v7  ;;  %4852 = vmatpush3.bf16.msra.mxu1 %v5160_v3  ;;  %v7465_v7 = vld [vmem:[#allocation3_spill] sm:$0xff] }
0x1042   :  { %2928 = vmatprep.subr.bf16.mxu0 %v5163_v43  ;;  %4853 = vmatprep.subr.bf16.mxu1 %v5164_v51  ;;  %v6993_v43 = vrot.slane %v2770_v63, %v7465_v7  ;;  %v7467_v7 = vld [vmem:[#allocation4_spill] sm:$0xff] }
0x1045   :  { %2929 = vmatpush1.bf16.msra.mxu0 %v5161_v13  ;;  %4854 = vmatpush3.bf16.msra.mxu1 %v5164_v51 }
0x1046   :  { %2930 = vmatprep.subr.bf16.mxu0 %v5167_v58  ;;  %4855 = vmatprep.subr.bf16.mxu1 %v5168_v46 }
0x1049   :  { %2931 = vmatpush1.bf16.msra.mxu0 %v5165_v8  ;;  %4856 = vmatpush3.bf16.msra.mxu1 %v5168_v46  ;;  %v7466_v46 = vld [vmem:[#allocation5_spill] sm:$0xff] }
0x104a   :  { %4865 = vmatprep.subr.bf16.mxu1 %v7446_v53  ;;  %3206 = vmatprep.subr.bf16.mxu0 %v6830_v30  ;;  %v6998_v8 = vrot.slane %v2770_v63, %v7466_v46 }
0x104c   :  { %2949 = vmatmul.mubr.bf16.vlgmr.msra.gmra.mrb[88].mxu0 %v2702_v10  ;;  %4858 = vmatmul.mubr.bf16.vlgmr.msra.gmra.mrb[88].mxu1 %v2703_v22 }
0x104d   :  { %4861 = vmatprep.mubr.bf16.mxu1 %v2704_v29  ;;  %2958 = vmatprep.mubr.bf16.mxu0 %v7447_v54 }
0x104e   :  { %3207 = vmatpush1.bf16.msra.mxu0 %v6835_v31  ;;  %4866 = vmatpush3.bf16.msra.mxu1 %v6841_v32 }
0x104f   :  { %4867 = vmatprep.subr.bf16.mxu1 %v7446_v53  ;;  %3208 = vmatprep.subr.bf16.mxu0 %v6848_v33 }
0x1052   :  { %3209 = vmatpush1.bf16.msra.mxu0 %v6853_v34  ;;  %4868 = vmatpush3.bf16.msra.mxu1 %v6859_v35 }
0x1053   :  { %4869 = vmatprep.subr.bf16.mxu1 %v7446_v53  ;;  %3210 = vmatprep.subr.bf16.mxu0 %v6867_v36 }
0x1054   :  { %2959 = vmatmul.mubr.bf16.gmra.mrb[92].mxu0 %v2703_v22 }
0x1055   :  { %2968 = vmatprep.mubr.bf16.mxu0 %v7447_v54 }
0x1056   :  { %3211 = vmatpush1.bf16.msra.mxu0 %v6872_v37  ;;  %4870 = vmatpush3.bf16.msra.mxu1 %v6878_v38 }
0x1057   :  { %4871 = vmatprep.subr.bf16.mxu1 %v7446_v53  ;;  %3212 = vmatprep.subr.bf16.mxu0 %v6886_v39 }
0x105a   :  { %3213 = vmatpush1.bf16.msra.mxu0 %v6891_v40  ;;  %4872 = vmatpush3.bf16.msra.mxu1 %v6897_v41 }
0x105b   :  { %4873 = vmatprep.subr.bf16.mxu1 %v7446_v53  ;;  %3214 = vmatprep.subr.bf16.mxu0 %v6905_v42 }
0x105c   :  { %2969 = vmatmul.mubr.bf16.gmra.mrb[96].mxu0 %v2704_v29 }
0x105d   :  { %2978 = vmatprep.mubr.bf16.mxu0 %v7447_v54 }
0x105e   :  { %3215 = vmatpush1.bf16.msra.mxu0 %v6910_v20  ;;  %4874 = vmatpush3.bf16.msra.mxu1 %v6916_v9 }
0x105f   :  { %3216 = vmatprep.subr.bf16.mxu0 %v6923_v19  ;;  %4875 = vmatprep.subr.bf16.mxu1 %v7446_v53 }
0x1062   :  { %3217 = vmatpush1.bf16.msra.mxu0 %v6928_v59  ;;  %4876 = vmatpush3.bf16.msra.mxu1 %v6934_v18 }
0x1063   :  { %3218 = vmatprep.subr.bf16.mxu0 %v6939_v62  ;;  %4877 = vmatprep.subr.bf16.mxu1 %v7446_v53 }
0x1066   :  { %3219 = vmatpush1.bf16.msra.mxu0 %v6947_v52  ;;  %4878 = vmatpush3.bf16.msra.mxu1 %v6954_v2 }
0x1067   :  { %3220 = vmatprep.subr.bf16.mxu0 %v6959_v47  ;;  %4879 = vmatprep.subr.bf16.mxu1 %v7446_v53 }
0x106a   :  { %3221 = vmatpush1.bf16.msra.mxu0 %v6966_v55  ;;  %4880 = vmatpush3.bf16.msra.mxu1 %v6973_v26 }
0x106b   :  { %3310 = vmatprep.subr.bf16.mxu0 %v6830_v30  ;;  %4885 = vmatprep.subr.bf16.mxu1 %v7446_v53 }
0x10ff   :  { %v2628_v48 = vpop.f32.mrb[84].mxu0  ;;  %v2669_v50 = vpop.f32.mrb[84].mxu1 }
0x1100   :  { %v2675_v14 = vadd.f32 %v2628_v48, %v1733_v28  ;;  %v2630_v4 = vpop.f32.mrb[85].mxu0  ;;  %v4839_v57 = vpop.f32.mrb[85].mxu1  ;;  %v2689_v16 = vadd.f32 %v5461_v49, %v2669_v50 }
0x1101   :  { %v2682_v24 = vadd.f32 %v2630_v4, %v1735_v23  ;;  %v2632_v1 = vpop.f32.mrb[86].mxu0  ;;  %v2672_v60 = vpop.f32.mrb[86].mxu1 }
0x1102   :  { %v4182_v10 = vmul.f32 -1.442695, %v2675_v14  ;;  %v2633_v6 = vpop.f32.mrb[87].mxu0  ;;  %v4840_v15 = vpop.f32.mrb[87].mxu1 }
0x1103   :  { %v4183_v5 = vmul.f32 -1.442695, %v2682_v24 }
0x1104   :  { %5359 = vpow2.f32 %v4182_v10 }
0x1105   :  { %5361 = vpow2.f32 %v4183_v5 }
0x110e   :  { %v5360_v21 = vpop.eup %5359 }
0x110f   :  { %v2679_v44 = vadd.f32 1.0, %v5360_v21  ;;  %v5362_v12 = vpop.eup %5361 }
0x1110   :  { %v2686_v17 = vadd.f32 1.0, %v5362_v12 }
0x1111   :  { %5363 = vrcp.f32 %v2679_v44 }
0x1112   :  { %5365 = vrcp.f32 %v2686_v17 }
0x111b   :  { %v5364_v0 = vpop.eup %5363 }
0x111c   :  { %v2690_v3 = vmul.f32 %v5364_v0, %v2689_v16  ;;  %v5366_v14 = vpop.eup %5365 }
0x111d   :  { %v2693_v1 = vsub.f32 1.0, %v5366_v14  ;;  %v2695_v5 = vmul.f32 %v5366_v14, %v6752_v11 }
0x111e   :  { %v2691_v51 = vadd.f32 %v2690_v3, %v1799_v45 }
0x111f   :  { %v2950_v13 = vpop.f32.mrb[88].mxu0  ;;  %v6995_v58 = vpop.f32.mrb[88].mxu1 }
0x1120   :  { %5367 = vtanh.f32 %v2691_v51  ;;  %v2951_v22 = vadd.f32 %v2950_v13, %v6993_v43  ;;  %v2952_v29 = vpop.f32.mrb[89].mxu0  ;;  %v3023_v27 = vpop.f32.mrb[89].mxu1  ;;  %v7028_v51 = vrot.slane %v2770_v63, %v7467_v7  ;;  %v7033_v13 = vld [vmem:[%s7417_s16] ss:$0 sm:$0xff] }
0x1121   :  { %v7001_v28 = vpop.f32.mrb[90].mxu0  ;;  %v7003_v56 = vpop.f32.mrb[90].mxu1  ;;  %v2953_v50 = vadd.f32 %v2952_v29, %v6998_v8 }
0x1122   :  { %v4209_v25 = vmul.f32 -1.442695, %v2951_v22  ;;  %v7005_v23 = vpop.f32.mrb[91].mxu0  ;;  %v7007_v48 = vpop.f32.mrb[91].mxu1  ;;  %v3024_v29 = vadd.f32 %v3023_v27, %v7028_v51 }
0x1123   :  { %v4210_v4 = vmul.f32 -1.442695, %v2953_v50  ;;  %v2957_v7 = vadd.f32 %v7005_v23, %v6998_v8 }
0x1124   :  { %5369 = vpow2.f32 %v4209_v25 }
0x1125   :  { %5371 = vpow2.f32 %v4210_v4 }
0x1127   :  { %v7010_v57 = vpop.f32.mrb[92].mxu0 }
0x1128   :  { %v7012_v24 = vpop.f32.mrb[93].mxu0 }
0x1129   :  { %v7014_v60 = vpop.f32.mrb[94].mxu0 }
0x112a   :  { %v5368_v10 = vpop.eup %5367  ;;  %v7016_v6 = vpop.f32.mrb[95].mxu0 }
0x112b   :  { %v2694_v15 = vmul.f32 %v5368_v10, %v2693_v1 }
0x112d   :  { %v2696_v21 = vadd.f32 %v2695_v5, %v2694_v15 }
0x112e   :  { %v5370_v44 = vpop.eup %5369 }
0x112f   :  { %v2697_v12 = vpack.c.bf16 %v2696_v21, %v2696_v21  ;;  %v3063_v17 = vadd.f32 1.0, %v5370_v44  ;;  %v7019_v49 = vpop.f32.mrb[96].mxu0  ;;  %v5372_v3 = vpop.eup %5371 }
0x1130   :  { %v7021_v16 = vpop.f32.mrb[97].mxu0  ;;  %v3069_v11 = vadd.f32 1.0, %v5372_v3  ;;  %v2955_v3 = vadd.f32 %v7001_v28, %v6993_v43 }
0x1131   :  { %v2699_v0 = vrot.slane %v2697_v12, 4  ;;  %5373 = vrcp.f32 %v3063_v17  ;;  %v7023_v61 = vpop.f32.mrb[98].mxu0 }
0x1132   :  { %v7025_v45 = vpop.f32.mrb[99].mxu0  ;;  %5375 = vrcp.f32 %v3069_v11 }
0x1133   :  { %2701 = vst [vmem:[#allocation2 + $0x18] sm:$0xf0] %v2699_v0 }
0x113a   :  { %v2705_v46 = vld [vmem:[#allocation2 + $0x18] sm:$0xff] }
0x113b   :  { %v5374_v22 = vpop.eup %5373  ;;  %2979 = vmatmul.mubr.bf16.gmra.mrb[100].mxu0 %v2705_v46  ;;  %4862 = vmatmul.mubr.bf16.gmra.mrb[92].mxu1 %v2705_v46 }
0x113c   :  { %v3072_v25 = vmul.f32 %v5374_v22, %v7033_v13  ;;  %3238 = vmatprep.mubr.bf16.mxu0 %v7447_v54  ;;  %4881 = vmatprep.mubr.msk.bf16.mxu1 %vm5474_vm5, %v7446_v53  ;;  %v5376_v50 = vpop.eup %5375 }
0x113d   :  { %v3075_v14 = vsub.f32 1.0, %v5376_v50 }
0x113e   :  { %v3073_v63 = vadd.f32 %v3072_v25, %v3024_v29 }
0x1140   :  { %5377 = vtanh.f32 %v3073_v63 }
0x114a   :  { %v5378_v4 = vpop.eup %5377 }
0x114b   :  { %v7040_v1 = vmul.f32 %v5378_v4, %v3075_v14 }
0x114d   :  { %v3077_v10 = vpack.c.bf16 %v7040_v1, %v7040_v1 }
0x114f   :  { %3239 = vmatmul.mubr.bf16.vlgmr.msra.gmra.mrb[104].mxu0 %v3077_v10  ;;  %4882 = vmatmul.mubr.bf16.vlgmr.msra.gmra.mrb[96].mxu1 %v3077_v10 }
0x1150   :  { %3311 = vmatpush1.bf16.msra.mxu0 %v6835_v31  ;;  %4886 = vmatpush3.bf16.msra.mxu1 %v6841_v32 }
0x1151   :  { %3312 = vmatprep.subr.bf16.mxu0 %v6848_v33  ;;  %4887 = vmatprep.subr.bf16.mxu1 %v7446_v53 }
0x1152   :  { %3342 = vmatprep.mubr.bf16.mxu0 %v7447_v54  ;;  %4901 = vmatprep.mubr.msk.bf16.mxu1 %vm5474_vm5, %v7446_v53 }
0x1154   :  { %3313 = vmatpush1.bf16.msra.mxu0 %v6853_v34  ;;  %4888 = vmatpush3.bf16.msra.mxu1 %v6859_v35 }
0x1155   :  { %3314 = vmatprep.subr.bf16.mxu0 %v6867_v36  ;;  %4889 = vmatprep.subr.bf16.mxu1 %v7446_v53 }
0x1158   :  { %3315 = vmatpush1.bf16.msra.mxu0 %v6872_v37  ;;  %4890 = vmatpush3.bf16.msra.mxu1 %v6878_v38 }
0x1159   :  { %3316 = vmatprep.subr.bf16.mxu0 %v6886_v39  ;;  %4891 = vmatprep.subr.bf16.mxu1 %v7446_v53 }
0x115c   :  { %3317 = vmatpush1.bf16.msra.mxu0 %v6891_v40  ;;  %4892 = vmatpush3.bf16.msra.mxu1 %v6897_v41 }
0x115d   :  { %3318 = vmatprep.subr.bf16.mxu0 %v6905_v42  ;;  %4893 = vmatprep.subr.bf16.mxu1 %v7446_v53 }
0x1160   :  { %3319 = vmatpush1.bf16.msra.mxu0 %v6910_v20  ;;  %4894 = vmatpush3.bf16.msra.mxu1 %v6916_v9 }
0x1161   :  { %3320 = vmatprep.subr.bf16.mxu0 %v6923_v19  ;;  %4895 = vmatprep.subr.bf16.mxu1 %v7446_v53 }
0x1164   :  { %3321 = vmatpush1.bf16.msra.mxu0 %v6928_v59  ;;  %4896 = vmatpush3.bf16.msra.mxu1 %v6934_v18 }
0x1165   :  { %3322 = vmatprep.subr.bf16.mxu0 %v6939_v62  ;;  %4897 = vmatprep.subr.bf16.mxu1 %v7446_v53 }
0x1168   :  { %3323 = vmatpush1.bf16.msra.mxu0 %v6947_v52  ;;  %4898 = vmatpush3.bf16.msra.mxu1 %v6954_v2 }
0x1169   :  { %3324 = vmatprep.subr.bf16.mxu0 %v6959_v47  ;;  %4899 = vmatprep.subr.bf16.mxu1 %v7446_v53 }
0x116c   :  { %3325 = vmatpush1.bf16.msra.mxu0 %v6966_v55  ;;  %4900 = vmatpush3.bf16.msra.mxu1 %v6973_v26 }
0x116d   :  { %3414 = vmatprep.subr.bf16.mxu0 %v6830_v30  ;;  %4905 = vmatprep.subr.bf16.mxu1 %v7446_v53 }
0x120e   :  { %v7079_v27 = vpop.f32.mrb[100].mxu0  ;;  %v7081_v15 = vpop.f32.mrb[92].mxu1 }
0x120f   :  { %7468 = vst [vmem:[#allocation7_spill] sm:$0xff] %v7079_v27  ;;  %7469 = vst [vmem:[#allocation8_spill] sm:$0xff] %v7081_v15  ;;  %v7083_v5 = vpop.f32.mrb[101].mxu0  ;;  %v7085_v21 = vpop.f32.mrb[93].mxu1 }
0x1210   :  { %7470 = vst [vmem:[#allocation6_spill] sm:$0xff] %v7083_v5  ;;  %v7087_v44 = vpop.f32.mrb[102].mxu0  ;;  %v7089_v12 = vpop.f32.mrb[94].mxu1 }
0x1211   :  { %7471 = vst [vmem:[#allocation9_spill] sm:$0xff] %v7087_v44  ;;  %7472 = vst [vmem:[#allocation11_spill] sm:$0xff] %v7089_v12  ;;  %v7091_v17 = vpop.f32.mrb[103].mxu0  ;;  %v7093_v0 = vpop.f32.mrb[95].mxu1 }
0x1212   :  { %7473 = vst [vmem:[#allocation10_spill] sm:$0xff] %v7091_v17 }
0x1222   :  { %v3240_v11 = vpop.f32.mrb[104].mxu0  ;;  %v3281_v46 = vpop.f32.mrb[96].mxu1 }
0x1223   :  { %v3287_v22 = vadd.f32 %v3240_v11, %v2955_v3  ;;  %v3242_v29 = vpop.f32.mrb[105].mxu0  ;;  %v4883_v25 = vpop.f32.mrb[97].mxu1  ;;  %v3301_v23 = vadd.f32 %v7033_v13, %v3281_v46  ;;  %v3027_v3 = vadd.f32 %v7007_v48, %v7028_v51  ;;  %v2961_v48 = vadd.f32 %v7010_v57, %v6993_v43 }
0x1224   :  { %v3294_v63 = vadd.f32 %v3242_v29, %v2957_v7  ;;  %v3244_v50 = vpop.f32.mrb[106].mxu0  ;;  %v3284_v14 = vpop.f32.mrb[98].mxu1 }
0x1225   :  { %v4235_v4 = vmul.f32 -1.442695, %v3287_v22  ;;  %v3245_v10 = vpop.f32.mrb[107].mxu0  ;;  %v4884_v12 = vpop.f32.mrb[99].mxu1 }
0x1226   :  { %v4236_v17 = vmul.f32 -1.442695, %v3294_v63 }
0x1227   :  { %5379 = vpow2.f32 %v4235_v4 }
0x1228   :  { %5381 = vpow2.f32 %v4236_v17 }
0x1231   :  { %v5380_v44 = vpop.eup %5379 }
0x1232   :  { %v3291_v15 = vadd.f32 1.0, %v5380_v44  ;;  %v5382_v28 = vpop.eup %5381 }
0x1233   :  { %v3298_v5 = vadd.f32 1.0, %v5382_v28 }
0x1234   :  { %5383 = vrcp.f32 %v3291_v15 }
0x1235   :  { %5385 = vrcp.f32 %v3298_v5 }
0x123e   :  { %v5384_v27 = vpop.eup %5383 }
0x123f   :  { %v3302_v7 = vmul.f32 %v5384_v27, %v3301_v23  ;;  %v5386_v22 = vpop.eup %5385 }
0x1240   :  { %v3305_v12 = vsub.f32 1.0, %v5386_v22  ;;  %v3307_v17 = vmul.f32 %v5386_v22, %v7040_v1  ;;  %v2963_v1 = vadd.f32 %v7012_v24, %v6998_v8 }
0x1241   :  { %v3303_v11 = vadd.f32 %v3302_v7, %v3027_v3 }
0x1243   :  { %5387 = vtanh.f32 %v3303_v11 }
0x124d   :  { %v5388_v29 = vpop.eup %5387 }
0x124e   :  { %v3306_v25 = vmul.f32 %v5388_v29, %v3305_v12 }
0x1250   :  { %v7103_v44 = vadd.f32 %v3307_v17, %v3306_v25  ;;  %v3032_v25 = vadd.f32 %v6995_v58, %v7028_v51  ;;  %v2965_v58 = vadd.f32 %v7014_v60, %v6993_v43 }
0x1252   :  { %v3309_v15 = vpack.c.bf16 %v7103_v44, %v7103_v44 }
0x1254   :  { %3343 = vmatmul.mubr.bf16.vlgmr.msra.gmra.mrb[108].mxu0 %v3309_v15  ;;  %4902 = vmatmul.mubr.bf16.vlgmr.msra.gmra.mrb[100].mxu1 %v3309_v15 }
0x1255   :  { %3415 = vmatpush1.bf16.msra.mxu0 %v6835_v31  ;;  %4906 = vmatpush3.bf16.msra.mxu1 %v6841_v32 }
0x1256   :  { %3416 = vmatprep.subr.bf16.mxu0 %v6848_v33  ;;  %4907 = vmatprep.subr.bf16.mxu1 %v7446_v53 }
0x1257   :  { %3446 = vmatprep.mubr.bf16.mxu0 %v7447_v54  ;;  %4921 = vmatprep.mubr.msk.bf16.mxu1 %vm5474_vm5, %v7446_v53 }
0x1259   :  { %3417 = vmatpush1.bf16.msra.mxu0 %v6853_v34  ;;  %4908 = vmatpush3.bf16.msra.mxu1 %v6859_v35 }
0x125a   :  { %3418 = vmatprep.subr.bf16.mxu0 %v6867_v36  ;;  %4909 = vmatprep.subr.bf16.mxu1 %v7446_v53 }
0x125d   :  { %3419 = vmatpush1.bf16.msra.mxu0 %v6872_v37  ;;  %4910 = vmatpush3.bf16.msra.mxu1 %v6878_v38 }
0x125e   :  { %3420 = vmatprep.subr.bf16.mxu0 %v6886_v39  ;;  %4911 = vmatprep.subr.bf16.mxu1 %v7446_v53 }
0x1261   :  { %3421 = vmatpush1.bf16.msra.mxu0 %v6891_v40  ;;  %4912 = vmatpush3.bf16.msra.mxu1 %v6897_v41 }
0x1262   :  { %3422 = vmatprep.subr.bf16.mxu0 %v6905_v42  ;;  %4913 = vmatprep.subr.bf16.mxu1 %v7446_v53 }
0x1265   :  { %3423 = vmatpush1.bf16.msra.mxu0 %v6910_v20  ;;  %4914 = vmatpush3.bf16.msra.mxu1 %v6916_v9 }
0x1266   :  { %3424 = vmatprep.subr.bf16.mxu0 %v6923_v19  ;;  %4915 = vmatprep.subr.bf16.mxu1 %v7446_v53 }
0x1269   :  { %3425 = vmatpush1.bf16.msra.mxu0 %v6928_v59  ;;  %4916 = vmatpush3.bf16.msra.mxu1 %v6934_v18 }
0x126a   :  { %3426 = vmatprep.subr.bf16.mxu0 %v6939_v62  ;;  %4917 = vmatprep.subr.bf16.mxu1 %v7446_v53 }
0x126d   :  { %3427 = vmatpush1.bf16.msra.mxu0 %v6947_v52  ;;  %4918 = vmatpush3.bf16.msra.mxu1 %v6954_v2 }
0x126e   :  { %3428 = vmatprep.subr.bf16.mxu0 %v6959_v47  ;;  %4919 = vmatprep.subr.bf16.mxu1 %v7446_v53 }
0x1271   :  { %3429 = vmatpush1.bf16.msra.mxu0 %v6966_v55  ;;  %4920 = vmatpush3.bf16.msra.mxu1 %v6973_v26 }
0x1272   :  { %3518 = vmatprep.subr.bf16.mxu0 %v6830_v30  ;;  %4925 = vmatprep.subr.bf16.mxu1 %v7446_v53 }
0x1327   :  { %v3344_v27 = vpop.f32.mrb[108].mxu0  ;;  %v3385_v5 = vpop.f32.mrb[100].mxu1 }
0x1328   :  { %v3391_v46 = vadd.f32 %v3344_v27, %v2961_v48  ;;  %v3346_v63 = vpop.f32.mrb[109].mxu0  ;;  %v4903_v50 = vpop.f32.mrb[101].mxu1  ;;  %v3405_v24 = vadd.f32 %v7033_v13, %v3385_v5 }
0x1329   :  { %v3398_v14 = vadd.f32 %v3346_v63, %v2963_v1  ;;  %v3348_v4 = vpop.f32.mrb[110].mxu0  ;;  %v3388_v10 = vpop.f32.mrb[102].mxu1 }
0x132a   :  { %v4237_v28 = vmul.f32 -1.442695, %v3391_v46  ;;  %v3349_v23 = vpop.f32.mrb[111].mxu0  ;;  %v4904_v3 = vpop.f32.mrb[103].mxu1 }
0x132b   :  { %v4238_v7 = vmul.f32 -1.442695, %v3398_v14 }
0x132c   :  { %5389 = vpow2.f32 %v4237_v28 }
0x132d   :  { %5391 = vpow2.f32 %v4238_v7 }
0x1336   :  { %v5390_v11 = vpop.eup %5389 }
0x1337   :  { %v3395_v22 = vadd.f32 1.0, %v5390_v11  ;;  %v5392_v57 = vpop.eup %5391 }
0x1338   :  { %v3402_v12 = vadd.f32 1.0, %v5392_v57 }
0x1339   :  { %5393 = vrcp.f32 %v3395_v22 }
0x133a   :  { %5395 = vrcp.f32 %v3402_v12 }
0x1343   :  { %v5394_v29 = vpop.eup %5393 }
0x1344   :  { %v3406_v17 = vmul.f32 %v5394_v29, %v3405_v24  ;;  %v5396_v48 = vpop.eup %5395 }
0x1345   :  { %v3409_v1 = vsub.f32 1.0, %v5396_v48  ;;  %v3411_v63 = vmul.f32 %v5396_v48, %v7103_v44  ;;  %v2967_v44 = vadd.f32 %v7016_v6, %v6998_v8  ;;  %v3035_v48 = vadd.f32 %v7003_v56, %v7028_v51 }
0x1346   :  { %v3407_v15 = vadd.f32 %v3406_v17, %v3032_v25  ;;  %v2971_v56 = vadd.f32 %v7019_v49, %v6993_v43 }
0x1348   :  { %5397 = vtanh.f32 %v3407_v15 }
0x1352   :  { %v5398_v27 = vpop.eup %5397 }
0x1353   :  { %v3410_v46 = vmul.f32 %v5398_v27, %v3409_v1 }
0x1355   :  { %v7150_v50 = vadd.f32 %v3411_v63, %v3410_v46 }
0x1357   :  { %v3413_v14 = vpack.c.bf16 %v7150_v50, %v7150_v50 }
0x1359   :  { %3447 = vmatmul.mubr.bf16.vlgmr.msra.gmra.mrb[112].mxu0 %v3413_v14  ;;  %4922 = vmatmul.mubr.bf16.vlgmr.msra.gmra.mrb[104].mxu1 %v3413_v14 }
0x135a   :  { %3519 = vmatpush1.bf16.msra.mxu0 %v6835_v31  ;;  %4926 = vmatpush3.bf16.msra.mxu1 %v6841_v32 }
0x135b   :  { %3520 = vmatprep.subr.bf16.mxu0 %v6848_v33  ;;  %4927 = vmatprep.subr.bf16.mxu1 %v7446_v53 }
0x135c   :  { %3550 = vmatprep.mubr.bf16.mxu0 %v7447_v54  ;;  %4941 = vmatprep.mubr.msk.bf16.mxu1 %vm5474_vm5, %v7446_v53 }
0x135e   :  { %3521 = vmatpush1.bf16.msra.mxu0 %v6853_v34  ;;  %4928 = vmatpush3.bf16.msra.mxu1 %v6859_v35 }
0x135f   :  { %3522 = vmatprep.subr.bf16.mxu0 %v6867_v36  ;;  %4929 = vmatprep.subr.bf16.mxu1 %v7446_v53 }
0x1362   :  { %3523 = vmatpush1.bf16.msra.mxu0 %v6872_v37  ;;  %4930 = vmatpush3.bf16.msra.mxu1 %v6878_v38 }
0x1363   :  { %3524 = vmatprep.subr.bf16.mxu0 %v6886_v39  ;;  %4931 = vmatprep.subr.bf16.mxu1 %v7446_v53 }
0x1366   :  { %3525 = vmatpush1.bf16.msra.mxu0 %v6891_v40  ;;  %4932 = vmatpush3.bf16.msra.mxu1 %v6897_v41 }
0x1367   :  { %3526 = vmatprep.subr.bf16.mxu0 %v6905_v42  ;;  %4933 = vmatprep.subr.bf16.mxu1 %v7446_v53 }
0x136a   :  { %3527 = vmatpush1.bf16.msra.mxu0 %v6910_v20  ;;  %4934 = vmatpush3.bf16.msra.mxu1 %v6916_v9 }
0x136b   :  { %3528 = vmatprep.subr.bf16.mxu0 %v6923_v19  ;;  %4935 = vmatprep.subr.bf16.mxu1 %v7446_v53 }
0x136e   :  { %3529 = vmatpush1.bf16.msra.mxu0 %v6928_v59  ;;  %4936 = vmatpush3.bf16.msra.mxu1 %v6934_v18 }
0x136f   :  { %3530 = vmatprep.subr.bf16.mxu0 %v6939_v62  ;;  %4937 = vmatprep.subr.bf16.mxu1 %v7446_v53 }
0x1372   :  { %3531 = vmatpush1.bf16.msra.mxu0 %v6947_v52  ;;  %4938 = vmatpush3.bf16.msra.mxu1 %v6954_v2 }
0x1373   :  { %3532 = vmatprep.subr.bf16.mxu0 %v6959_v47  ;;  %4939 = vmatprep.subr.bf16.mxu1 %v7446_v53 }
0x1376   :  { %3533 = vmatpush1.bf16.msra.mxu0 %v6966_v55  ;;  %4940 = vmatpush3.bf16.msra.mxu1 %v6973_v26 }
0x1377   :  { %3622 = vmatprep.subr.bf16.mxu0 %v6830_v30  ;;  %4945 = vmatprep.subr.bf16.mxu1 %v7446_v53 }
0x142c   :  { %v3448_v5 = vpop.f32.mrb[112].mxu0  ;;  %v3489_v4 = vpop.f32.mrb[104].mxu1 }
0x142d   :  { %v3495_v10 = vadd.f32 %v3448_v5, %v2965_v58  ;;  %v3450_v28 = vpop.f32.mrb[113].mxu0  ;;  %v4923_v23 = vpop.f32.mrb[105].mxu1  ;;  %v3509_v6 = vadd.f32 %v7033_v13, %v3489_v4 }
0x142e   :  { %v3502_v3 = vadd.f32 %v3450_v28, %v2967_v44  ;;  %v3452_v7 = vpop.f32.mrb[114].mxu0  ;;  %v3492_v11 = vpop.f32.mrb[106].mxu1 }
0x142f   :  { %v4239_v22 = vmul.f32 -1.442695, %v3495_v10  ;;  %v3453_v57 = vpop.f32.mrb[115].mxu0  ;;  %v4924_v12 = vpop.f32.mrb[107].mxu1 }
0x1430   :  { %v4240_v24 = vmul.f32 -1.442695, %v3502_v3 }
0x1431   :  { %5399 = vpow2.f32 %v4239_v22 }
0x1432   :  { %5401 = vpow2.f32 %v4240_v24 }
0x143b   :  { %v5400_v29 = vpop.eup %5399 }
0x143c   :  { %v3499_v25 = vadd.f32 1.0, %v5400_v29  ;;  %v5402_v60 = vpop.eup %5401 }
0x143d   :  { %v3506_v17 = vadd.f32 1.0, %v5402_v60 }
0x143e   :  { %5403 = vrcp.f32 %v3499_v25 }
0x143f   :  { %5405 = vrcp.f32 %v3506_v17 }
0x1448   :  { %v5404_v15 = vpop.eup %5403 }
0x1449   :  { %v3510_v1 = vmul.f32 %v5404_v15, %v3509_v6  ;;  %v5406_v46 = vpop.eup %5405 }
0x144a   :  { %v3513_v63 = vsub.f32 1.0, %v5406_v46  ;;  %v3515_v44 = vmul.f32 %v5406_v46, %v7150_v50  ;;  %v2973_v50 = vadd.f32 %v7021_v16, %v6998_v8 }
0x144b   :  { %v3511_v27 = vadd.f32 %v3510_v1, %v3035_v48  ;;  %v3040_v48 = vadd.f32 %v7085_v21, %v7028_v51 }
0x144d   :  { %5407 = vtanh.f32 %v3511_v27 }
0x1457   :  { %v5408_v14 = vpop.eup %5407 }
0x1458   :  { %v3514_v58 = vmul.f32 %v5408_v14, %v3513_v63 }
0x145a   :  { %v7197_v5 = vadd.f32 %v3515_v44, %v3514_v58 }
0x145c   :  { %v3517_v10 = vpack.c.bf16 %v7197_v5, %v7197_v5 }
0x145e   :  { %3551 = vmatmul.mubr.bf16.vlgmr.msra.gmra.mrb[116].mxu0 %v3517_v10  ;;  %4942 = vmatmul.mubr.bf16.vlgmr.msra.gmra.mrb[108].mxu1 %v3517_v10 }
0x145f   :  { %3623 = vmatpush1.bf16.msra.mxu0 %v6835_v31  ;;  %4946 = vmatpush3.bf16.msra.mxu1 %v6841_v32 }
0x1460   :  { %3624 = vmatprep.subr.bf16.mxu0 %v6848_v33  ;;  %4947 = vmatprep.subr.bf16.mxu1 %v7446_v53 }
0x1461   :  { %3654 = vmatprep.mubr.bf16.mxu0 %v7447_v54  ;;  %4961 = vmatprep.mubr.msk.bf16.mxu1 %vm5474_vm5, %v7446_v53 }
0x1463   :  { %3625 = vmatpush1.bf16.msra.mxu0 %v6853_v34  ;;  %4948 = vmatpush3.bf16.msra.mxu1 %v6859_v35 }
0x1464   :  { %3626 = vmatprep.subr.bf16.mxu0 %v6867_v36  ;;  %4949 = vmatprep.subr.bf16.mxu1 %v7446_v53 }
0x1467   :  { %3627 = vmatpush1.bf16.msra.mxu0 %v6872_v37  ;;  %4950 = vmatpush3.bf16.msra.mxu1 %v6878_v38 }
0x1468   :  { %3628 = vmatprep.subr.bf16.mxu0 %v6886_v39  ;;  %4951 = vmatprep.subr.bf16.mxu1 %v7446_v53 }
0x146b   :  { %3629 = vmatpush1.bf16.msra.mxu0 %v6891_v40  ;;  %4952 = vmatpush3.bf16.msra.mxu1 %v6897_v41 }
0x146c   :  { %3630 = vmatprep.subr.bf16.mxu0 %v6905_v42  ;;  %4953 = vmatprep.subr.bf16.mxu1 %v7446_v53 }
0x146f   :  { %3631 = vmatpush1.bf16.msra.mxu0 %v6910_v20  ;;  %4954 = vmatpush3.bf16.msra.mxu1 %v6916_v9 }
0x1470   :  { %3632 = vmatprep.subr.bf16.mxu0 %v6923_v19  ;;  %4955 = vmatprep.subr.bf16.mxu1 %v7446_v53 }
0x1473   :  { %3633 = vmatpush1.bf16.msra.mxu0 %v6928_v59  ;;  %4956 = vmatpush3.bf16.msra.mxu1 %v6934_v18 }
0x1474   :  { %3634 = vmatprep.subr.bf16.mxu0 %v6939_v62  ;;  %4957 = vmatprep.subr.bf16.mxu1 %v7446_v53 }
0x1477   :  { %3635 = vmatpush1.bf16.msra.mxu0 %v6947_v52  ;;  %4958 = vmatpush3.bf16.msra.mxu1 %v6954_v2 }
0x1478   :  { %3636 = vmatprep.subr.bf16.mxu0 %v6959_v47  ;;  %4959 = vmatprep.subr.bf16.mxu1 %v7446_v53 }
0x147b   :  { %3637 = vmatpush1.bf16.msra.mxu0 %v6966_v55  ;;  %4960 = vmatpush3.bf16.msra.mxu1 %v6973_v26 }
0x147c   :  { %3726 = vmatprep.subr.bf16.mxu0 %v6830_v30  ;;  %4965 = vmatprep.subr.bf16.mxu1 %v7446_v53 }
0x1531   :  { %v3552_v4 = vpop.f32.mrb[116].mxu0  ;;  %v3593_v28 = vpop.f32.mrb[108].mxu1 }
0x1532   :  { %v3599_v23 = vadd.f32 %v3552_v4, %v2971_v56  ;;  %v3554_v3 = vpop.f32.mrb[117].mxu0  ;;  %v4943_v7 = vpop.f32.mrb[109].mxu1  ;;  %v3613_v16 = vadd.f32 %v7033_v13, %v3593_v28 }
0x1533   :  { %v3606_v11 = vadd.f32 %v3554_v3, %v2973_v50  ;;  %v3556_v22 = vpop.f32.mrb[118].mxu0  ;;  %v3596_v57 = vpop.f32.mrb[110].mxu1 }
0x1534   :  { %v4241_v12 = vmul.f32 -1.442695, %v3599_v23  ;;  %v3557_v24 = vpop.f32.mrb[119].mxu0  ;;  %v4944_v29 = vpop.f32.mrb[111].mxu1  ;;  %v3043_v22 = vadd.f32 %v7093_v0, %v7028_v51  ;;  %v5462_v0 = vld [vmem:[%s7415_s14] ss:$12 sps:$4 sm:$0xff]  }
0x1535   :  { %v4242_v25 = vmul.f32 -1.442695, %v3606_v11 }
0x1536   :  { %5409 = vpow2.f32 %v4241_v12 }
0x1537   :  { %5411 = vpow2.f32 %v4242_v25 }
0x1540   :  { %v5410_v60 = vpop.eup %5409 }
0x1541   :  { %v3603_v17 = vadd.f32 1.0, %v5410_v60  ;;  %v5412_v49 = vpop.eup %5411 }
0x1542   :  { %v3610_v6 = vadd.f32 1.0, %v5412_v49 }
0x1543   :  { %5413 = vrcp.f32 %v3603_v17 }
0x1544   :  { %5415 = vrcp.f32 %v3610_v6 }
0x154d   :  { %v5414_v15 = vpop.eup %5413 }
0x154e   :  { %v3614_v1 = vmul.f32 %v5414_v15, %v3613_v16  ;;  %v5416_v46 = vpop.eup %5415  ;;  %v5463_v16 = vld [vmem:[%s7415_s14 + $0x8] ss:$12 sps:$4 sm:$0xff]  }
0x154f   :  { %v3617_v63 = vsub.f32 1.0, %v5416_v46  ;;  %v3619_v44 = vmul.f32 %v5416_v46, %v7197_v5  ;;  %v5464_v15 = vld [vmem:[%s7415_s14 + $0x1c] ss:$12 sps:$4 sm:$0xff]   ;;  %v5469_v46 = vld [vmem:[%s7415_s14 + $0x38] ss:$12 sps:$4 sm:$0xff]  }
0x1550   :  { %v3615_v27 = vadd.f32 %v3614_v1, %v3040_v48  ;;  %v5465_v48 = vld [vmem:[%s7415_s14 + $0x18] ss:$12 sps:$4 sm:$0xff]   ;;  %v5466_v1 = vld [vmem:[%s7415_s14 + $0x20] ss:$12 sps:$4 sm:$0xff]  }
0x1552   :  { %5417 = vtanh.f32 %v3615_v27  ;;  %v5467_v27 = vld [vmem:[%s7415_s14 + $0x34] ss:$12 sps:$4 sm:$0xff]  }
0x155c   :  { %v5418_v14 = vpop.eup %5417 }
0x155d   :  { %v3618_v58 = vmul.f32 %v5418_v14, %v3617_v63 }
0x155f   :  { %v7244_v10 = vadd.f32 %v3619_v44, %v3618_v58 }
0x1561   :  { %v3621_v56 = vpack.c.bf16 %v7244_v10, %v7244_v10 }
0x1563   :  { %3655 = vmatmul.mubr.bf16.vlgmr.msra.gmra.mrb[120].mxu0 %v3621_v56  ;;  %4962 = vmatmul.mubr.bf16.vlgmr.msra.gmra.mrb[112].mxu1 %v3621_v56 }
0x1564   :  { %3727 = vmatpush1.bf16.msra.mxu0 %v6835_v31  ;;  %4966 = vmatpush3.bf16.msra.mxu1 %v6841_v32  ;;  %v2975_v31 = vadd.f32 %v7023_v61, %v6993_v43  ;;  %v2977_v32 = vadd.f32 %v7025_v45, %v6998_v8 }
0x1565   :  { %3728 = vmatprep.subr.bf16.mxu0 %v6848_v33  ;;  %4967 = vmatprep.subr.bf16.mxu1 %v7446_v53 }
0x1566   :  { %3758 = vmatprep.mubr.bf16.mxu0 %v7447_v54  ;;  %4981 = vmatprep.mubr.msk.bf16.mxu1 %vm5474_vm5, %v7446_v53 }
0x1568   :  { %3729 = vmatpush1.bf16.msra.mxu0 %v6853_v34  ;;  %4968 = vmatpush3.bf16.msra.mxu1 %v6859_v35 }
0x1569   :  { %3730 = vmatprep.subr.bf16.mxu0 %v6867_v36  ;;  %4969 = vmatprep.subr.bf16.mxu1 %v7446_v53 }
0x156c   :  { %3731 = vmatpush1.bf16.msra.mxu0 %v6872_v37  ;;  %4970 = vmatpush3.bf16.msra.mxu1 %v6878_v38 }
0x156d   :  { %3732 = vmatprep.subr.bf16.mxu0 %v6886_v39  ;;  %4971 = vmatprep.subr.bf16.mxu1 %v7446_v53 }
0x1570   :  { %3733 = vmatpush1.bf16.msra.mxu0 %v6891_v40  ;;  %4972 = vmatpush3.bf16.msra.mxu1 %v6897_v41 }
0x1571   :  { %3734 = vmatprep.subr.bf16.mxu0 %v6905_v42  ;;  %4973 = vmatprep.subr.bf16.mxu1 %v7446_v53 }
0x1574   :  { %3735 = vmatpush1.bf16.msra.mxu0 %v6910_v20  ;;  %4974 = vmatpush3.bf16.msra.mxu1 %v6916_v9 }
0x1575   :  { %3736 = vmatprep.subr.bf16.mxu0 %v6923_v19  ;;  %4975 = vmatprep.subr.bf16.mxu1 %v7446_v53 }
0x1578   :  { %3737 = vmatpush1.bf16.msra.mxu0 %v6928_v59  ;;  %4976 = vmatpush3.bf16.msra.mxu1 %v6934_v18 }
0x1579   :  { %3738 = vmatprep.subr.bf16.mxu0 %v6939_v62  ;;  %4977 = vmatprep.subr.bf16.mxu1 %v7446_v53 }
0x157c   :  { %3739 = vmatpush1.bf16.msra.mxu0 %v6947_v52  ;;  %4978 = vmatpush3.bf16.msra.mxu1 %v6954_v2 }
0x157d   :  { %3740 = vmatprep.subr.bf16.mxu0 %v6959_v47  ;;  %4979 = vmatprep.subr.bf16.mxu1 %v7446_v53 }
0x1580   :  { %3741 = vmatpush1.bf16.msra.mxu0 %v6966_v55  ;;  %4980 = vmatpush3.bf16.msra.mxu1 %v6973_v26 }
0x1581   :  { %3830 = vmatprep.subr.bf16.mxu0 %v6830_v30  ;;  %4985 = vmatprep.subr.bf16.mxu1 %v7446_v53 }
0x1636   :  { %v3656_v33 = vpop.f32.mrb[120].mxu0  ;;  %v3697_v34 = vpop.f32.mrb[112].mxu1 }
0x1637   :  { %v3703_v35 = vadd.f32 %v3656_v33, %v2975_v31  ;;  %v3658_v36 = vpop.f32.mrb[121].mxu0  ;;  %v4963_v37 = vpop.f32.mrb[113].mxu1  ;;  %v3717_v45 = vadd.f32 %v7033_v13, %v3697_v34 }
0x1638   :  { %v3710_v38 = vadd.f32 %v3658_v36, %v2977_v32  ;;  %v3660_v21 = vpop.f32.mrb[122].mxu0  ;;  %v3700_v5 = vpop.f32.mrb[114].mxu1  ;;  %v7476_v32 = vld [vmem:[#allocation8_spill] sm:$0xff] }
0x1639   :  { %v4243_v50 = vmul.f32 -1.442695, %v3703_v35  ;;  %v3661_v4 = vpop.f32.mrb[123].mxu0  ;;  %v4964_v28 = vpop.f32.mrb[115].mxu1  ;;  %v3048_v33 = vadd.f32 %v7476_v32, %v7028_v51 }
0x163a   :  { %v4244_v30 = vmul.f32 -1.442695, %v3710_v38  ;;  %v5202_v28 = vld [vmem:[%s7418_s17 + $0x8] sm:$0xff]  }
0x163b   :  { %5419 = vpow2.f32 %v4243_v50 }
0x163c   :  { %5421 = vpow2.f32 %v4244_v30  ;;  %v5203_v30 = vld [vmem:[%s7418_s17 + $0x10] sm:$0xff]  }
0x1645   :  { %v5420_v23 = vpop.eup %5419 }
0x1646   :  { %v3707_v3 = vadd.f32 1.0, %v5420_v23  ;;  %v5422_v61 = vpop.eup %5421  ;;  %v5204_v23 = vld [vmem:[%s7418_s17 + $0x18] sm:$0xff]  }
0x1647   :  { %v3714_v7 = vadd.f32 1.0, %v5422_v61  ;;  %v5206_v61 = vld [vmem:[%s7418_s17 + $0x28] sm:$0xff]  }
0x1648   :  { %5423 = vrcp.f32 %v3707_v3  ;;  %v5205_v3 = vld [vmem:[%s7418_s17 + $0x20] sm:$0xff]  }
0x1649   :  { %5425 = vrcp.f32 %v3714_v7  ;;  %v5207_v7 = vld [vmem:[%s7418_s17 + $0x30] sm:$0xff]  }
0x1652   :  { %v5424_v11 = vpop.eup %5423 }
0x1653   :  { %v3718_v57 = vmul.f32 %v5424_v11, %v3717_v45  ;;  %v5426_v24 = vpop.eup %5425  ;;  %v5208_v45 = vld [vmem:[%s7418_s17 + $0x38] sm:$0xff]   ;;  %v7477_v11 = vld [vmem:[#allocation9_spill] sm:$0xff] }
0x1654   :  { %v3721_v29 = vsub.f32 1.0, %v5426_v24  ;;  %v3723_v17 = vmul.f32 %v5426_v24, %v7244_v10 }
0x1655   :  { %v3719_v12 = vadd.f32 %v3718_v57, %v3043_v22  ;;  %v2985_v22 = vadd.f32 %v7477_v11, %v6993_v43  ;;  %v7478_v57 = vld [vmem:[#allocation10_spill] sm:$0xff] }
0x1657   :  { %5427 = vtanh.f32 %v3719_v12  ;;  %v2987_v12 = vadd.f32 %v7478_v57, %v6998_v8 }
0x1661   :  { %v5428_v25 = vpop.eup %5427 }
0x1662   :  { %v3722_v60 = vmul.f32 %v5428_v25, %v3721_v29 }
0x1664   :  { %v7291_v49 = vadd.f32 %v3723_v17, %v3722_v60 }
0x1666   :  { %v3725_v6 = vpack.c.bf16 %v7291_v49, %v7291_v49 }
0x1668   :  { %3759 = vmatmul.mubr.bf16.vlgmr.msra.gmra.mrb[124].mxu0 %v3725_v6  ;;  %4982 = vmatmul.mubr.bf16.vlgmr.msra.gmra.mrb[116].mxu1 %v3725_v6 }
0x1669   :  { %3831 = vmatpush1.bf16.msra.mxu0 %v5462_v0  ;;  %4986 = vmatpush3.bf16.msra.mxu1 %v5463_v16 }
0x166a   :  { %3832 = vmatprep.subr.bf16.mxu0 %v5464_v15  ;;  %4987 = vmatprep.subr.bf16.mxu1 %v7446_v53 }
0x166b   :  { %3862 = vmatprep.mubr.bf16.mxu0 %v7447_v54  ;;  %5001 = vmatprep.mubr.msk.bf16.mxu1 %vm5474_vm5, %v7446_v53  ;;  %v5468_v54 = vld [vmem:[%s7415_s14 + $0x30] ss:$12 sps:$4 sm:$0xff]  }
0x166d   :  { %3833 = vmatpush1.bf16.msra.mxu0 %v5465_v48  ;;  %4988 = vmatpush3.bf16.msra.mxu1 %v5466_v1 }
0x166e   :  { %3834 = vmatprep.subr.bf16.mxu0 %v5467_v27  ;;  %4989 = vmatprep.subr.bf16.mxu1 %v7446_v53 }
0x1671   :  { %3835 = vmatpush1.bf16.msra.mxu0 %v5468_v54  ;;  %4990 = vmatpush3.bf16.msra.mxu1 %v5469_v46 }
0x1672   :  { %3836 = vmatprep.subr.bf16.mxu0 %v6886_v39  ;;  %4991 = vmatprep.subr.bf16.mxu1 %v7446_v53  ;;  %v7474_v39 = vld [vmem:[#allocation7_spill] sm:$0xff] }
0x1675   :  { %3837 = vmatpush1.bf16.msra.mxu0 %v6891_v40  ;;  %4992 = vmatpush3.bf16.msra.mxu1 %v6897_v41  ;;  %v2981_v40 = vadd.f32 %v7474_v39, %v6993_v43  ;;  %v7475_v41 = vld [vmem:[#allocation6_spill] sm:$0xff] }
0x1676   :  { %3838 = vmatprep.subr.bf16.mxu0 %v6905_v42  ;;  %4993 = vmatprep.subr.bf16.mxu1 %v7446_v53  ;;  %v2983_v42 = vadd.f32 %v7475_v41, %v6998_v8  ;;  %v5470_v8 = vld [vmem:[%s7417_s16] ss:$0 sm:$0xff] }
0x1679   :  { %3839 = vmatpush1.bf16.msra.mxu0 %v6910_v20  ;;  %4994 = vmatpush3.bf16.msra.mxu1 %v6916_v9 }
0x167a   :  { %3840 = vmatprep.subr.bf16.mxu0 %v6923_v19  ;;  %4995 = vmatprep.subr.bf16.mxu1 %v7446_v53 }
0x167d   :  { %3841 = vmatpush1.bf16.msra.mxu0 %v6928_v59  ;;  %4996 = vmatpush3.bf16.msra.mxu1 %v6934_v18 }
0x167e   :  { %3842 = vmatprep.subr.bf16.mxu0 %v6939_v62  ;;  %4997 = vmatprep.subr.bf16.mxu1 %v7446_v53 }
0x1681   :  { %3843 = vmatpush1.bf16.msra.mxu0 %v6947_v52  ;;  %4998 = vmatpush3.bf16.msra.mxu1 %v6954_v2 }
0x1682   :  { %3844 = vmatprep.subr.bf16.mxu0 %v6959_v47  ;;  %4999 = vmatprep.subr.bf16.mxu1 %v7446_v53 }
0x1685   :  { %3845 = vmatpush1.bf16.msra.mxu0 %v6966_v55  ;;  %5000 = vmatpush3.bf16.msra.mxu1 %v6973_v26 }
0x1686   :  { %5005 = vmatprep.subr.bf16.mxu0 %v7446_v53 }
0x173b   :  { %v3760_v20 = vpop.f32.mrb[124].mxu0  ;;  %v3801_v9 = vpop.f32.mrb[116].mxu1 }
0x173c   :  { %v3807_v19 = vadd.f32 %v3760_v20, %v2981_v40  ;;  %v3762_v59 = vpop.f32.mrb[125].mxu0  ;;  %v4983_v18 = vpop.f32.mrb[117].mxu1  ;;  %v3821_v56 = vadd.f32 %v7033_v13, %v3801_v9  ;;  %v5201_v13 = vld [vmem:[%s7418_s17] sm:$0xff]  }
0x173d   :  { %v3814_v62 = vadd.f32 %v3762_v59, %v2983_v42  ;;  %v3764_v52 = vpop.f32.mrb[126].mxu0  ;;  %v3804_v2 = vpop.f32.mrb[118].mxu1  ;;  %v7479_v40 = vld [vmem:[#allocation11_spill] sm:$0xff] }
0x173e   :  { %v4245_v47 = vmul.f32 -1.442695, %v3807_v19  ;;  %v3765_v55 = vpop.f32.mrb[127].mxu0  ;;  %v4984_v63 = vpop.f32.mrb[119].mxu1  ;;  %v3051_v41 = vadd.f32 %v7479_v40, %v7028_v51 }
0x173f   :  { %v4246_v26 = vmul.f32 -1.442695, %v3814_v62 }
0x1740   :  { %5429 = vpow2.f32 %v4245_v47  ;;  %v4249_v47 = vld [vmem:[%s7419_s18] ss:$0 sm:$0xff] }
0x1741   :  { %5431 = vpow2.f32 %v4246_v26 }
0x174a   :  { %v5430_v14 = vpop.eup %5429 }
0x174b   :  { %v3811_v58 = vadd.f32 1.0, %v5430_v14  ;;  %v5432_v44 = vpop.eup %5431 }
0x174c   :  { %v3818_v10 = vadd.f32 1.0, %v5432_v44 }
0x174d   :  { %5433 = vrcp.f32 %v3811_v58 }
0x174e   :  { %5435 = vrcp.f32 %v3818_v10 }
0x1757   :  { %v5434_v31 = vpop.eup %5433 }
0x1758   :  { %v3822_v34 = vmul.f32 %v5434_v31, %v3821_v56  ;;  %v5436_v36 = vpop.eup %5435 }
0x1759   :  { %v3825_v37 = vsub.f32 1.0, %v5436_v36  ;;  %v3827_v5 = vmul.f32 %v5436_v36, %v7291_v49 }
0x175a   :  { %v3823_v35 = vadd.f32 %v3822_v34, %v3048_v33 }
0x175c   :  { %5437 = vtanh.f32 %v3823_v35 }
0x1766   :  { %v5438_v38 = vpop.eup %5437 }
0x1767   :  { %v3826_v21 = vmul.f32 %v5438_v38, %v3825_v37 }
0x1769   :  { %v3828_v50 = vadd.f32 %v3827_v5, %v3826_v21 }
0x176b   :  { %v3829_v4 = vpack.c.bf16 %v3828_v50, %v3828_v50 }
0x176d   :  { %3863 = vmatmul.mubr.bf16.vlgmr.msra.gmra.mrb[128].mxu0 %v3829_v4  ;;  %5002 = vmatmul.mubr.bf16.vlgmr.msra.gmra.mrb[120].mxu1 %v3829_v4 }
0x176e   :  { %5021 = vmatprep.mubr.msk.bf16.mxu0 %vm5474_vm5, %v7446_v53  ;;  %5006 = vmatpush3.bf16.msra.mxu0 %v5201_v13 }
0x176f   :  { %5007 = vmatprep.subr.bf16.mxu0 %v7446_v53 }
0x1772   :  { %5008 = vmatpush3.bf16.msra.mxu0 %v5202_v28 }
0x1773   :  { %5009 = vmatprep.subr.bf16.mxu0 %v7446_v53 }
0x1776   :  { %5010 = vmatpush3.bf16.msra.mxu0 %v5203_v30 }
0x1777   :  { %5011 = vmatprep.subr.bf16.mxu0 %v7446_v53 }
0x177a   :  { %5012 = vmatpush3.bf16.msra.mxu0 %v5204_v23 }
0x177b   :  { %5013 = vmatprep.subr.bf16.mxu0 %v7446_v53 }
0x177e   :  { %5014 = vmatpush3.bf16.msra.mxu0 %v5205_v3 }
0x177f   :  { %5015 = vmatprep.subr.bf16.mxu0 %v7446_v53 }
0x1782   :  { %5016 = vmatpush3.bf16.msra.mxu0 %v5206_v61 }
0x1783   :  { %5017 = vmatprep.subr.bf16.mxu0 %v7446_v53 }
0x1786   :  { %5018 = vmatpush3.bf16.msra.mxu0 %v5207_v7 }
0x1787   :  { %5019 = vmatprep.subr.bf16.mxu0 %v7446_v53 }
0x178a   :  { %5020 = vmatpush3.bf16.msra.mxu0 %v5208_v45 }
0x1840   :  { %v3864_v24 = vpop.f32.mrb[128].mxu0  ;;  %v3905_v29 = vpop.f32.mrb[120].mxu1 }
0x1841   :  { %v3911_v25 = vadd.f32 %v3864_v24, %v2985_v22  ;;  %v3866_v60 = vpop.f32.mrb[129].mxu0  ;;  %v5003_v17 = vpop.f32.mrb[121].mxu1  ;;  %v3925_v46 = vadd.f32 %v5470_v8, %v3905_v29 }
0x1842   :  { %v3918_v49 = vadd.f32 %v3866_v60, %v2987_v12  ;;  %v3868_v6 = vpop.f32.mrb[130].mxu0  ;;  %v3908_v0 = vpop.f32.mrb[122].mxu1 }
0x1843   :  { %v4247_v16 = vmul.f32 -1.442695, %v3911_v25  ;;  %v3869_v15 = vpop.f32.mrb[131].mxu0  ;;  %v5004_v48 = vpop.f32.mrb[123].mxu1 }
0x1844   :  { %v4248_v53 = vmul.f32 -1.442695, %v3918_v49 }
0x1845   :  { %5439 = vpow2.f32 %v4247_v16 }
0x1846   :  { %5441 = vpow2.f32 %v4248_v53 }
0x184f   :  { %v5440_v1 = vpop.eup %5439 }
0x1850   :  { %v3915_v27 = vadd.f32 1.0, %v5440_v1  ;;  %v5442_v43 = vpop.eup %5441 }
0x1851   :  { %v3922_v54 = vadd.f32 1.0, %v5442_v43 }
0x1852   :  { %5443 = vrcp.f32 %v3915_v27 }
0x1853   :  { %5445 = vrcp.f32 %v3922_v54 }
0x185c   :  { %v5444_v39 = vpop.eup %5443 }
0x185d   :  { %v3926_v42 = vmul.f32 %v5444_v39, %v3925_v46  ;;  %v5446_v9 = vpop.eup %5445 }
0x185e   :  { %v3929_v19 = vsub.f32 1.0, %v5446_v9  ;;  %v3931_v62 = vmul.f32 %v5446_v9, %v3828_v50 }
0x185f   :  { %v3927_v20 = vadd.f32 %v3926_v42, %v3051_v41 }
0x1861   :  { %5447 = vtanh.f32 %v3927_v20 }
0x186b   :  { %v5448_v59 = vpop.eup %5447 }
0x186c   :  { %v3930_v18 = vmul.f32 %v5448_v59, %v3929_v19 }
0x186e   :  { %v3932_v52 = vadd.f32 %v3931_v62, %v3930_v18 }
0x1870   :  { %v3933_v2 = vpack.c.bf16 %v3932_v52, %v3932_v52 }
0x1872   :  { %5022 = vmatmul.mubr.bf16.vlgmr.msra.gmra.mrb[132].mxu0 %v3933_v2 }
0x1945   :  { %v4039_v55 = vpop.f32.mrb[132].mxu0 }
0x1946   :  { %v4040_v63 = vadd.f32 %v4249_v47, %v4039_v55  ;;  %v5023_v26 = vpop.f32.mrb[133].mxu0 }
0x1947   :  { %v4042_v51 = vpop.f32.mrb[134].mxu0 }
0x1948   :  { %4045 = vst [vmem:[%s7420_s19] sm:$0xff] %v4040_v63  ;;  %v5024_v14 = vpop.f32.mrb[135].mxu0 }

</bundles_post_ra>
